<compile_context>
chip_gen: v7x
topology: tpu7x:2x2x1
jax: 0.10.0
libtpu: 0.0.40
codegen_flags: <defaults>
</compile_context>

<pallas_src>
import functools

import jax
import jax.numpy as jnp
from jax import lax
from jax.experimental import pallas as pl
from jax.experimental.pallas import tpu as pltpu


def _round_up(x, m):
    return (x + m - 1) // m * m


# ----------------------- single-K-step tiled matmul kernel -------------------

def _mm_scale_kernel(x_ref, w_ref, scale_ref, o_ref):
    # Full K in one grid step: no accumulator scratch, no pl.when init/finalize.
    acc = jnp.dot(x_ref[...], w_ref[...], preferred_element_type=jnp.float32)
    o_ref[...] = (acc * scale_ref[...]).astype(o_ref.dtype)


def matmul_scale(x, w, scale, *, out_dtype=jnp.float32, tm=256, tn=256):
    """cols = (x @ w) * scale, bf16 MXU operands, f32 result, single K step."""
    M, K = x.shape
    K2, N = w.shape
    assert K == K2
    Kp = _round_up(K, 128)
    tm = min(tm, _round_up(M, 16))      # bf16 sublane packing: multiples of 16
    tn = min(tn, _round_up(N, 128))     # lane-dense stores
    # v7x megacore: if the parallel (M, N) grid would be a single tile, split a
    # dimension so both TensorCores get work.
    if _round_up(M, tm) == tm and _round_up(N, tn) == tn:
        if tn >= 256:
            tn = 128
        elif tm >= 32:
            tm = _round_up(tm // 2, 16)
    Mp, Np = _round_up(M, tm), _round_up(N, tn)

    xp = jnp.pad(x.astype(jnp.bfloat16), ((0, Mp - M), (0, Kp - K)))
    wp = jnp.pad(w.astype(jnp.bfloat16), ((0, Kp - K), (0, Np - N)))
    sp = jnp.pad(scale.reshape(1, N).astype(jnp.float32), ((0, 0), (0, Np - N)))

    grid = (Mp // tm, Np // tn)
    cost = pl.CostEstimate(
        flops=2 * Mp * Np * Kp,
        transcendentals=0,
        bytes_accessed=2 * (Mp * Kp + Kp * Np) + 4 * Np
        + jnp.dtype(out_dtype).itemsize * Mp * Np)

    out = pl.pallas_call(
        _mm_scale_kernel,
        grid=grid,
        out_shape=jax.ShapeDtypeStruct((Mp, Np), out_dtype),
        in_specs=[
            pl.BlockSpec((tm, Kp), lambda i, j: (i, 0)),
            # TODO(synk): pipeline_mode=pl.Buffered(3) on the weight stream could
            # hide a bit more exposed HBM latency on v6e now that the grid is short.
            pl.BlockSpec((Kp, tn), lambda i, j: (0, j)),
            pl.BlockSpec((1, tn), lambda i, j: (0, j)),
        ],
        out_specs=pl.BlockSpec((tm, tn), lambda i, j: (i, j)),
        compiler_params=pltpu.CompilerParams(
            dimension_semantics=("parallel", "parallel"),
            vmem_limit_bytes=32 * 1024 * 1024),
        cost_estimate=cost,
    )(xp, wp, sp)
    return out[:M, :N]


# ------------------------- fused self-attention kernel -----------------------

def _self_attention_kernel(gamma_ref, x_ref, wq_ref, wk_ref, wv_ref,
                           bq_ref, bk_ref, bv_ref, out_ref, attn_ref, *, n_valid):
    x = x_ref[0]                                                  # (NP, C) bf16
    # q/k/v 1x1 projections while x is VMEM-resident; single bf16 cast each.
    q = (jnp.dot(x, wq_ref[...], preferred_element_type=jnp.float32)
         + bq_ref[...]).astype(jnp.bfloat16)                      # (NP, Cq)
    k = (jnp.dot(x, wk_ref[...], preferred_element_type=jnp.float32)
         + bk_ref[...]).astype(jnp.bfloat16)                      # (NP, Cq)
    v = (jnp.dot(x, wv_ref[...], preferred_element_type=jnp.float32)
         + bv_ref[...]).astype(jnp.bfloat16)                      # (NP, C)
    # energy[i, j] = <q_i, k_j>  (contract last dims -> no explicit transpose)
    energy = lax.dot_general(q, k, (((1,), (1,)), ((), ())),
                             preferred_element_type=jnp.float32)  # (NP, NP)
    col = lax.broadcasted_iota(jnp.int32, energy.shape, 1)
    energy = jnp.where(col < n_valid, energy, -1e30)              # mask padded keys
    m = jnp.max(energy, axis=-1, keepdims=True)
    e = jnp.exp(energy - m)
    attn = e / jnp.sum(e, axis=-1, keepdims=True)                 # exact softmax, f32
    out = jnp.dot(attn.astype(jnp.bfloat16), v,
                  preferred_element_type=jnp.float32)             # (NP, C)
    gamma = gamma_ref[0]
    out_ref[0] = (gamma * out + x.astype(jnp.float32)).astype(out_ref.dtype)
    attn_ref[0] = attn.astype(attn_ref.dtype)                     # lane-dense store


def self_attention_pallas(feats, wq, bq, wk, bk, wv, bv, gamma):
    """feats: (B, N, C) -> (out (B, N, C) bf16, attention (B, N, N) f32)."""
    B, N, C = feats.shape
    Cq = wq.shape[1]
    NP = _round_up(N, 128)   # pad tokens so every load/store is lane/sublane dense
    feats_p = jnp.pad(feats.astype(jnp.bfloat16), ((0, 0), (0, NP - N), (0, 0)))
    kernel = functools.partial(_self_attention_kernel, n_valid=N)
    out, attn = pl.pallas_call(
        kernel,
        grid=(B,),
        out_shape=(jax.ShapeDtypeStruct((B, NP, C), jnp.bfloat16),
                   jax.ShapeDtypeStruct((B, NP, NP), jnp.float32)),
        in_specs=[
            pl.BlockSpec(memory_space=pltpu.MemorySpace.SMEM),     # gamma scalar
            pl.BlockSpec((1, NP, C), lambda b: (b, 0, 0)),
            pl.BlockSpec((C, Cq), lambda b: (0, 0)),
            pl.BlockSpec((C, Cq), lambda b: (0, 0)),
            pl.BlockSpec((C, C), lambda b: (0, 0)),
            pl.BlockSpec((1, Cq), lambda b: (0, 0)),
            pl.BlockSpec((1, Cq), lambda b: (0, 0)),
            pl.BlockSpec((1, C), lambda b: (0, 0)),
        ],
        out_specs=(
            pl.BlockSpec((1, NP, C), lambda b: (b, 0, 0)),
            pl.BlockSpec((1, NP, NP), lambda b: (b, 0, 0)),
        ),
        compiler_params=pltpu.CompilerParams(
            dimension_semantics=("parallel",),
            vmem_limit_bytes=32 * 1024 * 1024),
    )(gamma, feats_p, wq, wk, wv, bq, bk, bv)
    return out[:, :N, :], attn[:, :N, :N]


# ------------------------------ JAX glue --------------------------------------

def _col2im_add(cols, *, stride, pad):
    """Overlap-add of per-tap GEMM outputs. cols: (B, H, W, kh, kw, Cout) f32."""
    B, H, W, kh, kw, Cout = cols.shape
    Hup, Wup = (H - 1) * stride + kh, (W - 1) * stride + kw
    y = jnp.zeros((B, Hup, Wup, Cout), cols.dtype)
    for i in range(kh):
        for j in range(kw):
            y = y.at[:, i:i + (H - 1) * stride + 1:stride,
                        j:j + (W - 1) * stride + 1:stride, :].add(cols[:, :, :, i, j, :])
    Ho = (H - 1) * stride - 2 * pad + kh
    Wo = (W - 1) * stride - 2 * pad + kw
    return y[:, pad:pad + Ho, pad:pad + Wo, :]


def conv_transpose2d_pallas(x_nhwc, w_iohw, *, stride, pad, scale=None, shift=None,
                            activation=None, out_dtype=jnp.float32):
    """ConvTranspose2d (bias-free) in scatter-GEMM form.

    cols = x @ W.reshape(Cin, kh*kw*Cout) on the Pallas MXU kernel (BN scale
    fused per-channel), then a small col2im overlap-add.  BN shift + activation
    are applied after the overlap-add because kernel taps overlap.
    """
    Cin, Cout, kh, kw = w_iohw.shape
    B, H, W, C = x_nhwc.shape
    assert C == Cin
    x2d = x_nhwc.reshape(B * H * W, Cin)
    # N layout = (kh, kw, Cout): the lane axis stays the channel axis per tap.
    w_mat = jnp.transpose(w_iohw, (0, 2, 3, 1)).reshape(Cin, kh * kw * Cout)
    if scale is None:
        scale = jnp.ones((Cout,), jnp.float32)
    scale_n = jnp.tile(scale.astype(jnp.float32), kh * kw)
    cols = matmul_scale(x2d, w_mat, scale_n, out_dtype=jnp.float32)
    cols = cols.reshape(B, H, W, kh, kw, Cout)
    y = _col2im_add(cols, stride=stride, pad=pad)
    # TODO(synk): col2im overlap-add + shift/activation are XLA glue (small arrays).
    if shift is not None:
        y = y + shift
    if activation == "relu":
        y = jnp.maximum(y, 0.0)
    elif activation == "tanh":
        y = jnp.tanh(y)
    return y.astype(out_dtype)


def spectral_normalize(w, key, n_iter=5):
    """w / sigma_max(w.reshape(dim0, -1)) via power iteration (setup-time glue)."""
    w_mat = w.reshape(w.shape[0], -1)
    u = jax.random.normal(key, (w_mat.shape[0],), jnp.float32)
    u = u / (jnp.linalg.norm(u) + 1e-12)
    v = None
    for _ in range(n_iter):
        v = w_mat.T @ u
        v = v / (jnp.linalg.norm(v) + 1e-12)
        u = w_mat @ v
        u = u / (jnp.linalg.norm(u) + 1e-12)
    sigma = u @ (w_mat @ v)
    return w / sigma


def init_params(key, z_dim, eps=1e-5):
    keys = jax.random.split(key, 32)
    params = {}
    # Three SpectralNorm(ConvTranspose2d) + BatchNorm + ReLU blocks.
    cfg = [(z_dim, 512, 3), (512, 256, 3), (256, 128, 4)]
    for li, (cin, cout, k) in enumerate(cfg):
        w = 0.05 * jax.random.normal(keys[li], (cin, cout, k, k), jnp.float32)
        w = spectral_normalize(w, keys[4 + li])
        bn_gamma = 1.0 + 0.1 * jax.random.normal(keys[8 + li], (cout,), jnp.float32)
        bn_beta = 0.1 * jax.random.normal(keys[12 + li], (cout,), jnp.float32)
        run_mean = 0.1 * jax.random.normal(keys[16 + li], (cout,), jnp.float32)
        run_var = 1.0 + 0.1 * jnp.abs(
            jax.random.normal(keys[20 + li], (cout,), jnp.float32))
        scale = bn_gamma / jnp.sqrt(run_var + eps)
        shift = bn_beta - run_mean * scale
        params[f"convt{li}"] = {"w": w, "bn_scale": scale, "bn_shift": shift}

    C = 128
    Cq = C // 8
    ka = jax.random.split(keys[24], 6)
    params["attn"] = {
        "q_w": 0.05 * jax.random.normal(ka[0], (Cq, C, 1, 1), jnp.float32),
        "q_b": 0.05 * jax.random.normal(ka[1], (Cq,), jnp.float32),
        "k_w": 0.05 * jax.random.normal(ka[2], (Cq, C, 1, 1), jnp.float32),
        "k_b": 0.05 * jax.random.normal(ka[3], (Cq,), jnp.float32),
        "v_w": 0.05 * jax.random.normal(ka[4], (C, C, 1, 1), jnp.float32),
        "v_b": 0.05 * jax.random.normal(ka[5], (C,), jnp.float32),
        "gamma": jnp.zeros((1,), jnp.float32),   # nn.Parameter(torch.zeros(1))
    }
    # last: ConvTranspose2d(128, 1, 4, stride=2, padding=1, bias=False) + Tanh
    params["last_w"] = 0.05 * jax.random.normal(keys[25], (C, 1, 4, 4), jnp.float32)
    return params


def generator_forward(params, z):
    B, z_dim = z.shape
    # z.view(B, z_dim, 1, 1) in NCHW  ==  (B, 1, 1, z_dim) in NHWC.
    h = z.reshape(B, 1, 1, z_dim)

    # gen: 3 x [SpectralNorm(ConvTranspose2d) -> BatchNorm(eval) -> ReLU]
    for li, (s, p) in enumerate([(1, 0), (2, 0), (2, 1)]):
        pr = params[f"convt{li}"]
        h = conv_transpose2d_pallas(h, pr["w"], stride=s, pad=p,
                                    scale=pr["bn_scale"], shift=pr["bn_shift"],
                                    activation="relu", out_dtype=jnp.bfloat16)

    B, Hf, Wf, C = h.shape
    a = params["attn"]
    feats = h.reshape(B, Hf * Wf, C)                                # bf16
    wq = a["q_w"][:, :, 0, 0].T.astype(jnp.bfloat16)                # (C, Cq)
    wk = a["k_w"][:, :, 0, 0].T.astype(jnp.bfloat16)
    wv = a["v_w"][:, :, 0, 0].T.astype(jnp.bfloat16)                # (C, C)
    Cq = wq.shape[1]
    bq = a["q_b"].reshape(1, Cq).astype(jnp.float32)
    bk = a["k_b"].reshape(1, Cq).astype(jnp.float32)
    bv = a["v_b"].reshape(1, C).astype(jnp.float32)

    out_attn, attention = self_attention_pallas(feats, wq, bq, wk, bk, wv, bv,
                                                a["gamma"])

    # last: ConvTranspose2d(C, 1, 4, s2, p1, bias=False) -> Tanh
    out_nhwc = out_attn.reshape(B, Hf, Wf, C)
    img = conv_transpose2d_pallas(out_nhwc, params["last_w"], stride=2, pad=1,
                                  activation="tanh", out_dtype=jnp.float32)
    img_nchw = jnp.transpose(img, (0, 3, 1, 2))                     # NCHW
    return img_nchw, attention


if __name__ == "__main__":
    key = jax.random.PRNGKey(0)
    kz, kp = jax.random.split(key)

    batch, z_dim = 2, 32
    z = jax.random.normal(kz, (batch, z_dim), jnp.float32)
    params = init_params(kp, z_dim)

    fwd = jax.jit(generator_forward)
    img, attn = fwd(params, z)
    jax.block_until_ready((img, attn))

    # 1x1 -> 3x3 -> 7x7 -> 14x14 (attention, N=196) -> 28x28 tanh image
    assert img.shape == (batch, 1, 28, 28), img.shape
    Nspat = 14 * 14
    assert attn.shape == (batch, Nspat, Nspat), attn.shape
    assert bool(jnp.all(jnp.isfinite(img)))
    assert bool(jnp.all(jnp.isfinite(attn)))
    # tanh output must lie in [-1, 1]
    assert bool(jnp.all(jnp.abs(img) <= 1.0 + 1e-5))
    # exact f32 softmax: rows sum to ~1
    row_sums = jnp.sum(attn, axis=-1)
    assert bool(jnp.allclose(row_sums, 1.0, atol=1e-3)), row_sums

    print("KERNEL_OK")
</pallas_src>

<mosaic_0001>
module attributes {stable_mosaic.version = 11 : i64} {
  func.func @_mm_scale_kernel(%arg0: i32, %arg1: i32, %arg2: memref<16x128xbf16, #tpu.memory_space<vmem>>, %arg3: memref<128x256xbf16, #tpu.memory_space<vmem>>, %arg4: memref<1x256xf32, #tpu.memory_space<vmem>>, %arg5: memref<16x256xf32, #tpu.memory_space<vmem>>) attributes {dimension_semantics = [#tpu.dimension_semantics<parallel>, #tpu.dimension_semantics<parallel>], iteration_bounds = array<i64: 1, 18>, scalar_prefetch = 0 : i64, scratch_operands = 0 : i64, tpu.core_type = #tpu.core_type<tc>, window_params = [{transform_indices = @transform_0, window_bounds = array<i64: 16, 128>}, {transform_indices = @transform_1, window_bounds = array<i64: 128, 256>}, {transform_indices = @transform_2, window_bounds = array<i64: 1, 256>}, {transform_indices = @transform_3, window_bounds = array<i64: 16, 256>}]} {
    %c0 = arith.constant 0 : index
    %c0_0 = arith.constant 0 : index
    %0 = vector.load %arg2[%c0, %c0_0] : memref<16x128xbf16, #tpu.memory_space<vmem>>, vector<16x128xbf16>
    %c0_1 = arith.constant 0 : index
    %c0_2 = arith.constant 0 : index
    %1 = vector.load %arg3[%c0_1, %c0_2] : memref<128x256xbf16, #tpu.memory_space<vmem>>, vector<128x256xbf16>
    %cst = arith.constant dense<0.000000e+00> : vector<16x256xf32>
    %2 = tpu.matmul %0, %1, %cst {dimension_numbers = #tpu.dot_dimension_numbers<[1], [0], [0], [1], [0, 0, 1, 1], [], []>} : vector<16x128xbf16>, vector<128x256xbf16>, vector<16x256xf32> -> vector<16x256xf32>
    %c0_3 = arith.constant 0 : index
    %c0_4 = arith.constant 0 : index
    %3 = vector.load %arg4[%c0_3, %c0_4] : memref<1x256xf32, #tpu.memory_space<vmem>>, vector<1x256xf32>
    %4 = vector.broadcast %3 : vector<1x256xf32> to vector<16x256xf32>
    %5 = arith.mulf %2, %4 : vector<16x256xf32>
    %c0_5 = arith.constant 0 : index
    %c0_6 = arith.constant 0 : index
    %6 = vector.load %arg5[%c0_5, %c0_6] : memref<16x256xf32, #tpu.memory_space<vmem>>, vector<16x256xf32>
    tpu.vector_store %arg5[%c0_5, %c0_6], %5 {strides = array<i32>} : memref<16x256xf32, #tpu.memory_space<vmem>>, vector<16x256xf32>,
    return
  }
  func.func @transform_0(%arg0: i32, %arg1: i32) -> (i32, i32) {
    %c0_i32 = arith.constant 0 : i32
    %c0_i32_0 = arith.constant 0 : i32
    return %arg0, %c0_i32 : i32, i32
  }
  func.func @transform_1(%arg0: i32, %arg1: i32) -> (i32, i32) {
    %c0_i32 = arith.constant 0 : i32
    %c0_i32_0 = arith.constant 0 : i32
    return %c0_i32, %arg1 : i32, i32
  }
  func.func @transform_2(%arg0: i32, %arg1: i32) -> (i32, i32) {
    %c0_i32 = arith.constant 0 : i32
    %c0_i32_0 = arith.constant 0 : i32
    return %c0_i32, %arg1 : i32, i32
  }
  func.func @transform_3(%arg0: i32, %arg1: i32) -> (i32, i32) {
    %c0_i32 = arith.constant 0 : i32
    return %arg0, %arg1 : i32, i32
  }
}

module attributes {stable_mosaic.version = 11 : i64} {
  func.func @_mm_scale_kernel(%arg0: i32, %arg1: i32, %arg2: memref<32x512xbf16, #tpu.memory_space<vmem>>, %arg3: memref<512x256xbf16, #tpu.memory_space<vmem>>, %arg4: memref<1x256xf32, #tpu.memory_space<vmem>>, %arg5: memref<32x256xf32, #tpu.memory_space<vmem>>) attributes {dimension_semantics = [#tpu.dimension_semantics<parallel>, #tpu.dimension_semantics<parallel>], iteration_bounds = array<i64: 1, 9>, scalar_prefetch = 0 : i64, scratch_operands = 0 : i64, tpu.core_type = #tpu.core_type<tc>, window_params = [{transform_indices = @transform_0, window_bounds = array<i64: 32, 512>}, {transform_indices = @transform_1, window_bounds = array<i64: 512, 256>}, {transform_indices = @transform_2, window_bounds = array<i64: 1, 256>}, {transform_indices = @transform_3, window_bounds = array<i64: 32, 256>}]} {
    %c0 = arith.constant 0 : index
    %c0_0 = arith.constant 0 : index
    %0 = vector.load %arg2[%c0, %c0_0] : memref<32x512xbf16, #tpu.memory_space<vmem>>, vector<32x512xbf16>
    %c0_1 = arith.constant 0 : index
    %c0_2 = arith.constant 0 : index
    %1 = vector.load %arg3[%c0_1, %c0_2] : memref<512x256xbf16, #tpu.memory_space<vmem>>, vector<512x256xbf16>
    %cst = arith.constant dense<0.000000e+00> : vector<32x256xf32>
    %2 = tpu.matmul %0, %1, %cst {dimension_numbers = #tpu.dot_dimension_numbers<[1], [0], [0], [1], [0, 0, 1, 1], [], []>} : vector<32x512xbf16>, vector<512x256xbf16>, vector<32x256xf32> -> vector<32x256xf32>
    %c0_3 = arith.constant 0 : index
    %c0_4 = arith.constant 0 : index
    %3 = vector.load %arg4[%c0_3, %c0_4] : memref<1x256xf32, #tpu.memory_space<vmem>>, vector<1x256xf32>
    %4 = vector.broadcast %3 : vector<1x256xf32> to vector<32x256xf32>
    %5 = arith.mulf %2, %4 : vector<32x256xf32>
    %c0_5 = arith.constant 0 : index
    %c0_6 = arith.constant 0 : index
    %6 = vector.load %arg5[%c0_5, %c0_6] : memref<32x256xf32, #tpu.memory_space<vmem>>, vector<32x256xf32>
    tpu.vector_store %arg5[%c0_5, %c0_6], %5 {strides = array<i32>} : memref<32x256xf32, #tpu.memory_space<vmem>>, vector<32x256xf32>,
    return
  }
  func.func @transform_0(%arg0: i32, %arg1: i32) -> (i32, i32) {
    %c0_i32 = arith.constant 0 : i32
    %c0_i32_0 = arith.constant 0 : i32
    return %arg0, %c0_i32 : i32, i32
  }
  func.func @transform_1(%arg0: i32, %arg1: i32) -> (i32, i32) {
    %c0_i32 = arith.constant 0 : i32
    %c0_i32_0 = arith.constant 0 : i32
    return %c0_i32, %arg1 : i32, i32
  }
  func.func @transform_2(%arg0: i32, %arg1: i32) -> (i32, i32) {
    %c0_i32 = arith.constant 0 : i32
    %c0_i32_0 = arith.constant 0 : i32
    return %c0_i32, %arg1 : i32, i32
  }
  func.func @transform_3(%arg0: i32, %arg1: i32) -> (i32, i32) {
    %c0_i32 = arith.constant 0 : i32
    return %arg0, %arg1 : i32, i32
  }
}

module attributes {stable_mosaic.version = 11 : i64} {
  func.func @_mm_scale_kernel(%arg0: i32, %arg1: i32, %arg2: memref<112x256xbf16, #tpu.memory_space<vmem>>, %arg3: memref<256x256xbf16, #tpu.memory_space<vmem>>, %arg4: memref<1x256xf32, #tpu.memory_space<vmem>>, %arg5: memref<112x256xf32, #tpu.memory_space<vmem>>) attributes {dimension_semantics = [#tpu.dimension_semantics<parallel>, #tpu.dimension_semantics<parallel>], iteration_bounds = array<i64: 1, 8>, scalar_prefetch = 0 : i64, scratch_operands = 0 : i64, tpu.core_type = #tpu.core_type<tc>, window_params = [{transform_indices = @transform_0, window_bounds = array<i64: 112, 256>}, {transform_indices = @transform_1, window_bounds = array<i64: 256, 256>}, {transform_indices = @transform_2, window_bounds = array<i64: 1, 256>}, {transform_indices = @transform_3, window_bounds = array<i64: 112, 256>}]} {
    %c0 = arith.constant 0 : index
    %c0_0 = arith.constant 0 : index
    %0 = vector.load %arg2[%c0, %c0_0] : memref<112x256xbf16, #tpu.memory_space<vmem>>, vector<112x256xbf16>
    %c0_1 = arith.constant 0 : index
    %c0_2 = arith.constant 0 : index
    %1 = vector.load %arg3[%c0_1, %c0_2] : memref<256x256xbf16, #tpu.memory_space<vmem>>, vector<256x256xbf16>
    %cst = arith.constant dense<0.000000e+00> : vector<112x256xf32>
    %2 = tpu.matmul %0, %1, %cst {dimension_numbers = #tpu.dot_dimension_numbers<[1], [0], [0], [1], [0, 0, 1, 1], [], []>} : vector<112x256xbf16>, vector<256x256xbf16>, vector<112x256xf32> -> vector<112x256xf32>
    %c0_3 = arith.constant 0 : index
    %c0_4 = arith.constant 0 : index
    %3 = vector.load %arg4[%c0_3, %c0_4] : memref<1x256xf32, #tpu.memory_space<vmem>>, vector<1x256xf32>
    %4 = vector.broadcast %3 : vector<1x256xf32> to vector<112x256xf32>
    %5 = arith.mulf %2, %4 : vector<112x256xf32>
    %c0_5 = arith.constant 0 : index
    %c0_6 = arith.constant 0 : index
    %6 = vector.load %arg5[%c0_5, %c0_6] : memref<112x256xf32, #tpu.memory_space<vmem>>, vector<112x256xf32>
    tpu.vector_store %arg5[%c0_5, %c0_6], %5 {strides = array<i32>} : memref<112x256xf32, #tpu.memory_space<vmem>>, vector<112x256xf32>,
    return
  }
  func.func @transform_0(%arg0: i32, %arg1: i32) -> (i32, i32) {
    %c0_i32 = arith.constant 0 : i32
    %c0_i32_0 = arith.constant 0 : i32
    return %arg0, %c0_i32 : i32, i32
  }
  func.func @transform_1(%arg0: i32, %arg1: i32) -> (i32, i32) {
    %c0_i32 = arith.constant 0 : i32
    %c0_i32_0 = arith.constant 0 : i32
    return %c0_i32, %arg1 : i32, i32
  }
  func.func @transform_2(%arg0: i32, %arg1: i32) -> (i32, i32) {
    %c0_i32 = arith.constant 0 : i32
    %c0_i32_0 = arith.constant 0 : i32
    return %c0_i32, %arg1 : i32, i32
  }
  func.func @transform_3(%arg0: i32, %arg1: i32) -> (i32, i32) {
    %c0_i32 = arith.constant 0 : i32
    return %arg0, %arg1 : i32, i32
  }
}

module attributes {stable_mosaic.version = 11 : i64} {
  func.func @_self_attention_kernel(%arg0: i32, %arg1: memref<1xf32, #tpu.memory_space<smem>>, %arg2: memref<1x256x128xbf16, #tpu.memory_space<vmem>>, %arg3: memref<128x16xbf16, #tpu.memory_space<vmem>>, %arg4: memref<128x16xbf16, #tpu.memory_space<vmem>>, %arg5: memref<128x128xbf16, #tpu.memory_space<vmem>>, %arg6: memref<1x16xf32, #tpu.memory_space<vmem>>, %arg7: memref<1x16xf32, #tpu.memory_space<vmem>>, %arg8: memref<1x128xf32, #tpu.memory_space<vmem>>, %arg9: memref<1x256x128xbf16, #tpu.memory_space<vmem>>, %arg10: memref<1x256x256xf32, #tpu.memory_space<vmem>>) attributes {dimension_semantics = [#tpu.dimension_semantics<parallel>], iteration_bounds = array<i64: 2>, scalar_prefetch = 0 : i64, scratch_operands = 0 : i64, tpu.core_type = #tpu.core_type<tc>, window_params = [{transform_indices = @transform_0, window_bounds = array<i64: 1>}, {transform_indices = @transform_1, window_bounds = array<i64: 1, 256, 128>}, {pipeline_mode = #tpu.pipeline_mode<synchronous>, transform_indices = @transform_2, window_bounds = array<i64: 128, 16>}, {pipeline_mode = #tpu.pipeline_mode<synchronous>, transform_indices = @transform_3, window_bounds = array<i64: 128, 16>}, {pipeline_mode = #tpu.pipeline_mode<synchronous>, transform_indices = @transform_4, window_bounds = array<i64: 128, 128>}, {pipeline_mode = #tpu.pipeline_mode<synchronous>, transform_indices = @transform_5, window_bounds = array<i64: 1, 16>}, {pipeline_mode = #tpu.pipeline_mode<synchronous>, transform_indices = @transform_6, window_bounds = array<i64: 1, 16>}, {pipeline_mode = #tpu.pipeline_mode<synchronous>, transform_indices = @transform_7, window_bounds = array<i64: 1, 128>}, {transform_indices = @transform_8, window_bounds = array<i64: 1, 256, 128>}, {transform_indices = @transform_9, window_bounds = array<i64: 1, 256, 256>}]} {
    %c0 = arith.constant 0 : index
    %c0_0 = arith.constant 0 : index
    %c0_1 = arith.constant 0 : index
    %0 = vector.load %arg2[%c0, %c0_0, %c0_1] : memref<1x256x128xbf16, #tpu.memory_space<vmem>>, vector<1x256x128xbf16>
    %1 = vector.shape_cast %0 : vector<1x256x128xbf16> to vector<256x128xbf16>
    %c0_2 = arith.constant 0 : index
    %c0_3 = arith.constant 0 : index
    %2 = vector.load %arg3[%c0_2, %c0_3] : memref<128x16xbf16, #tpu.memory_space<vmem>>, vector<128x16xbf16>
    %cst = arith.constant dense<0.000000e+00> : vector<256x16xf32>
    %3 = tpu.matmul %1, %2, %cst {dimension_numbers = #tpu.dot_dimension_numbers<[1], [0], [0], [1], [0, 0, 1, 1], [], []>} : vector<256x128xbf16>, vector<128x16xbf16>, vector<256x16xf32> -> vector<256x16xf32>
    %c0_4 = arith.constant 0 : index
    %c0_5 = arith.constant 0 : index
    %4 = vector.load %arg6[%c0_4, %c0_5] : memref<1x16xf32, #tpu.memory_space<vmem>>, vector<1x16xf32>
    %5 = vector.broadcast %4 : vector<1x16xf32> to vector<256x16xf32>
    %6 = arith.addf %3, %5 : vector<256x16xf32>
    %7 = arith.truncf %6 : vector<256x16xf32> to vector<256x16xbf16>
    %c0_6 = arith.constant 0 : index
    %c0_7 = arith.constant 0 : index
    %8 = vector.load %arg4[%c0_6, %c0_7] : memref<128x16xbf16, #tpu.memory_space<vmem>>, vector<128x16xbf16>
    %cst_8 = arith.constant dense<0.000000e+00> : vector<256x16xf32>
    %9 = tpu.matmul %1, %8, %cst_8 {dimension_numbers = #tpu.dot_dimension_numbers<[1], [0], [0], [1], [0, 0, 1, 1], [], []>} : vector<256x128xbf16>, vector<128x16xbf16>, vector<256x16xf32> -> vector<256x16xf32>
    %c0_9 = arith.constant 0 : index
    %c0_10 = arith.constant 0 : index
    %10 = vector.load %arg7[%c0_9, %c0_10] : memref<1x16xf32, #tpu.memory_space<vmem>>, vector<1x16xf32>
    %11 = vector.broadcast %10 : vector<1x16xf32> to vector<256x16xf32>
    %12 = arith.addf %9, %11 : vector<256x16xf32>
    %13 = arith.truncf %12 : vector<256x16xf32> to vector<256x16xbf16>
    %c0_11 = arith.constant 0 : index
    %c0_12 = arith.constant 0 : index
    %14 = vector.load %arg5[%c0_11, %c0_12] : memref<128x128xbf16, #tpu.memory_space<vmem>>, vector<128x128xbf16>
    %cst_13 = arith.constant dense<0.000000e+00> : vector<256x128xf32>
    %15 = tpu.matmul %1, %14, %cst_13 {dimension_numbers = #tpu.dot_dimension_numbers<[1], [0], [0], [1], [0, 0, 1, 1], [], []>} : vector<256x128xbf16>, vector<128x128xbf16>, vector<256x128xf32> -> vector<256x128xf32>
    %c0_14 = arith.constant 0 : index
    %c0_15 = arith.constant 0 : index
    %16 = vector.load %arg8[%c0_14, %c0_15] : memref<1x128xf32, #tpu.memory_space<vmem>>, vector<1x128xf32>
    %17 = vector.broadcast %16 : vector<1x128xf32> to vector<256x128xf32>
    %18 = arith.addf %15, %17 : vector<256x128xf32>
    %19 = arith.truncf %18 : vector<256x128xf32> to vector<256x128xbf16>
    %cst_16 = arith.constant dense<0.000000e+00> : vector<256x256xf32>
    %20 = tpu.matmul %7, %13, %cst_16 {dimension_numbers = #tpu.dot_dimension_numbers<[1], [1], [0], [0], [0, 0, 1, 0], [], []>} : vector<256x16xbf16>, vector<256x16xbf16>, vector<256x256xf32> -> vector<256x256xf32>
    %21 = tpu.iota {dimensions = array<i32: 1>} : vector<256x256xi32>
    %c196_i32 = arith.constant 196 : i32
    %22 = vector.broadcast %c196_i32 : i32 to vector<256x256xi32>
    %23 = arith.cmpi slt, %21, %22 : vector<256x256xi32>
    %cst_17 = arith.constant -1.000000e+30 : f32
    %24 = vector.broadcast %cst_17 : f32 to vector<256x256xf32>
    %25 = arith.select %23, %20, %24 : vector<256x256xi1>, vector<256x256xf32>
    %cst_18 = arith.constant dense<0xFF800000> : vector<256xf32>
    %26 = vector.multi_reduction <maximumf>, %25, %cst_18 [1] : vector<256x256xf32> to vector<256xf32>
    %27 = vector.shape_cast %26 : vector<256xf32> to vector<256x1xf32>
    %28 = vector.broadcast %27 : vector<256x1xf32> to vector<256x256xf32>
    %29 = arith.subf %25, %28 : vector<256x256xf32>
    %30 = math.exp %29 : vector<256x256xf32>
    %cst_19 = arith.constant dense<0.000000e+00> : vector<256xf32>
    %31 = vector.multi_reduction <add>, %30, %cst_19 [1] : vector<256x256xf32> to vector<256xf32>
    %32 = vector.shape_cast %31 : vector<256xf32> to vector<256x1xf32>
    %33 = vector.broadcast %32 : vector<256x1xf32> to vector<256x256xf32>
    %34 = arith.divf %30, %33 : vector<256x256xf32>
    %35 = arith.truncf %34 : vector<256x256xf32> to vector<256x256xbf16>
    %cst_20 = arith.constant dense<0.000000e+00> : vector<256x128xf32>
    %36 = tpu.matmul %35, %19, %cst_20 {dimension_numbers = #tpu.dot_dimension_numbers<[1], [0], [0], [1], [0, 0, 1, 1], [], []>} : vector<256x256xbf16>, vector<256x128xbf16>, vector<256x128xf32> -> vector<256x128xf32>
    %c0_21 = arith.constant 0 : index
    %37 = memref.load %arg1[%c0_21] : memref<1xf32, #tpu.memory_space<smem>>
    %38 = vector.broadcast %37 : f32 to vector<256x128xf32>
    %39 = arith.mulf %38, %36 : vector<256x128xf32>
    %40 = arith.extf %1 : vector<256x128xbf16> to vector<256x128xf32>
    %41 = arith.addf %39, %40 : vector<256x128xf32>
    %42 = arith.truncf %41 : vector<256x128xf32> to vector<256x128xbf16>
    %c0_22 = arith.constant 0 : index
    %c0_23 = arith.constant 0 : index
    %c0_24 = arith.constant 0 : index
    %43 = vector.load %arg9[%c0_22, %c0_23, %c0_24] : memref<1x256x128xbf16, #tpu.memory_space<vmem>>, vector<1x256x128xbf16>
    %44 = vector.shape_cast %43 : vector<1x256x128xbf16> to vector<256x128xbf16>
    %45 = vector.shape_cast %42 : vector<256x128xbf16> to vector<1x256x128xbf16>
    tpu.vector_store %arg9[%c0_22, %c0_23, %c0_24], %45 {strides = array<i32>} : memref<1x256x128xbf16, #tpu.memory_space<vmem>>, vector<1x256x128xbf16>,
    %c0_25 = arith.constant 0 : index
    %c0_26 = arith.constant 0 : index
    %c0_27 = arith.constant 0 : index
    %46 = vector.load %arg10[%c0_25, %c0_26, %c0_27] : memref<1x256x256xf32, #tpu.memory_space<vmem>>, vector<1x256x256xf32>
    %47 = vector.shape_cast %46 : vector<1x256x256xf32> to vector<256x256xf32>
    %48 = vector.shape_cast %34 : vector<256x256xf32> to vector<1x256x256xf32>
    tpu.vector_store %arg10[%c0_25, %c0_26, %c0_27], %48 {strides = array<i32>} : memref<1x256x256xf32, #tpu.memory_space<vmem>>, vector<1x256x256xf32>,
    return
  }
  func.func @transform_0(%arg0: i32) -> i32 {
    %c0_i32 = arith.constant 0 : i32
    %c0_i32_0 = arith.constant 0 : i32
    return %c0_i32 : i32
  }
  func.func @transform_1(%arg0: i32) -> (i32, i32, i32) {
    %c0_i32 = arith.constant 0 : i32
    %c0_i32_0 = arith.constant 0 : i32
    %c0_i32_1 = arith.constant 0 : i32
    return %arg0, %c0_i32, %c0_i32_0 : i32, i32, i32
  }
  func.func @transform_2(%arg0: i32) -> (i32, i32) {
    %c0_i32 = arith.constant 0 : i32
    %c0_i32_0 = arith.constant 0 : i32
    %c0_i32_1 = arith.constant 0 : i32
    return %c0_i32, %c0_i32_0 : i32, i32
  }
  func.func @transform_3(%arg0: i32) -> (i32, i32) {
    %c0_i32 = arith.constant 0 : i32
    %c0_i32_0 = arith.constant 0 : i32
    %c0_i32_1 = arith.constant 0 : i32
    return %c0_i32, %c0_i32_0 : i32, i32
  }
  func.func @transform_4(%arg0: i32) -> (i32, i32) {
    %c0_i32 = arith.constant 0 : i32
    %c0_i32_0 = arith.constant 0 : i32
    %c0_i32_1 = arith.constant 0 : i32
    return %c0_i32, %c0_i32_0 : i32, i32
  }
  func.func @transform_5(%arg0: i32) -> (i32, i32) {
    %c0_i32 = arith.constant 0 : i32
    %c0_i32_0 = arith.constant 0 : i32
    %c0_i32_1 = arith.constant 0 : i32
    return %c0_i32, %c0_i32_0 : i32, i32
  }
  func.func @transform_6(%arg0: i32) -> (i32, i32) {
    %c0_i32 = arith.constant 0 : i32
    %c0_i32_0 = arith.constant 0 : i32
    %c0_i32_1 = arith.constant 0 : i32
    return %c0_i32, %c0_i32_0 : i32, i32
  }
  func.func @transform_7(%arg0: i32) -> (i32, i32) {
    %c0_i32 = arith.constant 0 : i32
    %c0_i32_0 = arith.constant 0 : i32
    %c0_i32_1 = arith.constant 0 : i32
    return %c0_i32, %c0_i32_0 : i32, i32
  }
  func.func @transform_8(%arg0: i32) -> (i32, i32, i32) {
    %c0_i32 = arith.constant 0 : i32
    %c0_i32_0 = arith.constant 0 : i32
    %c0_i32_1 = arith.constant 0 : i32
    return %arg0, %c0_i32, %c0_i32_0 : i32, i32, i32
  }
  func.func @transform_9(%arg0: i32) -> (i32, i32, i32) {
    %c0_i32 = arith.constant 0 : i32
    %c0_i32_0 = arith.constant 0 : i32
    %c0_i32_1 = arith.constant 0 : i32
    return %arg0, %c0_i32, %c0_i32_0 : i32, i32, i32
  }
}

module attributes {stable_mosaic.version = 11 : i64} {
  func.func @_mm_scale_kernel(%arg0: i32, %arg1: i32, %arg2: memref<256x128xbf16, #tpu.memory_space<vmem>>, %arg3: memref<128x128xbf16, #tpu.memory_space<vmem>>, %arg4: memref<1x128xf32, #tpu.memory_space<vmem>>, %arg5: memref<256x128xf32, #tpu.memory_space<vmem>>) attributes {dimension_semantics = [#tpu.dimension_semantics<parallel>, #tpu.dimension_semantics<parallel>], iteration_bounds = array<i64: 2, 1>, scalar_prefetch = 0 : i64, scratch_operands = 0 : i64, tpu.core_type = #tpu.core_type<tc>, window_params = [{transform_indices = @transform_0, window_bounds = array<i64: 256, 128>}, {transform_indices = @transform_1, window_bounds = array<i64: 128, 128>}, {transform_indices = @transform_2, window_bounds = array<i64: 1, 128>}, {transform_indices = @transform_3, window_bounds = array<i64: 256, 128>}]} {
    %c0 = arith.constant 0 : index
    %c0_0 = arith.constant 0 : index
    %0 = vector.load %arg2[%c0, %c0_0] : memref<256x128xbf16, #tpu.memory_space<vmem>>, vector<256x128xbf16>
    %c0_1 = arith.constant 0 : index
    %c0_2 = arith.constant 0 : index
    %1 = vector.load %arg3[%c0_1, %c0_2] : memref<128x128xbf16, #tpu.memory_space<vmem>>, vector<128x128xbf16>
    %cst = arith.constant dense<0.000000e+00> : vector<256x128xf32>
    %2 = tpu.matmul %0, %1, %cst {dimension_numbers = #tpu.dot_dimension_numbers<[1], [0], [0], [1], [0, 0, 1, 1], [], []>} : vector<256x128xbf16>, vector<128x128xbf16>, vector<256x128xf32> -> vector<256x128xf32>
    %c0_3 = arith.constant 0 : index
    %c0_4 = arith.constant 0 : index
    %3 = vector.load %arg4[%c0_3, %c0_4] : memref<1x128xf32, #tpu.memory_space<vmem>>, vector<1x128xf32>
    %4 = vector.broadcast %3 : vector<1x128xf32> to vector<256x128xf32>
    %5 = arith.mulf %2, %4 : vector<256x128xf32>
    %c0_5 = arith.constant 0 : index
    %c0_6 = arith.constant 0 : index
    %6 = vector.load %arg5[%c0_5, %c0_6] : memref<256x128xf32, #tpu.memory_space<vmem>>, vector<256x128xf32>
    tpu.vector_store %arg5[%c0_5, %c0_6], %5 {strides = array<i32>} : memref<256x128xf32, #tpu.memory_space<vmem>>, vector<256x128xf32>,
    return
  }
  func.func @transform_0(%arg0: i32, %arg1: i32) -> (i32, i32) {
    %c0_i32 = arith.constant 0 : i32
    %c0_i32_0 = arith.constant 0 : i32
    return %arg0, %c0_i32 : i32, i32
  }
  func.func @transform_1(%arg0: i32, %arg1: i32) -> (i32, i32) {
    %c0_i32 = arith.constant 0 : i32
    %c0_i32_0 = arith.constant 0 : i32
    return %c0_i32, %arg1 : i32, i32
  }
  func.func @transform_2(%arg0: i32, %arg1: i32) -> (i32, i32) {
    %c0_i32 = arith.constant 0 : i32
    %c0_i32_0 = arith.constant 0 : i32
    return %c0_i32, %arg1 : i32, i32
  }
  func.func @transform_3(%arg0: i32, %arg1: i32) -> (i32, i32) {
    %c0_i32 = arith.constant 0 : i32
    return %arg0, %arg1 : i32, i32
  }
}

</mosaic_0001>

<bundles_post_ra>
// kernel: generator_forward.5
= control target key start
LH: loop header
LB: loop body
LE: loop exit
PB: predicated region body
PF: predicated region fallthrough
CT: control target
= control target key end

     0   :  { %s777_s12 = smov 0   ;;  %s779_s13 = smov 0   ;;  %s878_s0 = inlined_call_operand.vmem [shape: bf16[16,128], index: 0, kind: input, shape index: {}]   ;;  %s879_s1 = inlined_call_operand.vmem [shape: bf16[128,4608], index: 1, kind: input, shape index: {}]   ;;  %s880_s2 = inlined_call_operand.vmem [shape: f32[1,4608], index: 2, kind: input, shape index: {}]   ;;  %s881_s3 = inlined_call_operand.vmem [shape: f32[16,4608], index: 3, kind: output, shape index: {}]  }
   0x1   :  { %s781_s14 = smov 0   ;;  %s783_s15 = smov 0  }
   0x2   :  { %s785_s16 = smov 0  }
   0x3 LB: > { %s22_s17 = sadd.s32 1, %s750_s15  ;;  %s614_s18 = sadd.s32 4294967295, %s754_s16   ;;  %s754_s16 = sphi %s785_s16, %s13_s16   ;;  %s750_s15 = sphi %s783_s15, %s886_s15   ;;  %s746_s14 = sphi %s781_s14, %s885_s14   ;;  %s742_s13 = sphi %s779_s13, %s884_s13   ;;  %s738_s12 = sphi %s777_s12, %s883_s12  }
   0x4   : > { %p23_p0 = scmp.ge.s32.totalorder %s22_s17, 18  ;;  %p65_p1 = scmp.ne.s32.totalorder %s742_s13, %s738_s12 }
   0x5   : > { %p66_p2 = scmp.eq.s32.totalorder %s754_s16, 0  ;;  %p123_p4 = scmp.eq.s32.totalorder %s614_s18, 17 }
   0x6   : > { %s888_s17 = smov (%p23_p0, %s22_s17), 0  ;;  %s58_s20 = sadd.s32 1, %s742_s13 }
   0x7   : > { %p67_p3 = por %p66_p2, %p65_p1  ;;  %s55_s19 = ssub.s32 %s750_s15, %s888_s17 }
   0x8   : > { %p56_p5 = scmp.eq.s32.totalorder %s55_s19, 0  ;;  %p812_p6 = por %p123_p4, %p65_p1 }
   0x9   : > { %p618_p7 = scmp.ge.s32.totalorder %s754_s16, 18 }
   0xa   : > { %s817_s22 = scalar_select %p56_p5, %s742_s13, %s58_s20  }
   0xb   : > { %154 = sbr.rel (%p618_p7) target bundleno = 30 (0x1e), region = 20 }
  0x12   : > { %157 = sbr.rel (!%p67_p3) target bundleno = 30 (0x1e), region = 24  ;;  %s159_s23 = sand.u32 (%p67_p3), 1, %s742_s13  }
  0x13   : > { %s648_s24 = sshll.u32 (%p67_p3), %s750_s15, 3  ;;  %s619_s25 = sshll.u32 (%p67_p3), %s159_s23, 7 }
  0x14   : > { %s825_s28 = scalar_lea.vmem (%p67_p3), %s879_s1, %s648_s24  ;;  %s161_s29 = scalar_lea.vmem (%p67_p3), [#allocation2], %s619_s25 }
  0x15   : > { %v222_v0 = vld [vmem:[%s825_s28] sm:$0xff] (%p67_p3)  ;;  %v224_v1 = vld [vmem:[%s825_s28 + $0x90] sm:$0xff] (%p67_p3) }
  0x16   : > { %v226_v2 = vld [vmem:[%s825_s28 + $0x120] sm:$0xff] (%p67_p3)  ;;  %223 = vst [vmem:[%s161_s29] sm:$0xff] (%p67_p3), %v222_v0  ;;  %225 = vst [vmem:[%s161_s29 + $0x8] sm:$0xff] (%p67_p3), %v224_v1  ;;  %v228_v3 = vld [vmem:[%s825_s28 + $0x1b0] sm:$0xff] (%p67_p3) }
  0x17   : > { %227 = vst [vmem:[%s161_s29 + $0x10] sm:$0xff] (%p67_p3), %v226_v2  ;;  %v230_v4 = vld [vmem:[%s825_s28 + $0x240] sm:$0xff] (%p67_p3)  ;;  %v232_v5 = vld [vmem:[%s825_s28 + $0x2d0] sm:$0xff] (%p67_p3)  ;;  %229 = vst [vmem:[%s161_s29 + $0x18] sm:$0xff] (%p67_p3), %v228_v3 }
  0x18   : > { %231 = vst [vmem:[%s161_s29 + $0x20] sm:$0xff] (%p67_p3), %v230_v4  ;;  %233 = vst [vmem:[%s161_s29 + $0x28] sm:$0xff] (%p67_p3), %v232_v5  ;;  %v234_v6 = vld [vmem:[%s825_s28 + $0x360] sm:$0xff] (%p67_p3)  ;;  %v236_v7 = vld [vmem:[%s825_s28 + $0x3f0] sm:$0xff] (%p67_p3) }
  0x19   : > { %v238_v8 = vld [vmem:[%s825_s28 + $0x480] sm:$0xff]  ;;  %235 = vst [vmem:[%s161_s29 + $0x30] sm:$0xff] %v234_v6  ;;  %237 = vst [vmem:[%s161_s29 + $0x38] sm:$0xff] %v236_v7  ;;  %v240_v9 = vld [vmem:[%s825_s28 + $0x510] sm:$0xff] }
  0x1a   : > { %239 = vst [vmem:[%s161_s29 + $0x40] sm:$0xff] %v238_v8  ;;  %v242_v10 = vld [vmem:[%s825_s28 + $0x5a0] sm:$0xff]  ;;  %v244_v11 = vld [vmem:[%s825_s28 + $0x630] sm:$0xff]  ;;  %241 = vst [vmem:[%s161_s29 + $0x48] sm:$0xff] %v240_v9 }
  0x1b   : > { %243 = vst [vmem:[%s161_s29 + $0x50] sm:$0xff] %v242_v10  ;;  %245 = vst [vmem:[%s161_s29 + $0x58] sm:$0xff] %v244_v11  ;;  %v246_v12 = vld [vmem:[%s825_s28 + $0x6c0] sm:$0xff]  ;;  %v248_v13 = vld [vmem:[%s825_s28 + $0x750] sm:$0xff] }
  0x1c   : > { %v250_v14 = vld [vmem:[%s825_s28 + $0x7e0] sm:$0xff]  ;;  %247 = vst [vmem:[%s161_s29 + $0x60] sm:$0xff] %v246_v12  ;;  %249 = vst [vmem:[%s161_s29 + $0x68] sm:$0xff] %v248_v13  ;;  %v252_v15 = vld [vmem:[%s825_s28 + $0x870] sm:$0xff] }
  0x1d   : > { %251 = vst [vmem:[%s161_s29 + $0x70] sm:$0xff] %v250_v14  ;;  %253 = vst [vmem:[%s161_s29 + $0x78] sm:$0xff] %v252_v15 }
  0x1e PF: > { %p622_p8 = scmp.ge.s32.totalorder %s754_s16, 1  ;;  %p266_p9 = scmp.lt.s32.totalorder %s754_s16, 19 }
  0x20   : > { %p267_p10 = pnand %p622_p8, %p266_p9 }
  0x21   : > { %s273_s30 = sand.u32 (!%p267_p10), 1, %s738_s12   ;;  %v756_v16 = vmov (!%p267_p10), 0   ;;  %v715_v33 = vld [vmem:[%s878_s0] sm:$0xff] (!%p267_p10)   ;;  %s625_s8 = sshll.u32 (!%p267_p10), %s746_s14, 1  ;;  %v468_v34 = vlaneseq (!%p267_p10) }
  0x22   : > { %270 = sbr.rel (%p267_p10) target bundleno = 295 (0x127), region = 66  ;;  %s623_s4 = sshll.u32 (!%p267_p10), %s273_s30, 7  ;;  %455 = vmatprep.mubr.bf16.mxu0 (!%p267_p10), %v756_v16 }
  0x23   : > { %s275_s5 = scalar_lea.vmem (!%p267_p10), [#allocation2], %s623_s4  ;;  %p312_p11 = scmp.lt.s32.totalorder (!%p267_p10), %s625_s8, 35  ;;  %v469_v35 = vshrl.u32 (!%p267_p10), %v468_v34, 7 }
  0x24   : > { %v691_v17 = vld [vmem:[%s275_s5 + $0x4] ss:$8 sps:$4 sm:$0xff] (!%p267_p10)   ;;  %v693_v18 = vld [vmem:[%s275_s5] ss:$8 sps:$4 sm:$0xff] (!%p267_p10)   ;;  %v694_v19 = vld [vmem:[%s275_s5 + $0x14] ss:$8 sps:$4 sm:$0xff] (!%p267_p10)  }
  0x25   : > { %423 = vmatprep.subr.bf16.mxu0 (!%p267_p10), %v691_v17  ;;  %v696_v20 = vld [vmem:[%s275_s5 + $0x10] ss:$8 sps:$4 sm:$0xff] (!%p267_p10)   ;;  %v697_v21 = vld [vmem:[%s275_s5 + $0x24] ss:$8 sps:$4 sm:$0xff] (!%p267_p10)   ;;  %v699_v22 = vld [vmem:[%s275_s5 + $0x20] ss:$8 sps:$4 sm:$0xff] (!%p267_p10)  }
  0x26   : > { %424 = vmatpush1.bf16.msra.mxu0 (!%p267_p10), %v693_v18  ;;  %v700_v23 = vld [vmem:[%s275_s5 + $0x34] ss:$8 sps:$4 sm:$0xff] (!%p267_p10)   ;;  %v702_v24 = vld [vmem:[%s275_s5 + $0x30] ss:$8 sps:$4 sm:$0xff] (!%p267_p10)   ;;  %v703_v25 = vld [vmem:[%s275_s5 + $0x44] ss:$8 sps:$4 sm:$0xff] (!%p267_p10)  }
  0x27   : > { %425 = vmatprep.subr.bf16.mxu0 (!%p267_p10), %v694_v19  ;;  %v705_v26 = vld [vmem:[%s275_s5 + $0x40] ss:$8 sps:$4 sm:$0xff] (!%p267_p10)   ;;  %v706_v27 = vld [vmem:[%s275_s5 + $0x54] ss:$8 sps:$4 sm:$0xff] (!%p267_p10)   ;;  %v708_v28 = vld [vmem:[%s275_s5 + $0x50] ss:$8 sps:$4 sm:$0xff] (!%p267_p10)  }
  0x28   : > { %v709_v29 = vld [vmem:[%s275_s5 + $0x64] ss:$8 sps:$4 sm:$0xff] (!%p267_p10)   ;;  %v711_v30 = vld [vmem:[%s275_s5 + $0x60] ss:$8 sps:$4 sm:$0xff] (!%p267_p10)   ;;  %v712_v31 = vld [vmem:[%s275_s5 + $0x74] ss:$8 sps:$4 sm:$0xff] (!%p267_p10)  }
  0x29   : > { %v714_v32 = vld [vmem:[%s275_s5 + $0x70] ss:$8 sps:$4 sm:$0xff]   ;;  %s890_s8 = smov (!%p312_p11, %s625_s8), 35  ;;  %v470_v36 = vsub.s32 0, %v469_v35  ;;  %v474_v38 = vsub.s32 1, %v469_v35  ;;  %s624_s18 = sshll.u32 %s273_s30, 5 }
  0x2a   : > { %426 = vmatpush1.bf16.msra.mxu0 %v696_v20  ;;  %s314_s11 = scalar_lea.vmem %s880_s2, %s890_s8  ;;  %s303_s19 = scalar_lea.vmem [#allocation3], %s624_s18 }
  0x2b   : > { %427 = vmatprep.subr.bf16.mxu0 %v697_v21  ;;  %v466_v37 = vld [vmem:[%s314_s11] sm:$0x3]  ;;  %s649_s12 = sshll.u32 (%p812_p6), %s746_s14, 4 }
  0x2c   : > { %v471_v39 = vrot.slane %v466_v37, %v470_v36  ;;  %v475_v40 = vrot.slane %v466_v37, %v474_v38  ;;  %s498_s24 = scalar_lea.vmem (%p812_p6), %s881_s3, %s649_s12 }
  0x2e   : > { %428 = vmatpush1.bf16.msra.mxu0 %v699_v22 }
  0x2f   : > { %429 = vmatprep.subr.bf16.mxu0 %v700_v23 }
  0x32   : > { %430 = vmatpush1.bf16.msra.mxu0 %v702_v24 }
  0x33   : > { %431 = vmatprep.subr.bf16.mxu0 %v703_v25 }
  0x36   : > { %432 = vmatpush1.bf16.msra.mxu0 %v705_v26 }
  0x37   : > { %433 = vmatprep.subr.bf16.mxu0 %v706_v27 }
  0x3a   : > { %434 = vmatpush1.bf16.msra.mxu0 %v708_v28 }
  0x3b   : > { %435 = vmatprep.subr.bf16.mxu0 %v709_v29 }
  0x3e   : > { %436 = vmatpush1.bf16.msra.mxu0 %v711_v30 }
  0x3f   : > { %437 = vmatprep.subr.bf16.mxu0 %v712_v31 }
  0x42   : > { %438 = vmatpush1.bf16.msra.mxu0 %v714_v32 }
  0x45   : > { %456 = vmatmul.mubr.bf16.vlgmr.msra.gmra.mrb[0].mxu0 %v715_v33 }
 0x118   : > { %v457_v41 = vpop.f32.mrb[0].mxu0  ;;  %492 = sbr.rel (!%p812_p6) target bundleno = 295 (0x127), region = 74 }
 0x119   : > { %v478_v42 = vmul.f32 %v471_v39, %v457_v41  ;;  %v459_v43 = vpop.f32.mrb[1].mxu0 }
 0x11a   : > { %v479_v44 = vmul.f32 %v475_v40, %v459_v43  ;;  %v461_v45 = vpop.f32.mrb[2].mxu0 }
 0x11b   : > { %482 = vst [vmem:[%s303_s19] sm:$0xff] %v478_v42  ;;  %v480_v46 = vmul.f32 %v471_v39, %v461_v45  ;;  %v463_v47 = vpop.f32.mrb[3].mxu0 }
 0x11c   : > { %483 = vst [vmem:[%s303_s19 + $0x8] sm:$0xff] %v479_v44  ;;  %v481_v48 = vmul.f32 %v475_v40, %v463_v47 }
 0x11d   : > { %484 = vst [vmem:[%s303_s19 + $0x10] sm:$0xff] %v480_v46 }
 0x11e   : > { %485 = vst [vmem:[%s303_s19 + $0x18] sm:$0xff] %v481_v48 }
 0x122   : > { %v511_v49 = vld [vmem:[%s303_s19] sm:$0xff] }
 0x123   : > { %v513_v50 = vld [vmem:[%s303_s19 + $0x8] sm:$0xff]  ;;  %512 = vst [vmem:[%s498_s24] sm:$0xff] %v511_v49 }
 0x124   : > { %v515_v51 = vld [vmem:[%s303_s19 + $0x10] sm:$0xff]  ;;  %514 = vst [vmem:[%s498_s24 + $0x8] sm:$0xff] %v513_v50 }
 0x125   : > { %v517_v52 = vld [vmem:[%s303_s19 + $0x18] sm:$0xff]  ;;  %516 = vst [vmem:[%s498_s24 + $0x120] sm:$0xff] %v515_v51 }
 0x126   : > { %518 = vst [vmem:[%s498_s24 + $0x128] sm:$0xff] %v517_v52 }
 0x127 PF: > { %s13_s16 = sadd.s32 1, %s754_s16   ;;  %s883_s12 = smov %s742_s13 }
 0x128   : > { %p10_p12 = scmp.ge.s32.totalorder %s13_s16, 20   ;;  %s884_s13 = smov %s817_s22 }
 0x129   : > { %s885_s14 = smov %s750_s15  ;;  %s886_s15 = smov %s888_s17 }
 0x12a   :  { %12 = sbr.rel (!%p10_p12) target bundleno = 3 (0x3), region = 134 }

// kernel: generator_forward.6
= control target key start
LH: loop header
LB: loop body
LE: loop exit
PB: predicated region body
PF: predicated region fallthrough
CT: control target
= control target key end

     0   :  { %s1522_s12 = smov 0   ;;  %s1524_s13 = smov 0   ;;  %s1842_s0 = inlined_call_operand.vmem [shape: bf16[32,512], index: 0, kind: input, shape index: {}]   ;;  %s1843_s1 = inlined_call_operand.vmem [shape: bf16[512,2304], index: 1, kind: input, shape index: {}]   ;;  %s1844_s2 = inlined_call_operand.vmem [shape: f32[1,2304], index: 2, kind: input, shape index: {}]   ;;  %s1845_s3 = inlined_call_operand.vmem [shape: f32[32,2304], index: 3, kind: output, shape index: {}]  }
   0x1   :  { %s1526_s14 = smov 0   ;;  %s1528_s15 = smov 0  }
   0x2   :  { %s1530_s16 = smov 0  }
   0x3 LB: > { %s22_s17 = sadd.s32 1, %s1496_s15  ;;  %s1215_s18 = sadd.s32 4294967295, %s1500_s16   ;;  %s1500_s16 = sphi %s1530_s16, %s13_s16   ;;  %s1496_s15 = sphi %s1528_s15, %s1850_s15   ;;  %s1492_s14 = sphi %s1526_s14, %s1849_s14   ;;  %s1488_s13 = sphi %s1524_s13, %s1848_s13   ;;  %s1484_s12 = sphi %s1522_s12, %s1847_s12  }
   0x4   : > { %p23_p0 = scmp.ge.s32.totalorder %s22_s17, 9  ;;  %p65_p1 = scmp.ne.s32.totalorder %s1488_s13, %s1484_s12 }
   0x5   : > { %p66_p2 = scmp.eq.s32.totalorder %s1500_s16, 0  ;;  %p123_p4 = scmp.eq.s32.totalorder %s1215_s18, 8 }
   0x6   : > { %s1852_s17 = smov (%p23_p0, %s22_s17), 0  ;;  %s58_s20 = sadd.s32 1, %s1488_s13 }
   0x7   : > { %p67_p3 = por %p66_p2, %p65_p1  ;;  %s55_s19 = ssub.s32 %s1496_s15, %s1852_s17 }
   0x8   : > { %p56_p5 = scmp.eq.s32.totalorder %s55_s19, 0  ;;  %p1557_p6 = por %p123_p4, %p65_p1 }
   0x9   : > { %p1219_p7 = scmp.ge.s32.totalorder %s1500_s16, 9 }
   0xa   : > { %s1562_s22 = scalar_select %p56_p5, %s1488_s13, %s58_s20  }
   0xb   : > { %155 = sbr.rel (%p1219_p7) target bundleno = 54 (0x36), region = 20 }
  0x12   : > { %158 = sbr.rel (!%p67_p3) target bundleno = 54 (0x36), region = 24  ;;  %s160_s23 = sand.u32 (%p67_p3), 1, %s1488_s13  }
  0x13   : > { %s1304_s24 = sshll.u32 (%p67_p3), %s1496_s15, 3  ;;  %s1220_s25 = sshll.u32 (%p67_p3), %s160_s23, 9 }
  0x14   : > { %s1570_s28 = scalar_lea.vmem (%p67_p3), %s1843_s1, %s1304_s24  ;;  %s1575_s29 = scalar_lea.vmem (%p67_p3), [#allocation2], %s1220_s25 }
  0x15   : > { %v319_v0 = vld [vmem:[%s1570_s28] sm:$0xff] (%p67_p3)  ;;  %v321_v1 = vld [vmem:[%s1570_s28 + $0x48] sm:$0xff] (%p67_p3)  ;;  %v323_v2 = vld [vmem:[%s1570_s28 + $0x90] sm:$0xff] (%p67_p3) }
  0x16   : > { %320 = vst [vmem:[%s1575_s29] sm:$0xff] (%p67_p3), %v319_v0  ;;  %322 = vst [vmem:[%s1575_s29 + $0x8] sm:$0xff] (%p67_p3), %v321_v1  ;;  %v325_v3 = vld [vmem:[%s1570_s28 + $0xd8] sm:$0xff] (%p67_p3)  ;;  %v327_v4 = vld [vmem:[%s1570_s28 + $0x120] sm:$0xff] (%p67_p3) }
  0x17   : > { %324 = vst [vmem:[%s1575_s29 + $0x10] sm:$0xff] (%p67_p3), %v323_v2  ;;  %v329_v5 = vld [vmem:[%s1570_s28 + $0x168] sm:$0xff] (%p67_p3)  ;;  %326 = vst [vmem:[%s1575_s29 + $0x18] sm:$0xff] (%p67_p3), %v325_v3  ;;  %v331_v6 = vld [vmem:[%s1570_s28 + $0x1b0] sm:$0xff] (%p67_p3) }
  0x18   : > { %328 = vst [vmem:[%s1575_s29 + $0x20] sm:$0xff] (%p67_p3), %v327_v4  ;;  %330 = vst [vmem:[%s1575_s29 + $0x28] sm:$0xff] (%p67_p3), %v329_v5  ;;  %v333_v7 = vld [vmem:[%s1570_s28 + $0x1f8] sm:$0xff] (%p67_p3)  ;;  %v335_v8 = vld [vmem:[%s1570_s28 + $0x240] sm:$0xff] (%p67_p3) }
  0x19   : > { %332 = vst [vmem:[%s1575_s29 + $0x30] sm:$0xff] %v331_v6  ;;  %334 = vst [vmem:[%s1575_s29 + $0x38] sm:$0xff] %v333_v7  ;;  %v337_v9 = vld [vmem:[%s1570_s28 + $0x288] sm:$0xff]  ;;  %v339_v10 = vld [vmem:[%s1570_s28 + $0x2d0] sm:$0xff] }
  0x1a   : > { %336 = vst [vmem:[%s1575_s29 + $0x40] sm:$0xff] %v335_v8  ;;  %v341_v11 = vld [vmem:[%s1570_s28 + $0x318] sm:$0xff]  ;;  %338 = vst [vmem:[%s1575_s29 + $0x48] sm:$0xff] %v337_v9  ;;  %v343_v12 = vld [vmem:[%s1570_s28 + $0x360] sm:$0xff] }
  0x1b   : > { %340 = vst [vmem:[%s1575_s29 + $0x50] sm:$0xff] %v339_v10  ;;  %342 = vst [vmem:[%s1575_s29 + $0x58] sm:$0xff] %v341_v11  ;;  %v345_v13 = vld [vmem:[%s1570_s28 + $0x3a8] sm:$0xff]  ;;  %v347_v14 = vld [vmem:[%s1570_s28 + $0x3f0] sm:$0xff] }
  0x1c   : > { %344 = vst [vmem:[%s1575_s29 + $0x60] sm:$0xff] %v343_v12  ;;  %346 = vst [vmem:[%s1575_s29 + $0x68] sm:$0xff] %v345_v13  ;;  %v349_v15 = vld [vmem:[%s1570_s28 + $0x438] sm:$0xff]  ;;  %v351_v16 = vld [vmem:[%s1570_s28 + $0x480] sm:$0xff] }
  0x1d   : > { %348 = vst [vmem:[%s1575_s29 + $0x70] sm:$0xff] %v347_v14  ;;  %v353_v17 = vld [vmem:[%s1570_s28 + $0x4c8] sm:$0xff]  ;;  %350 = vst [vmem:[%s1575_s29 + $0x78] sm:$0xff] %v349_v15  ;;  %v355_v18 = vld [vmem:[%s1570_s28 + $0x510] sm:$0xff] }
  0x1e   : > { %352 = vst [vmem:[%s1575_s29 + $0x80] sm:$0xff] %v351_v16  ;;  %354 = vst [vmem:[%s1575_s29 + $0x88] sm:$0xff] %v353_v17  ;;  %v357_v19 = vld [vmem:[%s1570_s28 + $0x558] sm:$0xff]  ;;  %v359_v20 = vld [vmem:[%s1570_s28 + $0x5a0] sm:$0xff] }
  0x1f   : > { %356 = vst [vmem:[%s1575_s29 + $0x90] sm:$0xff] %v355_v18  ;;  %358 = vst [vmem:[%s1575_s29 + $0x98] sm:$0xff] %v357_v19  ;;  %v361_v21 = vld [vmem:[%s1570_s28 + $0x5e8] sm:$0xff]  ;;  %v363_v22 = vld [vmem:[%s1570_s28 + $0x630] sm:$0xff] }
  0x20   : > { %360 = vst [vmem:[%s1575_s29 + $0xa0] sm:$0xff] %v359_v20  ;;  %v365_v23 = vld [vmem:[%s1570_s28 + $0x678] sm:$0xff]  ;;  %362 = vst [vmem:[%s1575_s29 + $0xa8] sm:$0xff] %v361_v21  ;;  %v367_v24 = vld [vmem:[%s1570_s28 + $0x6c0] sm:$0xff] }
  0x21   : > { %364 = vst [vmem:[%s1575_s29 + $0xb0] sm:$0xff] %v363_v22  ;;  %366 = vst [vmem:[%s1575_s29 + $0xb8] sm:$0xff] %v365_v23  ;;  %v369_v25 = vld [vmem:[%s1570_s28 + $0x708] sm:$0xff]  ;;  %v371_v26 = vld [vmem:[%s1570_s28 + $0x750] sm:$0xff] }
  0x22   : > { %368 = vst [vmem:[%s1575_s29 + $0xc0] sm:$0xff] %v367_v24  ;;  %370 = vst [vmem:[%s1575_s29 + $0xc8] sm:$0xff] %v369_v25  ;;  %v373_v27 = vld [vmem:[%s1570_s28 + $0x798] sm:$0xff]  ;;  %v375_v28 = vld [vmem:[%s1570_s28 + $0x7e0] sm:$0xff] }
  0x23   : > { %372 = vst [vmem:[%s1575_s29 + $0xd0] sm:$0xff] %v371_v26  ;;  %v377_v29 = vld [vmem:[%s1570_s28 + $0x828] sm:$0xff]  ;;  %374 = vst [vmem:[%s1575_s29 + $0xd8] sm:$0xff] %v373_v27  ;;  %v379_v30 = vld [vmem:[%s1570_s28 + $0x870] sm:$0xff] }
  0x24   : > { %376 = vst [vmem:[%s1575_s29 + $0xe0] sm:$0xff] %v375_v28  ;;  %378 = vst [vmem:[%s1575_s29 + $0xe8] sm:$0xff] %v377_v29  ;;  %v381_v31 = vld [vmem:[%s1570_s28 + $0x8b8] sm:$0xff]  ;;  %v383_v32 = vld [vmem:[%s1570_s28 + $0x900] sm:$0xff] }
  0x25   : > { %380 = vst [vmem:[%s1575_s29 + $0xf0] sm:$0xff] %v379_v30  ;;  %382 = vst [vmem:[%s1575_s29 + $0xf8] sm:$0xff] %v381_v31  ;;  %v385_v33 = vld [vmem:[%s1570_s28 + $0x948] sm:$0xff]  ;;  %v387_v34 = vld [vmem:[%s1570_s28 + $0x990] sm:$0xff] }
  0x26   : > { %384 = vst [vmem:[%s1575_s29 + $0x100] sm:$0xff] %v383_v32  ;;  %v389_v35 = vld [vmem:[%s1570_s28 + $0x9d8] sm:$0xff]  ;;  %386 = vst [vmem:[%s1575_s29 + $0x108] sm:$0xff] %v385_v33  ;;  %v391_v36 = vld [vmem:[%s1570_s28 + $0xa20] sm:$0xff] }
  0x27   : > { %388 = vst [vmem:[%s1575_s29 + $0x110] sm:$0xff] %v387_v34  ;;  %390 = vst [vmem:[%s1575_s29 + $0x118] sm:$0xff] %v389_v35  ;;  %v393_v37 = vld [vmem:[%s1570_s28 + $0xa68] sm:$0xff]  ;;  %v395_v38 = vld [vmem:[%s1570_s28 + $0xab0] sm:$0xff] }
  0x28   : > { %392 = vst [vmem:[%s1575_s29 + $0x120] sm:$0xff] %v391_v36  ;;  %394 = vst [vmem:[%s1575_s29 + $0x128] sm:$0xff] %v393_v37  ;;  %v397_v39 = vld [vmem:[%s1570_s28 + $0xaf8] sm:$0xff]  ;;  %v399_v40 = vld [vmem:[%s1570_s28 + $0xb40] sm:$0xff] }
  0x29   : > { %396 = vst [vmem:[%s1575_s29 + $0x130] sm:$0xff] %v395_v38  ;;  %v401_v41 = vld [vmem:[%s1570_s28 + $0xb88] sm:$0xff]  ;;  %398 = vst [vmem:[%s1575_s29 + $0x138] sm:$0xff] %v397_v39  ;;  %v403_v42 = vld [vmem:[%s1570_s28 + $0xbd0] sm:$0xff] }
  0x2a   : > { %400 = vst [vmem:[%s1575_s29 + $0x140] sm:$0xff] %v399_v40  ;;  %402 = vst [vmem:[%s1575_s29 + $0x148] sm:$0xff] %v401_v41  ;;  %v405_v43 = vld [vmem:[%s1570_s28 + $0xc18] sm:$0xff]  ;;  %v407_v44 = vld [vmem:[%s1570_s28 + $0xc60] sm:$0xff] }
  0x2b   : > { %404 = vst [vmem:[%s1575_s29 + $0x150] sm:$0xff] %v403_v42  ;;  %406 = vst [vmem:[%s1575_s29 + $0x158] sm:$0xff] %v405_v43  ;;  %v409_v45 = vld [vmem:[%s1570_s28 + $0xca8] sm:$0xff]  ;;  %v411_v46 = vld [vmem:[%s1570_s28 + $0xcf0] sm:$0xff] }
  0x2c   : > { %408 = vst [vmem:[%s1575_s29 + $0x160] sm:$0xff] %v407_v44  ;;  %v413_v47 = vld [vmem:[%s1570_s28 + $0xd38] sm:$0xff]  ;;  %410 = vst [vmem:[%s1575_s29 + $0x168] sm:$0xff] %v409_v45  ;;  %v415_v48 = vld [vmem:[%s1570_s28 + $0xd80] sm:$0xff] }
  0x2d   : > { %412 = vst [vmem:[%s1575_s29 + $0x170] sm:$0xff] %v411_v46  ;;  %414 = vst [vmem:[%s1575_s29 + $0x178] sm:$0xff] %v413_v47  ;;  %v417_v49 = vld [vmem:[%s1570_s28 + $0xdc8] sm:$0xff]  ;;  %v419_v50 = vld [vmem:[%s1570_s28 + $0xe10] sm:$0xff] }
  0x2e   : > { %416 = vst [vmem:[%s1575_s29 + $0x180] sm:$0xff] %v415_v48  ;;  %418 = vst [vmem:[%s1575_s29 + $0x188] sm:$0xff] %v417_v49  ;;  %v421_v51 = vld [vmem:[%s1570_s28 + $0xe58] sm:$0xff]  ;;  %v423_v52 = vld [vmem:[%s1570_s28 + $0xea0] sm:$0xff] }
  0x2f   : > { %420 = vst [vmem:[%s1575_s29 + $0x190] sm:$0xff] %v419_v50  ;;  %v425_v53 = vld [vmem:[%s1570_s28 + $0xee8] sm:$0xff]  ;;  %422 = vst [vmem:[%s1575_s29 + $0x198] sm:$0xff] %v421_v51  ;;  %v427_v54 = vld [vmem:[%s1570_s28 + $0xf30] sm:$0xff] }
  0x30   : > { %424 = vst [vmem:[%s1575_s29 + $0x1a0] sm:$0xff] %v423_v52  ;;  %426 = vst [vmem:[%s1575_s29 + $0x1a8] sm:$0xff] %v425_v53  ;;  %v429_v55 = vld [vmem:[%s1570_s28 + $0xf78] sm:$0xff]  ;;  %v431_v56 = vld [vmem:[%s1570_s28 + $0xfc0] sm:$0xff] }
  0x31   : > { %428 = vst [vmem:[%s1575_s29 + $0x1b0] sm:$0xff] %v427_v54  ;;  %430 = vst [vmem:[%s1575_s29 + $0x1b8] sm:$0xff] %v429_v55  ;;  %v433_v57 = vld [vmem:[%s1570_s28 + $0x1008] sm:$0xff]  ;;  %v435_v58 = vld [vmem:[%s1570_s28 + $0x1050] sm:$0xff] }
  0x32   : > { %432 = vst [vmem:[%s1575_s29 + $0x1c0] sm:$0xff] %v431_v56  ;;  %v437_v59 = vld [vmem:[%s1570_s28 + $0x1098] sm:$0xff]  ;;  %434 = vst [vmem:[%s1575_s29 + $0x1c8] sm:$0xff] %v433_v57  ;;  %v439_v60 = vld [vmem:[%s1570_s28 + $0x10e0] sm:$0xff] }
  0x33   : > { %436 = vst [vmem:[%s1575_s29 + $0x1d0] sm:$0xff] %v435_v58  ;;  %438 = vst [vmem:[%s1575_s29 + $0x1d8] sm:$0xff] %v437_v59  ;;  %v441_v61 = vld [vmem:[%s1570_s28 + $0x1128] sm:$0xff]  ;;  %v443_v62 = vld [vmem:[%s1570_s28 + $0x1170] sm:$0xff] }
  0x34   : > { %440 = vst [vmem:[%s1575_s29 + $0x1e0] sm:$0xff] %v439_v60  ;;  %442 = vst [vmem:[%s1575_s29 + $0x1e8] sm:$0xff] %v441_v61  ;;  %v445_v63 = vld [vmem:[%s1570_s28 + $0x11b8] sm:$0xff] }
  0x35   : > { %444 = vst [vmem:[%s1575_s29 + $0x1f0] sm:$0xff] %v443_v62  ;;  %446 = vst [vmem:[%s1575_s29 + $0x1f8] sm:$0xff] %v445_v63 }
  0x36 PF: > { %p1223_p8 = scmp.ge.s32.totalorder %s1500_s16, 1  ;;  %p459_p9 = scmp.lt.s32.totalorder %s1500_s16, 10 }
  0x38   : > { %p460_p10 = pnand %p1223_p8, %p459_p9 }
  0x39   : > { %s466_s30 = sand.u32 (!%p460_p10), 1, %s1484_s12   ;;  %v1452_v0 = vld [vmem:[%s1842_s0 + $0x4] ss:$16 sps:$4 sm:$0xff] (!%p460_p10)   ;;  %v1455_v1 = vld [vmem:[%s1842_s0 + $0xc] ss:$16 sps:$4 sm:$0xff] (!%p460_p10)  }
  0x3a   : > { %463 = sbr.rel (%p460_p10) target bundleno = 362 (0x16a), region = 66  ;;  %s1224_s4 = sshll.u32 (!%p460_p10), %s466_s30, 9  ;;  %977 = vmatprep.mubr.bf16.mxu1 (!%p460_p10), %v1452_v0  ;;  %1030 = vmatprep.mubr.bf16.mxu0 (!%p460_p10), %v1455_v1 }
  0x3b   : > { %s1713_s9 = scalar_lea.vmem (!%p460_p10), [#allocation2], %s1224_s4  ;;  %s1226_s4 = sshll.u32 (!%p460_p10), %s1492_s14, 1 }
  0x3c   : > { %v1354_v2 = vld [vmem:[%s1713_s9 + $0x4] ss:$8 sps:$4 sm:$0xff] (!%p460_p10)   ;;  %v1358_v4 = vld [vmem:[%s1713_s9] ss:$8 sps:$4 sm:$0xff] (!%p460_p10)   ;;  %v1360_v6 = vld [vmem:[%s1713_s9 + $0x14] ss:$8 sps:$4 sm:$0xff] (!%p460_p10)  }
  0x3d   : > { %v1356_v3 = vld [vmem:[%s1713_s9 + $0x104] ss:$8 sps:$4 sm:$0xff] (!%p460_p10)   ;;  %945 = vmatprep.subr.bf16.mxu1 (!%p460_p10), %v1354_v2  ;;  %v1359_v5 = vld [vmem:[%s1713_s9 + $0x100] ss:$8 sps:$4 sm:$0xff] (!%p460_p10)   ;;  %v1362_v7 = vld [vmem:[%s1713_s9 + $0x114] ss:$8 sps:$4 sm:$0xff] (!%p460_p10)  }
  0x3e   : > { %998 = vmatprep.subr.bf16.mxu0 (!%p460_p10), %v1356_v3  ;;  %946 = vmatpush1.bf16.msra.mxu1 (!%p460_p10), %v1358_v4  ;;  %v1364_v8 = vld [vmem:[%s1713_s9 + $0x10] ss:$8 sps:$4 sm:$0xff] (!%p460_p10)   ;;  %v1366_v10 = vld [vmem:[%s1713_s9 + $0x24] ss:$8 sps:$4 sm:$0xff] (!%p460_p10)   ;;  %v1370_v12 = vld [vmem:[%s1713_s9 + $0x20] ss:$8 sps:$4 sm:$0xff] (!%p460_p10)  }
  0x3f   : > { %999 = vmatpush1.bf16.msra.mxu0 (!%p460_p10), %v1359_v5  ;;  %947 = vmatprep.subr.bf16.mxu1 (!%p460_p10), %v1360_v6  ;;  %v1365_v9 = vld [vmem:[%s1713_s9 + $0x110] ss:$8 sps:$4 sm:$0xff] (!%p460_p10)   ;;  %v1368_v11 = vld [vmem:[%s1713_s9 + $0x124] ss:$8 sps:$4 sm:$0xff] (!%p460_p10)   ;;  %v1371_v13 = vld [vmem:[%s1713_s9 + $0x120] ss:$8 sps:$4 sm:$0xff] (!%p460_p10)  }
  0x40   : > { %1000 = vmatprep.subr.bf16.mxu0 (!%p460_p10), %v1362_v7  ;;  %v1372_v14 = vld [vmem:[%s1713_s9 + $0x34] ss:$8 sps:$4 sm:$0xff] (!%p460_p10)   ;;  %v1376_v16 = vld [vmem:[%s1713_s9 + $0x30] ss:$8 sps:$4 sm:$0xff] (!%p460_p10)   ;;  %v1378_v18 = vld [vmem:[%s1713_s9 + $0x44] ss:$8 sps:$4 sm:$0xff] (!%p460_p10)  }
  0x41   : > { %v1374_v15 = vld [vmem:[%s1713_s9 + $0x134] ss:$8 sps:$4 sm:$0xff]   ;;  %v1377_v17 = vld [vmem:[%s1713_s9 + $0x130] ss:$8 sps:$4 sm:$0xff]   ;;  %v1380_v19 = vld [vmem:[%s1713_s9 + $0x144] ss:$8 sps:$4 sm:$0xff]  }
  0x42   : > { %948 = vmatpush1.bf16.msra.mxu1 %v1364_v8  ;;  %v1382_v20 = vld [vmem:[%s1713_s9 + $0x40] ss:$8 sps:$4 sm:$0xff]   ;;  %v1384_v22 = vld [vmem:[%s1713_s9 + $0x54] ss:$8 sps:$4 sm:$0xff]   ;;  %v1388_v24 = vld [vmem:[%s1713_s9 + $0x50] ss:$8 sps:$4 sm:$0xff]   ;;  %v1053_v8 = vlaneseq }
  0x43   : > { %1001 = vmatpush1.bf16.msra.mxu0 %v1365_v9  ;;  %949 = vmatprep.subr.bf16.mxu1 %v1366_v10  ;;  %v1383_v21 = vld [vmem:[%s1713_s9 + $0x140] ss:$8 sps:$4 sm:$0xff]   ;;  %v1386_v23 = vld [vmem:[%s1713_s9 + $0x154] ss:$8 sps:$4 sm:$0xff]   ;;  %v1389_v25 = vld [vmem:[%s1713_s9 + $0x150] ss:$8 sps:$4 sm:$0xff]  }
  0x44   : > { %1002 = vmatprep.subr.bf16.mxu0 %v1368_v11  ;;  %v1390_v26 = vld [vmem:[%s1713_s9 + $0x64] ss:$8 sps:$4 sm:$0xff]   ;;  %v1394_v28 = vld [vmem:[%s1713_s9 + $0x60] ss:$8 sps:$4 sm:$0xff]   ;;  %v1396_v30 = vld [vmem:[%s1713_s9 + $0x74] ss:$8 sps:$4 sm:$0xff]  }
  0x45   : > { %v1392_v27 = vld [vmem:[%s1713_s9 + $0x164] ss:$8 sps:$4 sm:$0xff]   ;;  %v1395_v29 = vld [vmem:[%s1713_s9 + $0x160] ss:$8 sps:$4 sm:$0xff]   ;;  %v1398_v31 = vld [vmem:[%s1713_s9 + $0x174] ss:$8 sps:$4 sm:$0xff]  }
  0x46   : > { %950 = vmatpush1.bf16.msra.mxu1 %v1370_v12  ;;  %v1400_v32 = vld [vmem:[%s1713_s9 + $0x70] ss:$8 sps:$4 sm:$0xff]   ;;  %v1402_v34 = vld [vmem:[%s1713_s9 + $0x84] ss:$8 sps:$4 sm:$0xff]   ;;  %v1406_v36 = vld [vmem:[%s1713_s9 + $0x80] ss:$8 sps:$4 sm:$0xff]  }
  0x47   : > { %1003 = vmatpush1.bf16.msra.mxu0 %v1371_v13  ;;  %951 = vmatprep.subr.bf16.mxu1 %v1372_v14  ;;  %v1401_v33 = vld [vmem:[%s1713_s9 + $0x170] ss:$8 sps:$4 sm:$0xff]   ;;  %v1404_v35 = vld [vmem:[%s1713_s9 + $0x184] ss:$8 sps:$4 sm:$0xff]   ;;  %v1407_v37 = vld [vmem:[%s1713_s9 + $0x180] ss:$8 sps:$4 sm:$0xff]  }
  0x48   : > { %1004 = vmatprep.subr.bf16.mxu0 %v1374_v15  ;;  %v1408_v38 = vld [vmem:[%s1713_s9 + $0x94] ss:$8 sps:$4 sm:$0xff]   ;;  %v1412_v40 = vld [vmem:[%s1713_s9 + $0x90] ss:$8 sps:$4 sm:$0xff]   ;;  %v1414_v42 = vld [vmem:[%s1713_s9 + $0xa4] ss:$8 sps:$4 sm:$0xff]  }
  0x49   : > { %v1410_v39 = vld [vmem:[%s1713_s9 + $0x194] ss:$8 sps:$4 sm:$0xff]   ;;  %v1413_v41 = vld [vmem:[%s1713_s9 + $0x190] ss:$8 sps:$4 sm:$0xff]   ;;  %v1416_v43 = vld [vmem:[%s1713_s9 + $0x1a4] ss:$8 sps:$4 sm:$0xff]  }
  0x4a   : > { %952 = vmatpush1.bf16.msra.mxu1 %v1376_v16  ;;  %v1418_v44 = vld [vmem:[%s1713_s9 + $0xa0] ss:$8 sps:$4 sm:$0xff]   ;;  %v1420_v46 = vld [vmem:[%s1713_s9 + $0xb4] ss:$8 sps:$4 sm:$0xff]   ;;  %v1424_v48 = vld [vmem:[%s1713_s9 + $0xb0] ss:$8 sps:$4 sm:$0xff]  }
  0x4b   : > { %1005 = vmatpush1.bf16.msra.mxu0 %v1377_v17  ;;  %953 = vmatprep.subr.bf16.mxu1 %v1378_v18  ;;  %v1419_v45 = vld [vmem:[%s1713_s9 + $0x1a0] ss:$8 sps:$4 sm:$0xff]   ;;  %v1422_v47 = vld [vmem:[%s1713_s9 + $0x1b4] ss:$8 sps:$4 sm:$0xff]   ;;  %v1425_v49 = vld [vmem:[%s1713_s9 + $0x1b0] ss:$8 sps:$4 sm:$0xff]  }
  0x4c   : > { %1006 = vmatprep.subr.bf16.mxu0 %v1380_v19  ;;  %v1426_v50 = vld [vmem:[%s1713_s9 + $0xc4] ss:$8 sps:$4 sm:$0xff]   ;;  %v1430_v52 = vld [vmem:[%s1713_s9 + $0xc0] ss:$8 sps:$4 sm:$0xff]   ;;  %v1432_v54 = vld [vmem:[%s1713_s9 + $0xd4] ss:$8 sps:$4 sm:$0xff]  }
  0x4d   : > { %v1428_v51 = vld [vmem:[%s1713_s9 + $0x1c4] ss:$8 sps:$4 sm:$0xff]   ;;  %v1431_v53 = vld [vmem:[%s1713_s9 + $0x1c0] ss:$8 sps:$4 sm:$0xff]   ;;  %v1434_v55 = vld [vmem:[%s1713_s9 + $0x1d4] ss:$8 sps:$4 sm:$0xff]  }
  0x4e   : > { %954 = vmatpush1.bf16.msra.mxu1 %v1382_v20  ;;  %v1436_v56 = vld [vmem:[%s1713_s9 + $0xd0] ss:$8 sps:$4 sm:$0xff]   ;;  %v1438_v58 = vld [vmem:[%s1713_s9 + $0xe4] ss:$8 sps:$4 sm:$0xff]   ;;  %v1442_v60 = vld [vmem:[%s1713_s9 + $0xe0] ss:$8 sps:$4 sm:$0xff]  }
  0x4f   : > { %1007 = vmatpush1.bf16.msra.mxu0 %v1383_v21  ;;  %955 = vmatprep.subr.bf16.mxu1 %v1384_v22  ;;  %v1437_v57 = vld [vmem:[%s1713_s9 + $0x1d0] ss:$8 sps:$4 sm:$0xff]   ;;  %v1440_v59 = vld [vmem:[%s1713_s9 + $0x1e4] ss:$8 sps:$4 sm:$0xff]   ;;  %v1443_v61 = vld [vmem:[%s1713_s9 + $0x1e0] ss:$8 sps:$4 sm:$0xff]  }
  0x50   : > { %1008 = vmatprep.subr.bf16.mxu0 %v1386_v23  ;;  %v1444_v62 = vld [vmem:[%s1713_s9 + $0xf4] ss:$8 sps:$4 sm:$0xff]   ;;  %v1448_v0 = vld [vmem:[%s1713_s9 + $0xf0] ss:$8 sps:$4 sm:$0xff]   ;;  %p507_p11 = scmp.lt.s32.totalorder %s1226_s4, 17  ;;  %v1054_v9 = vshrl.u32 %v1053_v8, 7 }
  0x51   : > { %v1446_v63 = vld [vmem:[%s1713_s9 + $0x1f4] ss:$8 sps:$4 sm:$0xff]   ;;  %v1449_v1 = vld [vmem:[%s1713_s9 + $0x1f0] ss:$8 sps:$4 sm:$0xff]   ;;  %s1225_s8 = sshll.u32 %s466_s30, 6  ;;  %s1305_s12 = sshll.u32 (%p1557_p6), %s1492_s14, 4 }
  0x52   : > { %956 = vmatpush1.bf16.msra.mxu1 %v1388_v24  ;;  %v1450_v2 = vld [vmem:[%s1842_s0] ss:$16 sps:$4 sm:$0xff]   ;;  %v1453_v3 = vld [vmem:[%s1842_s0 + $0x8] ss:$16 sps:$4 sm:$0xff]   ;;  %v1456_v4 = vld [vmem:[%s1842_s0 + $0x24] ss:$16 sps:$4 sm:$0xff]   ;;  %s1091_s11 = scalar_lea.vmem (%p1557_p6), %s1845_s3, %s1305_s12 }
  0x53   : > { %1009 = vmatpush1.bf16.msra.mxu0 %v1389_v25  ;;  %957 = vmatprep.subr.bf16.mxu1 %v1390_v26  ;;  %v1458_v5 = vld [vmem:[%s1842_s0 + $0x2c] ss:$16 sps:$4 sm:$0xff]   ;;  %v1460_v6 = vld [vmem:[%s1842_s0 + $0x20] ss:$16 sps:$4 sm:$0xff]   ;;  %v1461_v7 = vld [vmem:[%s1842_s0 + $0x28] ss:$16 sps:$4 sm:$0xff]  }
  0x54   : > { %1010 = vmatprep.subr.bf16.mxu0 %v1392_v27  ;;  %s1854_s4 = smov (!%p507_p11, %s1226_s4), 17  ;;  %v1055_v10 = vsub.s32 0, %v1054_v9  ;;  %v1059_v12 = vsub.s32 1, %v1054_v9  ;;  %s1803_s9 = scalar_lea.vmem [#allocation3], %s1225_s8 }
  0x55   : > { %s509_s7 = scalar_lea.vmem %s1844_s2, %s1854_s4 }
  0x56   : > { %958 = vmatpush1.bf16.msra.mxu1 %v1394_v28  ;;  %v1051_v11 = vld [vmem:[%s509_s7] sm:$0x3] }
  0x57   : > { %1011 = vmatpush1.bf16.msra.mxu0 %v1395_v29  ;;  %959 = vmatprep.subr.bf16.mxu1 %v1396_v30  ;;  %v1056_v13 = vrot.slane %v1051_v11, %v1055_v10  ;;  %v1060_v16 = vrot.slane %v1051_v11, %v1059_v12 }
  0x58   : > { %1012 = vmatprep.subr.bf16.mxu0 %v1398_v31 }
  0x5a   : > { %960 = vmatpush1.bf16.msra.mxu1 %v1400_v32 }
  0x5b   : > { %1013 = vmatpush1.bf16.msra.mxu0 %v1401_v33  ;;  %961 = vmatprep.subr.bf16.mxu1 %v1402_v34 }
  0x5c   : > { %1014 = vmatprep.subr.bf16.mxu0 %v1404_v35 }
  0x5e   : > { %962 = vmatpush1.bf16.msra.mxu1 %v1406_v36 }
  0x5f   : > { %1015 = vmatpush1.bf16.msra.mxu0 %v1407_v37  ;;  %963 = vmatprep.subr.bf16.mxu1 %v1408_v38 }
  0x60   : > { %1016 = vmatprep.subr.bf16.mxu0 %v1410_v39 }
  0x62   : > { %964 = vmatpush1.bf16.msra.mxu1 %v1412_v40 }
  0x63   : > { %1017 = vmatpush1.bf16.msra.mxu0 %v1413_v41  ;;  %965 = vmatprep.subr.bf16.mxu1 %v1414_v42 }
  0x64   : > { %1018 = vmatprep.subr.bf16.mxu0 %v1416_v43 }
  0x66   : > { %966 = vmatpush1.bf16.msra.mxu1 %v1418_v44 }
  0x67   : > { %1019 = vmatpush1.bf16.msra.mxu0 %v1419_v45  ;;  %967 = vmatprep.subr.bf16.mxu1 %v1420_v46 }
  0x68   : > { %1020 = vmatprep.subr.bf16.mxu0 %v1422_v47 }
  0x6a   : > { %968 = vmatpush1.bf16.msra.mxu1 %v1424_v48 }
  0x6b   : > { %1021 = vmatpush1.bf16.msra.mxu0 %v1425_v49  ;;  %969 = vmatprep.subr.bf16.mxu1 %v1426_v50 }
  0x6c   : > { %1022 = vmatprep.subr.bf16.mxu0 %v1428_v51 }
  0x6e   : > { %970 = vmatpush1.bf16.msra.mxu1 %v1430_v52 }
  0x6f   : > { %1023 = vmatpush1.bf16.msra.mxu0 %v1431_v53  ;;  %971 = vmatprep.subr.bf16.mxu1 %v1432_v54 }
  0x70   : > { %1024 = vmatprep.subr.bf16.mxu0 %v1434_v55 }
  0x72   : > { %972 = vmatpush1.bf16.msra.mxu1 %v1436_v56 }
  0x73   : > { %1025 = vmatpush1.bf16.msra.mxu0 %v1437_v57  ;;  %973 = vmatprep.subr.bf16.mxu1 %v1438_v58 }
  0x74   : > { %1026 = vmatprep.subr.bf16.mxu0 %v1440_v59 }
  0x76   : > { %974 = vmatpush1.bf16.msra.mxu1 %v1442_v60 }
  0x77   : > { %1027 = vmatpush1.bf16.msra.mxu0 %v1443_v61  ;;  %975 = vmatprep.subr.bf16.mxu1 %v1444_v62 }
  0x78   : > { %1028 = vmatprep.subr.bf16.mxu0 %v1446_v63 }
  0x7a   : > { %976 = vmatpush1.bf16.msra.mxu1 %v1448_v0 }
  0x7b   : > { %1029 = vmatpush1.bf16.msra.mxu0 %v1449_v1 }
  0x7d   : > { %978 = vmatmul.mubr.bf16.vlgmr.msra.gmra.mrb[0].mxu1 %v1450_v2 }
  0x7e   : > { %1031 = vmatmul.mubr.bf16.vlgmr.msra.gmra.mrb[0].mxu0 %v1453_v3  ;;  %987 = vmatprep.mubr.bf16.mxu1 %v1456_v4 }
  0x7f   : > { %1040 = vmatprep.mubr.bf16.mxu0 %v1458_v5 }
  0x85   : > { %988 = vmatmul.mubr.bf16.gmra.mrb[4].mxu1 %v1460_v6 }
  0x86   : > { %1041 = vmatmul.mubr.bf16.gmra.mrb[4].mxu0 %v1461_v7 }
 0x150   : > { %v979_v14 = vpop.f32.mrb[0].mxu1 }
 0x151   : > { %v1032_v15 = vpop.f32.mrb[0].mxu0  ;;  %v981_v18 = vpop.f32.mrb[1].mxu1 }
 0x152   : > { %v1033_v17 = vadd.f32 %v1032_v15, %v979_v14  ;;  %v1034_v19 = vpop.f32.mrb[1].mxu0  ;;  %v983_v21 = vpop.f32.mrb[2].mxu1 }
 0x153   : > { %v1035_v20 = vadd.f32 %v1034_v19, %v981_v18  ;;  %v1036_v22 = vpop.f32.mrb[2].mxu0  ;;  %v985_v25 = vpop.f32.mrb[3].mxu1 }
 0x154   : > { %v1063_v23 = vmul.f32 %v1056_v13, %v1033_v17  ;;  %v1037_v24 = vadd.f32 %v1036_v22, %v983_v21  ;;  %v1038_v26 = vpop.f32.mrb[3].mxu0 }
 0x155   : > { %v1064_v27 = vmul.f32 %v1060_v16, %v1035_v20  ;;  %v1039_v28 = vadd.f32 %v1038_v26, %v985_v25 }
 0x156   : > { %1071 = vst [vmem:[%s1803_s9] sm:$0xff] %v1063_v23  ;;  %v1065_v29 = vmul.f32 %v1056_v13, %v1037_v24 }
 0x157   : > { %1072 = vst [vmem:[%s1803_s9 + $0x8] sm:$0xff] %v1064_v27  ;;  %v1066_v30 = vmul.f32 %v1060_v16, %v1039_v28 }
 0x158   : > { %1073 = vst [vmem:[%s1803_s9 + $0x10] sm:$0xff] %v1065_v29  ;;  %v989_v31 = vpop.f32.mrb[4].mxu1 }
 0x159   : > { %1074 = vst [vmem:[%s1803_s9 + $0x18] sm:$0xff] %v1066_v30  ;;  %v1042_v32 = vpop.f32.mrb[4].mxu0  ;;  %v991_v34 = vpop.f32.mrb[5].mxu1 }
 0x15a   : > { %v1043_v33 = vadd.f32 %v1042_v32, %v989_v31  ;;  %v1044_v35 = vpop.f32.mrb[5].mxu0  ;;  %v993_v37 = vpop.f32.mrb[6].mxu1 }
 0x15b   : > { %v1045_v36 = vadd.f32 %v1044_v35, %v991_v34  ;;  %v1046_v38 = vpop.f32.mrb[6].mxu0  ;;  %v995_v41 = vpop.f32.mrb[7].mxu1  ;;  %1085 = sbr.rel (!%p1557_p6) target bundleno = 362 (0x16a), region = 74 }
 0x15c   : > { %v1067_v39 = vmul.f32 %v1056_v13, %v1043_v33  ;;  %v1047_v40 = vadd.f32 %v1046_v38, %v993_v37  ;;  %v1048_v42 = vpop.f32.mrb[7].mxu0 }
 0x15d   : > { %v1068_v43 = vmul.f32 %v1060_v16, %v1045_v36  ;;  %v1049_v44 = vadd.f32 %v1048_v42, %v995_v41  ;;  %v1104_v47 = vld [vmem:[%s1803_s9] sm:$0xff] (%p1557_p6) }
 0x15e   : > { %1075 = vst [vmem:[%s1803_s9 + $0x20] sm:$0xff] %v1067_v39  ;;  %v1069_v45 = vmul.f32 %v1056_v13, %v1047_v40  ;;  %v1106_v48 = vld [vmem:[%s1803_s9 + $0x8] sm:$0xff] (%p1557_p6)  ;;  %1105 = vst [vmem:[%s1091_s11] sm:$0xff] (%p1557_p6), %v1104_v47 }
 0x15f   : > { %1076 = vst [vmem:[%s1803_s9 + $0x28] sm:$0xff] %v1068_v43  ;;  %v1070_v46 = vmul.f32 %v1060_v16, %v1049_v44  ;;  %v1108_v49 = vld [vmem:[%s1803_s9 + $0x10] sm:$0xff] (%p1557_p6)  ;;  %1107 = vst [vmem:[%s1091_s11 + $0x8] sm:$0xff] (%p1557_p6), %v1106_v48 }
 0x160   : > { %1077 = vst [vmem:[%s1803_s9 + $0x30] sm:$0xff] %v1069_v45  ;;  %v1110_v50 = vld [vmem:[%s1803_s9 + $0x18] sm:$0xff] (%p1557_p6)  ;;  %1109 = vst [vmem:[%s1091_s11 + $0x90] sm:$0xff] (%p1557_p6), %v1108_v49 }
 0x161   : > { %1078 = vst [vmem:[%s1803_s9 + $0x38] sm:$0xff] %v1070_v46  ;;  %1111 = vst [vmem:[%s1091_s11 + $0x98] sm:$0xff] (%p1557_p6), %v1110_v50 }
 0x165   : > { %v1112_v51 = vld [vmem:[%s1803_s9 + $0x20] sm:$0xff] }
 0x166   : > { %v1114_v52 = vld [vmem:[%s1803_s9 + $0x28] sm:$0xff]  ;;  %1113 = vst [vmem:[%s1091_s11 + $0x120] sm:$0xff] %v1112_v51 }
 0x167   : > { %1115 = vst [vmem:[%s1091_s11 + $0x128] sm:$0xff] %v1114_v52  ;;  %v1116_v53 = vld [vmem:[%s1803_s9 + $0x30] sm:$0xff] }
 0x168   : > { %v1118_v54 = vld [vmem:[%s1803_s9 + $0x38] sm:$0xff]  ;;  %1117 = vst [vmem:[%s1091_s11 + $0x1b0] sm:$0xff] %v1116_v53 }
 0x169   : > { %1119 = vst [vmem:[%s1091_s11 + $0x1b8] sm:$0xff] %v1118_v54 }
 0x16a PF: > { %s13_s16 = sadd.s32 1, %s1500_s16   ;;  %s1847_s12 = smov %s1488_s13 }
 0x16b   : > { %p10_p12 = scmp.ge.s32.totalorder %s13_s16, 11   ;;  %s1848_s13 = smov %s1562_s22 }
 0x16c   : > { %s1849_s14 = smov %s1496_s15  ;;  %s1850_s15 = smov %s1852_s17 }
 0x16d   :  { %12 = sbr.rel (!%p10_p12) target bundleno = 3 (0x3), region = 134 }

// kernel: tile.28
= control target key start
LH: loop header
LB: loop body
LE: loop exit
PB: predicated region body
PF: predicated region fallthrough
CT: control target
= control target key end

     0   :  { %s28_s0 = inlined_call_operand.vmem [shape: f32[128], index: 0, kind: input, shape index: {}]   ;;  %s29_s1 = inlined_call_operand.vmem [shape: f32[16,128], index: 1, kind: output, shape index: {}]  }
   0x1   :  { %v4_v0 = vld [vmem:[%s28_s0] ss:$0 sm:$0xff] }
   0x2   :  { %5 = vst [vmem:[%s29_s1] sm:$0xff] %v4_v0  ;;  %8 = vst [vmem:[%s29_s1 + $0x8] sm:$0xff] %v4_v0 }

// kernel: generator_forward.7
= control target key start
LH: loop header
LB: loop body
LE: loop exit
PB: predicated region body
PF: predicated region fallthrough
CT: control target
= control target key end

     0   :  { %s1273_s12 = smov 0   ;;  %s1275_s13 = smov 0   ;;  %s1617_s0 = inlined_call_operand.vmem [shape: bf16[112,256], index: 0, kind: input, shape index: {}]   ;;  %s1618_s1 = inlined_call_operand.vmem [shape: bf16[256,2048], index: 1, kind: input, shape index: {}]   ;;  %s1619_s2 = inlined_call_operand.vmem [shape: f32[1,2048], index: 2, kind: input, shape index: {}]   ;;  %s1620_s3 = inlined_call_operand.vmem [shape: f32[112,2048], index: 3, kind: output, shape index: {}]  }
   0x1   :  { %s1277_s14 = smov 0   ;;  %s1279_s15 = smov 0  }
   0x2   :  { %s1281_s16 = smov 0  }
   0x3 LB: > { %s22_s17 = sadd.s32 1, %s1247_s15  ;;  %s1008_s18 = sadd.s32 4294967295, %s1251_s16   ;;  %s1251_s16 = sphi %s1281_s16, %s13_s16   ;;  %s1247_s15 = sphi %s1279_s15, %s1625_s15   ;;  %s1243_s14 = sphi %s1277_s14, %s1624_s14   ;;  %s1239_s13 = sphi %s1275_s13, %s1623_s13   ;;  %s1235_s12 = sphi %s1273_s12, %s1622_s12  }
   0x4   : > { %p23_p0 = scmp.ge.s32.totalorder %s22_s17, 8  ;;  %p65_p1 = scmp.ne.s32.totalorder %s1239_s13, %s1235_s12 }
   0x5   : > { %p66_p2 = scmp.eq.s32.totalorder %s1251_s16, 0  ;;  %p123_p4 = scmp.eq.s32.totalorder %s1008_s18, 7 }
   0x6   : > { %s1627_s17 = smov (%p23_p0, %s22_s17), 0  ;;  %s58_s20 = sadd.s32 1, %s1239_s13 }
   0x7   : > { %p67_p3 = por %p66_p2, %p65_p1  ;;  %s55_s19 = ssub.s32 %s1247_s15, %s1627_s17 }
   0x8   : > { %p56_p5 = scmp.eq.s32.totalorder %s55_s19, 0  ;;  %p1308_p6 = por %p123_p4, %p65_p1 }
   0x9   : > { %p1012_p7 = scmp.ge.s32.totalorder %s1251_s16, 8 }
   0xa   : > { %s1313_s22 = scalar_select %p56_p5, %s1239_s13, %s58_s20  }
   0xb   : > { %155 = sbr.rel (%p1012_p7) target bundleno = 54 (0x36), region = 20 }
  0x12   : > { %158 = sbr.rel (!%p67_p3) target bundleno = 54 (0x36), region = 24  ;;  %s160_s23 = sand.u32 (%p67_p3), 1, %s1239_s13  }
  0x13   : > { %s1069_s24 = sshll.u32 (%p67_p3), %s1247_s15, 3  ;;  %s1013_s25 = sshll.u32 (%p67_p3), %s160_s23, 8 }
  0x14   : > { %s1321_s28 = scalar_lea.vmem (%p67_p3), %s1618_s1, %s1069_s24  ;;  %s1326_s29 = scalar_lea.vmem (%p67_p3), [#allocation2], %s1013_s25 }
  0x15   : > { %v255_v0 = vld [vmem:[%s1321_s28] sm:$0xff] (%p67_p3) }
  0x16   : > { %v257_v1 = vld [vmem:[%s1321_s28 + $0x40] sm:$0xff] (%p67_p3)  ;;  %256 = vst [vmem:[%s1326_s29] sm:$0xff] (%p67_p3), %v255_v0 }
  0x17   : > { %v259_v2 = vld [vmem:[%s1321_s28 + $0x80] sm:$0xff] (%p67_p3)  ;;  %258 = vst [vmem:[%s1326_s29 + $0x8] sm:$0xff] (%p67_p3), %v257_v1 }
  0x18   : > { %260 = vst [vmem:[%s1326_s29 + $0x10] sm:$0xff] (%p67_p3), %v259_v2  ;;  %v261_v3 = vld [vmem:[%s1321_s28 + $0xc0] sm:$0xff] (%p67_p3) }
  0x19   : > { %v263_v4 = vld [vmem:[%s1321_s28 + $0x100] sm:$0xff]  ;;  %262 = vst [vmem:[%s1326_s29 + $0x18] sm:$0xff] %v261_v3 }
  0x1a   : > { %v265_v5 = vld [vmem:[%s1321_s28 + $0x140] sm:$0xff]  ;;  %264 = vst [vmem:[%s1326_s29 + $0x20] sm:$0xff] %v263_v4 }
  0x1b   : > { %266 = vst [vmem:[%s1326_s29 + $0x28] sm:$0xff] %v265_v5  ;;  %v267_v6 = vld [vmem:[%s1321_s28 + $0x180] sm:$0xff] }
  0x1c   : > { %v269_v7 = vld [vmem:[%s1321_s28 + $0x1c0] sm:$0xff]  ;;  %268 = vst [vmem:[%s1326_s29 + $0x30] sm:$0xff] %v267_v6 }
  0x1d   : > { %v271_v8 = vld [vmem:[%s1321_s28 + $0x200] sm:$0xff]  ;;  %270 = vst [vmem:[%s1326_s29 + $0x38] sm:$0xff] %v269_v7 }
  0x1e   : > { %272 = vst [vmem:[%s1326_s29 + $0x40] sm:$0xff] %v271_v8  ;;  %v273_v9 = vld [vmem:[%s1321_s28 + $0x240] sm:$0xff] }
  0x1f   : > { %v275_v10 = vld [vmem:[%s1321_s28 + $0x280] sm:$0xff]  ;;  %274 = vst [vmem:[%s1326_s29 + $0x48] sm:$0xff] %v273_v9 }
  0x20   : > { %v277_v11 = vld [vmem:[%s1321_s28 + $0x2c0] sm:$0xff]  ;;  %276 = vst [vmem:[%s1326_s29 + $0x50] sm:$0xff] %v275_v10 }
  0x21   : > { %278 = vst [vmem:[%s1326_s29 + $0x58] sm:$0xff] %v277_v11  ;;  %v279_v12 = vld [vmem:[%s1321_s28 + $0x300] sm:$0xff] }
  0x22   : > { %v281_v13 = vld [vmem:[%s1321_s28 + $0x340] sm:$0xff]  ;;  %280 = vst [vmem:[%s1326_s29 + $0x60] sm:$0xff] %v279_v12 }
  0x23   : > { %v283_v14 = vld [vmem:[%s1321_s28 + $0x380] sm:$0xff]  ;;  %282 = vst [vmem:[%s1326_s29 + $0x68] sm:$0xff] %v281_v13 }
  0x24   : > { %284 = vst [vmem:[%s1326_s29 + $0x70] sm:$0xff] %v283_v14  ;;  %v285_v15 = vld [vmem:[%s1321_s28 + $0x3c0] sm:$0xff] }
  0x25   : > { %v287_v16 = vld [vmem:[%s1321_s28 + $0x400] sm:$0xff]  ;;  %286 = vst [vmem:[%s1326_s29 + $0x78] sm:$0xff] %v285_v15 }
  0x26   : > { %v289_v17 = vld [vmem:[%s1321_s28 + $0x440] sm:$0xff]  ;;  %288 = vst [vmem:[%s1326_s29 + $0x80] sm:$0xff] %v287_v16 }
  0x27   : > { %290 = vst [vmem:[%s1326_s29 + $0x88] sm:$0xff] %v289_v17  ;;  %v291_v18 = vld [vmem:[%s1321_s28 + $0x480] sm:$0xff] }
  0x28   : > { %v293_v19 = vld [vmem:[%s1321_s28 + $0x4c0] sm:$0xff]  ;;  %292 = vst [vmem:[%s1326_s29 + $0x90] sm:$0xff] %v291_v18 }
  0x29   : > { %v295_v20 = vld [vmem:[%s1321_s28 + $0x500] sm:$0xff]  ;;  %294 = vst [vmem:[%s1326_s29 + $0x98] sm:$0xff] %v293_v19 }
  0x2a   : > { %296 = vst [vmem:[%s1326_s29 + $0xa0] sm:$0xff] %v295_v20  ;;  %v297_v21 = vld [vmem:[%s1321_s28 + $0x540] sm:$0xff] }
  0x2b   : > { %v299_v22 = vld [vmem:[%s1321_s28 + $0x580] sm:$0xff]  ;;  %298 = vst [vmem:[%s1326_s29 + $0xa8] sm:$0xff] %v297_v21 }
  0x2c   : > { %v301_v23 = vld [vmem:[%s1321_s28 + $0x5c0] sm:$0xff]  ;;  %300 = vst [vmem:[%s1326_s29 + $0xb0] sm:$0xff] %v299_v22 }
  0x2d   : > { %302 = vst [vmem:[%s1326_s29 + $0xb8] sm:$0xff] %v301_v23  ;;  %v303_v24 = vld [vmem:[%s1321_s28 + $0x600] sm:$0xff] }
  0x2e   : > { %v305_v25 = vld [vmem:[%s1321_s28 + $0x640] sm:$0xff]  ;;  %304 = vst [vmem:[%s1326_s29 + $0xc0] sm:$0xff] %v303_v24 }
  0x2f   : > { %v307_v26 = vld [vmem:[%s1321_s28 + $0x680] sm:$0xff]  ;;  %306 = vst [vmem:[%s1326_s29 + $0xc8] sm:$0xff] %v305_v25 }
  0x30   : > { %308 = vst [vmem:[%s1326_s29 + $0xd0] sm:$0xff] %v307_v26  ;;  %v309_v27 = vld [vmem:[%s1321_s28 + $0x6c0] sm:$0xff] }
  0x31   : > { %v311_v28 = vld [vmem:[%s1321_s28 + $0x700] sm:$0xff]  ;;  %310 = vst [vmem:[%s1326_s29 + $0xd8] sm:$0xff] %v309_v27 }
  0x32   : > { %v313_v29 = vld [vmem:[%s1321_s28 + $0x740] sm:$0xff]  ;;  %312 = vst [vmem:[%s1326_s29 + $0xe0] sm:$0xff] %v311_v28 }
  0x33   : > { %314 = vst [vmem:[%s1326_s29 + $0xe8] sm:$0xff] %v313_v29  ;;  %v315_v30 = vld [vmem:[%s1321_s28 + $0x780] sm:$0xff] }
  0x34   : > { %v317_v31 = vld [vmem:[%s1321_s28 + $0x7c0] sm:$0xff]  ;;  %316 = vst [vmem:[%s1326_s29 + $0xf0] sm:$0xff] %v315_v30 }
  0x35   : > { %318 = vst [vmem:[%s1326_s29 + $0xf8] sm:$0xff] %v317_v31 }
  0x36 PF: > { %p1016_p8 = scmp.ge.s32.totalorder %s1251_s16, 1  ;;  %p331_p9 = scmp.lt.s32.totalorder %s1251_s16, 9 }
  0x38   : > { %p332_p10 = pnand %p1016_p8, %p331_p9 }
  0x39   : > { %s338_s30 = sand.u32 (!%p332_p10), 1, %s1235_s12   ;;  %v1194_v32 = vld [vmem:[%s1617_s0 + $0x4] ss:$8 sps:$4 sm:$0xff] (!%p332_p10)   ;;  %v1192_v2 = vld [vmem:[%s1617_s0] ss:$8 sps:$4 sm:$0xff] (!%p332_p10)   ;;  %s1018_s24 = sshll.u32 (!%p332_p10), %s1243_s14, 1  ;;  %v766_v14 = vlaneseq (!%p332_p10) }
  0x3a   : > { %335 = sbr.rel (%p332_p10) target bundleno = 375 (0x177), region = 66  ;;  %s1017_s4 = sshll.u32 (!%p332_p10), %s338_s30, 8  ;;  %v1197_v33 = vld [vmem:[%s1617_s0 + $0x44] ss:$8 sps:$4 sm:$0xff] (!%p332_p10)   ;;  %693 = vmatprep.mubr.bf16.mxu0 (!%p332_p10), %v1194_v32  ;;  %v1195_v3 = vld [vmem:[%s1617_s0 + $0x40] ss:$8 sps:$4 sm:$0xff] (!%p332_p10)  }
  0x3b   : > { %s1400_s9 = scalar_lea.vmem (!%p332_p10), [#allocation2], %s1017_s4  ;;  %733 = vmatprep.mubr.bf16.mxu1 (!%p332_p10), %v1197_v33  ;;  %v1198_v4 = vld [vmem:[%s1617_s0 + $0x14] ss:$8 sps:$4 sm:$0xff] (!%p332_p10)   ;;  %v1200_v6 = vld [vmem:[%s1617_s0 + $0x10] ss:$8 sps:$4 sm:$0xff] (!%p332_p10)   ;;  %p379_p11 = scmp.lt.s32.totalorder (!%p332_p10), %s1018_s24, 15 }
  0x3c   : > { %v1144_v34 = vld [vmem:[%s1400_s9 + $0x4] ss:$8 sps:$4 sm:$0xff] (!%p332_p10)   ;;  %v1146_v35 = vld [vmem:[%s1400_s9] ss:$8 sps:$4 sm:$0xff] (!%p332_p10)   ;;  %v1147_v36 = vld [vmem:[%s1400_s9 + $0x14] ss:$8 sps:$4 sm:$0xff] (!%p332_p10)  }
  0x3d   : > { %661 = vmatprep.subr.bf16.mxu0 (!%p332_p10), %v1144_v34  ;;  %1071 = vmatprep.subr.bf16.mxu1 (!%p332_p10), %v1144_v34  ;;  %v1149_v37 = vld [vmem:[%s1400_s9 + $0x10] ss:$8 sps:$4 sm:$0xff] (!%p332_p10)   ;;  %v1150_v38 = vld [vmem:[%s1400_s9 + $0x24] ss:$8 sps:$4 sm:$0xff] (!%p332_p10)   ;;  %v1152_v39 = vld [vmem:[%s1400_s9 + $0x20] ss:$8 sps:$4 sm:$0xff] (!%p332_p10)  }
  0x3e   : > { %662 = vmatpush1.bf16.msra.mxu0 (!%p332_p10), %v1146_v35  ;;  %1087 = vmatpush1.bf16.msra.mxu1 (!%p332_p10), %v1146_v35  ;;  %v1153_v40 = vld [vmem:[%s1400_s9 + $0x34] ss:$8 sps:$4 sm:$0xff] (!%p332_p10)   ;;  %v1155_v41 = vld [vmem:[%s1400_s9 + $0x30] ss:$8 sps:$4 sm:$0xff] (!%p332_p10)   ;;  %v1156_v42 = vld [vmem:[%s1400_s9 + $0x44] ss:$8 sps:$4 sm:$0xff] (!%p332_p10)  }
  0x3f   : > { %663 = vmatprep.subr.bf16.mxu0 (!%p332_p10), %v1147_v36  ;;  %1072 = vmatprep.subr.bf16.mxu1 (!%p332_p10), %v1147_v36  ;;  %v1158_v43 = vld [vmem:[%s1400_s9 + $0x40] ss:$8 sps:$4 sm:$0xff] (!%p332_p10)   ;;  %v1159_v44 = vld [vmem:[%s1400_s9 + $0x54] ss:$8 sps:$4 sm:$0xff] (!%p332_p10)   ;;  %v1161_v45 = vld [vmem:[%s1400_s9 + $0x50] ss:$8 sps:$4 sm:$0xff] (!%p332_p10)  }
  0x40   : > { %v1162_v46 = vld [vmem:[%s1400_s9 + $0x64] ss:$8 sps:$4 sm:$0xff] (!%p332_p10)   ;;  %v1164_v47 = vld [vmem:[%s1400_s9 + $0x60] ss:$8 sps:$4 sm:$0xff] (!%p332_p10)   ;;  %v1165_v48 = vld [vmem:[%s1400_s9 + $0x74] ss:$8 sps:$4 sm:$0xff] (!%p332_p10)  }
  0x41   : > { %v1167_v49 = vld [vmem:[%s1400_s9 + $0x70] ss:$8 sps:$4 sm:$0xff]   ;;  %v1168_v50 = vld [vmem:[%s1400_s9 + $0x84] ss:$8 sps:$4 sm:$0xff]   ;;  %v1170_v51 = vld [vmem:[%s1400_s9 + $0x80] ss:$8 sps:$4 sm:$0xff]  }
  0x42   : > { %664 = vmatpush1.bf16.msra.mxu0 %v1149_v37  ;;  %1088 = vmatpush1.bf16.msra.mxu1 %v1149_v37  ;;  %v1171_v52 = vld [vmem:[%s1400_s9 + $0x94] ss:$8 sps:$4 sm:$0xff]   ;;  %v1173_v53 = vld [vmem:[%s1400_s9 + $0x90] ss:$8 sps:$4 sm:$0xff]   ;;  %v1174_v54 = vld [vmem:[%s1400_s9 + $0xa4] ss:$8 sps:$4 sm:$0xff]  }
  0x43   : > { %665 = vmatprep.subr.bf16.mxu0 %v1150_v38  ;;  %1073 = vmatprep.subr.bf16.mxu1 %v1150_v38  ;;  %v1176_v55 = vld [vmem:[%s1400_s9 + $0xa0] ss:$8 sps:$4 sm:$0xff]   ;;  %v1177_v56 = vld [vmem:[%s1400_s9 + $0xb4] ss:$8 sps:$4 sm:$0xff]   ;;  %v1179_v57 = vld [vmem:[%s1400_s9 + $0xb0] ss:$8 sps:$4 sm:$0xff]  }
  0x44   : > { %v1180_v58 = vld [vmem:[%s1400_s9 + $0xc4] ss:$8 sps:$4 sm:$0xff]   ;;  %v1182_v59 = vld [vmem:[%s1400_s9 + $0xc0] ss:$8 sps:$4 sm:$0xff]   ;;  %v1183_v60 = vld [vmem:[%s1400_s9 + $0xd4] ss:$8 sps:$4 sm:$0xff]  }
  0x45   : > { %v1185_v61 = vld [vmem:[%s1400_s9 + $0xd0] ss:$8 sps:$4 sm:$0xff]   ;;  %v1186_v62 = vld [vmem:[%s1400_s9 + $0xe4] ss:$8 sps:$4 sm:$0xff]   ;;  %v1188_v63 = vld [vmem:[%s1400_s9 + $0xe0] ss:$8 sps:$4 sm:$0xff]  }
  0x46   : > { %666 = vmatpush1.bf16.msra.mxu0 %v1152_v39  ;;  %1089 = vmatpush1.bf16.msra.mxu1 %v1152_v39  ;;  %v1189_v0 = vld [vmem:[%s1400_s9 + $0xf4] ss:$8 sps:$4 sm:$0xff]   ;;  %v1191_v1 = vld [vmem:[%s1400_s9 + $0xf0] ss:$8 sps:$4 sm:$0xff]   ;;  %v1204_v8 = vld [vmem:[%s1617_s0 + $0x24] ss:$8 sps:$4 sm:$0xff]  }
  0x47   : > { %667 = vmatprep.subr.bf16.mxu0 %v1153_v40  ;;  %1074 = vmatprep.subr.bf16.mxu1 %v1153_v40  ;;  %v1201_v5 = vld [vmem:[%s1617_s0 + $0x54] ss:$8 sps:$4 sm:$0xff]   ;;  %v1203_v7 = vld [vmem:[%s1617_s0 + $0x50] ss:$8 sps:$4 sm:$0xff]   ;;  %v1207_v9 = vld [vmem:[%s1617_s0 + $0x64] ss:$8 sps:$4 sm:$0xff]  }
  0x48   : > { %v1206_v10 = vld [vmem:[%s1617_s0 + $0x20] ss:$8 sps:$4 sm:$0xff]   ;;  %v1210_v12 = vld [vmem:[%s1617_s0 + $0x34] ss:$8 sps:$4 sm:$0xff]   ;;  %v1212_v13 = vld [vmem:[%s1617_s0 + $0x30] ss:$8 sps:$4 sm:$0xff]  }
  0x49   : > { %v1209_v11 = vld [vmem:[%s1617_s0 + $0x60] ss:$8 sps:$4 sm:$0xff]   ;;  %s1629_s24 = smov (!%p379_p11, %s1018_s24), 15  ;;  %v767_v15 = vshrl.u32 %v766_v14, 7  ;;  %s1103_s28 = smul.u32 224, %s338_s30 }
  0x4a   : > { %668 = vmatpush1.bf16.msra.mxu0 %v1155_v41  ;;  %1090 = vmatpush1.bf16.msra.mxu1 %v1155_v41  ;;  %s381_s27 = scalar_lea.vmem %s1619_s2, %s1629_s24  ;;  %s1070_s30 = sshll.u32 (%p1308_p6), %s1243_s14, 4 }
  0x4b   : > { %669 = vmatprep.subr.bf16.mxu0 %v1156_v42  ;;  %1075 = vmatprep.subr.bf16.mxu1 %v1156_v42  ;;  %v768_v16 = vsub.s32 0, %v767_v15  ;;  %v764_v17 = vld [vmem:[%s381_s27] sm:$0x3]  ;;  %v772_v18 = vsub.s32 1, %v767_v15  ;;  %s1484_s12 = scalar_lea.vmem [#allocation3], %s1103_s28  ;;  %s1547_s5 = scalar_lea.vmem (%p1308_p6), %s1620_s3, %s1070_s30 }
  0x4d   : > { %v1476_v19 = vrot.slane %v764_v17, %v768_v16  ;;  %v1478_v20 = vrot.slane %v764_v17, %v772_v18 }
  0x4e   : > { %670 = vmatpush1.bf16.msra.mxu0 %v1158_v43  ;;  %1091 = vmatpush1.bf16.msra.mxu1 %v1158_v43 }
  0x4f   : > { %671 = vmatprep.subr.bf16.mxu0 %v1159_v44  ;;  %1076 = vmatprep.subr.bf16.mxu1 %v1159_v44 }
  0x52   : > { %672 = vmatpush1.bf16.msra.mxu0 %v1161_v45  ;;  %1092 = vmatpush1.bf16.msra.mxu1 %v1161_v45 }
  0x53   : > { %673 = vmatprep.subr.bf16.mxu0 %v1162_v46  ;;  %1077 = vmatprep.subr.bf16.mxu1 %v1162_v46 }
  0x56   : > { %674 = vmatpush1.bf16.msra.mxu0 %v1164_v47  ;;  %1093 = vmatpush1.bf16.msra.mxu1 %v1164_v47 }
  0x57   : > { %675 = vmatprep.subr.bf16.mxu0 %v1165_v48  ;;  %1078 = vmatprep.subr.bf16.mxu1 %v1165_v48 }
  0x5a   : > { %676 = vmatpush1.bf16.msra.mxu0 %v1167_v49  ;;  %1094 = vmatpush1.bf16.msra.mxu1 %v1167_v49 }
  0x5b   : > { %677 = vmatprep.subr.bf16.mxu0 %v1168_v50  ;;  %1079 = vmatprep.subr.bf16.mxu1 %v1168_v50 }
  0x5e   : > { %678 = vmatpush1.bf16.msra.mxu0 %v1170_v51  ;;  %1095 = vmatpush1.bf16.msra.mxu1 %v1170_v51 }
  0x5f   : > { %679 = vmatprep.subr.bf16.mxu0 %v1171_v52  ;;  %1080 = vmatprep.subr.bf16.mxu1 %v1171_v52 }
  0x62   : > { %680 = vmatpush1.bf16.msra.mxu0 %v1173_v53  ;;  %1096 = vmatpush1.bf16.msra.mxu1 %v1173_v53 }
  0x63   : > { %681 = vmatprep.subr.bf16.mxu0 %v1174_v54  ;;  %1081 = vmatprep.subr.bf16.mxu1 %v1174_v54 }
  0x66   : > { %682 = vmatpush1.bf16.msra.mxu0 %v1176_v55  ;;  %1097 = vmatpush1.bf16.msra.mxu1 %v1176_v55 }
  0x67   : > { %683 = vmatprep.subr.bf16.mxu0 %v1177_v56  ;;  %1082 = vmatprep.subr.bf16.mxu1 %v1177_v56 }
  0x6a   : > { %684 = vmatpush1.bf16.msra.mxu0 %v1179_v57  ;;  %1098 = vmatpush1.bf16.msra.mxu1 %v1179_v57 }
  0x6b   : > { %685 = vmatprep.subr.bf16.mxu0 %v1180_v58  ;;  %1083 = vmatprep.subr.bf16.mxu1 %v1180_v58 }
  0x6e   : > { %686 = vmatpush1.bf16.msra.mxu0 %v1182_v59  ;;  %1099 = vmatpush1.bf16.msra.mxu1 %v1182_v59 }
  0x6f   : > { %687 = vmatprep.subr.bf16.mxu0 %v1183_v60  ;;  %1084 = vmatprep.subr.bf16.mxu1 %v1183_v60 }
  0x72   : > { %688 = vmatpush1.bf16.msra.mxu0 %v1185_v61  ;;  %1100 = vmatpush1.bf16.msra.mxu1 %v1185_v61 }
  0x73   : > { %689 = vmatprep.subr.bf16.mxu0 %v1186_v62  ;;  %1085 = vmatprep.subr.bf16.mxu1 %v1186_v62 }
  0x76   : > { %690 = vmatpush1.bf16.msra.mxu0 %v1188_v63  ;;  %1101 = vmatpush1.bf16.msra.mxu1 %v1188_v63 }
  0x77   : > { %691 = vmatprep.subr.bf16.mxu0 %v1189_v0  ;;  %1086 = vmatprep.subr.bf16.mxu1 %v1189_v0 }
  0x7a   : > { %692 = vmatpush1.bf16.msra.mxu0 %v1191_v1  ;;  %1102 = vmatpush1.bf16.msra.mxu1 %v1191_v1 }
  0x7d   : > { %694 = vmatmul.mubr.bf16.vlgmr.msra.gmra.mrb[0].mxu0 %v1192_v2  ;;  %734 = vmatmul.mubr.bf16.vlgmr.msra.gmra.mrb[0].mxu1 %v1195_v3 }
  0x7e   : > { %703 = vmatprep.mubr.bf16.mxu0 %v1198_v4  ;;  %743 = vmatprep.mubr.bf16.mxu1 %v1201_v5 }
  0x85   : > { %704 = vmatmul.mubr.bf16.gmra.mrb[4].mxu0 %v1200_v6  ;;  %744 = vmatmul.mubr.bf16.gmra.mrb[4].mxu1 %v1203_v7 }
  0x86   : > { %713 = vmatprep.mubr.bf16.mxu0 %v1204_v8  ;;  %753 = vmatprep.mubr.bf16.mxu1 %v1207_v9 }
  0x8d   : > { %714 = vmatmul.mubr.bf16.gmra.mrb[8].mxu0 %v1206_v10  ;;  %754 = vmatmul.mubr.bf16.gmra.mrb[8].mxu1 %v1209_v11 }
  0x8e   : > { %723 = vmatprep.mubr.bf16.mxu0 %v1210_v12 }
  0x95   : > { %724 = vmatmul.mubr.bf16.gmra.mrb[12].mxu0 %v1212_v13 }
 0x150   : > { %v695_v21 = vpop.f32.mrb[0].mxu0  ;;  %v735_v22 = vpop.f32.mrb[0].mxu1 }
 0x151   : > { %v776_v23 = vmul.f32 %v1476_v19, %v695_v21  ;;  %v697_v24 = vpop.f32.mrb[1].mxu0  ;;  %v792_v25 = vmul.f32 %v1476_v19, %v735_v22  ;;  %v737_v26 = vpop.f32.mrb[1].mxu1 }
 0x152   : > { %v777_v27 = vmul.f32 %v1478_v20, %v697_v24  ;;  %v699_v28 = vpop.f32.mrb[2].mxu0  ;;  %v793_v29 = vmul.f32 %v1478_v20, %v737_v26  ;;  %v739_v30 = vpop.f32.mrb[2].mxu1 }
 0x153   : > { %804 = vst [vmem:[%s1484_s12] sm:$0xff] %v776_v23  ;;  %v778_v31 = vmul.f32 %v1476_v19, %v699_v28  ;;  %v701_v32 = vpop.f32.mrb[3].mxu0  ;;  %820 = vst [vmem:[%s1484_s12 + $0x80] sm:$0xff] %v792_v25  ;;  %v794_v33 = vmul.f32 %v1476_v19, %v739_v30  ;;  %v741_v34 = vpop.f32.mrb[3].mxu1 }
 0x154   : > { %805 = vst [vmem:[%s1484_s12 + $0x8] sm:$0xff] %v777_v27  ;;  %v779_v35 = vmul.f32 %v1478_v20, %v701_v32  ;;  %821 = vst [vmem:[%s1484_s12 + $0x88] sm:$0xff] %v793_v29  ;;  %v795_v36 = vmul.f32 %v1478_v20, %v741_v34 }
 0x155   : > { %806 = vst [vmem:[%s1484_s12 + $0x10] sm:$0xff] %v778_v31  ;;  %822 = vst [vmem:[%s1484_s12 + $0x90] sm:$0xff] %v794_v33 }
 0x156   : > { %807 = vst [vmem:[%s1484_s12 + $0x18] sm:$0xff] %v779_v35  ;;  %823 = vst [vmem:[%s1484_s12 + $0x98] sm:$0xff] %v795_v36 }
 0x158   : > { %v705_v37 = vpop.f32.mrb[4].mxu0  ;;  %v745_v38 = vpop.f32.mrb[4].mxu1 }
 0x159   : > { %v780_v39 = vmul.f32 %v1476_v19, %v705_v37  ;;  %v707_v40 = vpop.f32.mrb[5].mxu0  ;;  %v796_v41 = vmul.f32 %v1476_v19, %v745_v38  ;;  %v747_v42 = vpop.f32.mrb[5].mxu1 }
 0x15a   : > { %v781_v43 = vmul.f32 %v1478_v20, %v707_v40  ;;  %v709_v44 = vpop.f32.mrb[6].mxu0  ;;  %v797_v45 = vmul.f32 %v1478_v20, %v747_v42  ;;  %v749_v46 = vpop.f32.mrb[6].mxu1  ;;  %v857_v13 = vld [vmem:[%s1484_s12] sm:$0xff] (%p1308_p6) }
 0x15b   : > { %808 = vst [vmem:[%s1484_s12 + $0x20] sm:$0xff] %v780_v39  ;;  %v782_v47 = vmul.f32 %v1476_v19, %v709_v44  ;;  %v711_v48 = vpop.f32.mrb[7].mxu0  ;;  %824 = vst [vmem:[%s1484_s12 + $0xa0] sm:$0xff] %v796_v41  ;;  %v798_v49 = vmul.f32 %v1476_v19, %v749_v46  ;;  %v751_v50 = vpop.f32.mrb[7].mxu1  ;;  %v859_v14 = vld [vmem:[%s1484_s12 + $0x8] sm:$0xff] (%p1308_p6)  ;;  %v889_v29 = vld [vmem:[%s1484_s12 + $0x80] sm:$0xff] (%p1308_p6) }
 0x15c   : > { %809 = vst [vmem:[%s1484_s12 + $0x28] sm:$0xff] %v781_v43  ;;  %v783_v51 = vmul.f32 %v1478_v20, %v711_v48  ;;  %825 = vst [vmem:[%s1484_s12 + $0xa8] sm:$0xff] %v797_v45  ;;  %v799_v52 = vmul.f32 %v1478_v20, %v751_v50  ;;  %v861_v15 = vld [vmem:[%s1484_s12 + $0x10] sm:$0xff] (%p1308_p6)  ;;  %v891_v30 = vld [vmem:[%s1484_s12 + $0x88] sm:$0xff] (%p1308_p6) }
 0x15d   : > { %810 = vst [vmem:[%s1484_s12 + $0x30] sm:$0xff] %v782_v47  ;;  %826 = vst [vmem:[%s1484_s12 + $0xb0] sm:$0xff] %v798_v49  ;;  %v863_v16 = vld [vmem:[%s1484_s12 + $0x18] sm:$0xff] (%p1308_p6)  ;;  %v893_v31 = vld [vmem:[%s1484_s12 + $0x90] sm:$0xff] (%p1308_p6) }
 0x15e   : > { %811 = vst [vmem:[%s1484_s12 + $0x38] sm:$0xff] %v783_v51  ;;  %827 = vst [vmem:[%s1484_s12 + $0xb8] sm:$0xff] %v799_v52  ;;  %v895_v32 = vld [vmem:[%s1484_s12 + $0x98] sm:$0xff] (%p1308_p6) }
 0x15f   : > { %858 = vst [vmem:[%s1547_s5] sm:$0xff] (%p1308_p6), %v857_v13  ;;  %860 = vst [vmem:[%s1547_s5 + $0x8] sm:$0xff] (%p1308_p6), %v859_v14 }
 0x160   : > { %v715_v53 = vpop.f32.mrb[8].mxu0  ;;  %v755_v54 = vpop.f32.mrb[8].mxu1  ;;  %862 = vst [vmem:[%s1547_s5 + $0x80] sm:$0xff] (%p1308_p6), %v861_v15  ;;  %864 = vst [vmem:[%s1547_s5 + $0x88] sm:$0xff] (%p1308_p6), %v863_v16 }
 0x161   : > { %v784_v55 = vmul.f32 %v1476_v19, %v715_v53  ;;  %v717_v56 = vpop.f32.mrb[9].mxu0  ;;  %v800_v57 = vmul.f32 %v1476_v19, %v755_v54  ;;  %v757_v58 = vpop.f32.mrb[9].mxu1  ;;  %890 = vst [vmem:[%s1547_s5 + $0x400] sm:$0xff] (%p1308_p6), %v889_v29  ;;  %892 = vst [vmem:[%s1547_s5 + $0x408] sm:$0xff] (%p1308_p6), %v891_v30 }
 0x162   : > { %v785_v59 = vmul.f32 %v1478_v20, %v717_v56  ;;  %v719_v60 = vpop.f32.mrb[10].mxu0  ;;  %v801_v61 = vmul.f32 %v1478_v20, %v757_v58  ;;  %v759_v62 = vpop.f32.mrb[10].mxu1  ;;  %v865_v17 = vld [vmem:[%s1484_s12 + $0x20] sm:$0xff] (%p1308_p6)  ;;  %894 = vst [vmem:[%s1547_s5 + $0x480] sm:$0xff] (%p1308_p6), %v893_v31  ;;  %896 = vst [vmem:[%s1547_s5 + $0x488] sm:$0xff] (%p1308_p6), %v895_v32 }
 0x163   : > { %812 = vst [vmem:[%s1484_s12 + $0x40] sm:$0xff] %v784_v55  ;;  %v786_v63 = vmul.f32 %v1476_v19, %v719_v60  ;;  %v721_v0 = vpop.f32.mrb[11].mxu0  ;;  %828 = vst [vmem:[%s1484_s12 + $0xc0] sm:$0xff] %v800_v57  ;;  %v802_v1 = vmul.f32 %v1476_v19, %v759_v62  ;;  %v761_v2 = vpop.f32.mrb[11].mxu1  ;;  %v867_v18 = vld [vmem:[%s1484_s12 + $0x28] sm:$0xff] (%p1308_p6)  ;;  %v897_v33 = vld [vmem:[%s1484_s12 + $0xa0] sm:$0xff] (%p1308_p6) }
 0x164   : > { %813 = vst [vmem:[%s1484_s12 + $0x48] sm:$0xff] %v785_v59  ;;  %v787_v3 = vmul.f32 %v1478_v20, %v721_v0  ;;  %829 = vst [vmem:[%s1484_s12 + $0xc8] sm:$0xff] %v801_v61  ;;  %v803_v4 = vmul.f32 %v1478_v20, %v761_v2  ;;  %v899_v34 = vld [vmem:[%s1484_s12 + $0xa8] sm:$0xff] (%p1308_p6)  ;;  %v901_v35 = vld [vmem:[%s1484_s12 + $0xb0] sm:$0xff] (%p1308_p6) }
 0x165   : > { %814 = vst [vmem:[%s1484_s12 + $0x50] sm:$0xff] %v786_v63  ;;  %830 = vst [vmem:[%s1484_s12 + $0xd0] sm:$0xff] %v802_v1  ;;  %v903_v36 = vld [vmem:[%s1484_s12 + $0xb8] sm:$0xff] (%p1308_p6) }
 0x166   : > { %815 = vst [vmem:[%s1484_s12 + $0x58] sm:$0xff] %v787_v3  ;;  %831 = vst [vmem:[%s1484_s12 + $0xd8] sm:$0xff] %v803_v4 }
 0x167   : > { %866 = vst [vmem:[%s1547_s5 + $0x100] sm:$0xff] (%p1308_p6), %v865_v17  ;;  %868 = vst [vmem:[%s1547_s5 + $0x108] sm:$0xff] (%p1308_p6), %v867_v18 }
 0x168   : > { %v725_v5 = vpop.f32.mrb[12].mxu0  ;;  %838 = sbr.rel (!%p1308_p6) target bundleno = 375 (0x177), region = 74  ;;  %898 = vst [vmem:[%s1547_s5 + $0x500] sm:$0xff] (%p1308_p6), %v897_v33  ;;  %900 = vst [vmem:[%s1547_s5 + $0x508] sm:$0xff] (%p1308_p6), %v899_v34 }
 0x169   : > { %v788_v6 = vmul.f32 %v1476_v19, %v725_v5  ;;  %v727_v7 = vpop.f32.mrb[13].mxu0  ;;  %902 = vst [vmem:[%s1547_s5 + $0x580] sm:$0xff] (%p1308_p6), %v901_v35  ;;  %904 = vst [vmem:[%s1547_s5 + $0x588] sm:$0xff] (%p1308_p6), %v903_v36 }
 0x16a   : > { %v789_v8 = vmul.f32 %v1478_v20, %v727_v7  ;;  %v729_v9 = vpop.f32.mrb[14].mxu0  ;;  %v873_v21 = vld [vmem:[%s1484_s12 + $0x40] sm:$0xff] (%p1308_p6) }
 0x16b   : > { %816 = vst [vmem:[%s1484_s12 + $0x60] sm:$0xff] %v788_v6  ;;  %v790_v10 = vmul.f32 %v1476_v19, %v729_v9  ;;  %v731_v11 = vpop.f32.mrb[15].mxu0  ;;  %v869_v19 = vld [vmem:[%s1484_s12 + $0x30] sm:$0xff] (%p1308_p6)  ;;  %874 = vst [vmem:[%s1547_s5 + $0x200] sm:$0xff] (%p1308_p6), %v873_v21  ;;  %v875_v22 = vld [vmem:[%s1484_s12 + $0x48] sm:$0xff] (%p1308_p6) }
 0x16c   : > { %817 = vst [vmem:[%s1484_s12 + $0x68] sm:$0xff] %v789_v8  ;;  %v791_v12 = vmul.f32 %v1478_v20, %v731_v11  ;;  %v871_v20 = vld [vmem:[%s1484_s12 + $0x38] sm:$0xff] (%p1308_p6)  ;;  %870 = vst [vmem:[%s1547_s5 + $0x180] sm:$0xff] (%p1308_p6), %v869_v19  ;;  %v877_v23 = vld [vmem:[%s1484_s12 + $0x50] sm:$0xff] (%p1308_p6) }
 0x16d   : > { %818 = vst [vmem:[%s1484_s12 + $0x70] sm:$0xff] %v790_v10  ;;  %872 = vst [vmem:[%s1547_s5 + $0x188] sm:$0xff] (%p1308_p6), %v871_v20  ;;  %v879_v24 = vld [vmem:[%s1484_s12 + $0x58] sm:$0xff] (%p1308_p6)  ;;  %v905_v37 = vld [vmem:[%s1484_s12 + $0xc0] sm:$0xff] (%p1308_p6) }
 0x16e   : > { %819 = vst [vmem:[%s1484_s12 + $0x78] sm:$0xff] %v791_v12  ;;  %876 = vst [vmem:[%s1547_s5 + $0x208] sm:$0xff] (%p1308_p6), %v875_v22  ;;  %v907_v38 = vld [vmem:[%s1484_s12 + $0xc8] sm:$0xff] (%p1308_p6)  ;;  %v909_v39 = vld [vmem:[%s1484_s12 + $0xd0] sm:$0xff] (%p1308_p6) }
 0x16f   : > { %878 = vst [vmem:[%s1547_s5 + $0x280] sm:$0xff] %v877_v23  ;;  %880 = vst [vmem:[%s1547_s5 + $0x288] sm:$0xff] %v879_v24  ;;  %v911_v40 = vld [vmem:[%s1484_s12 + $0xd8] sm:$0xff] }
 0x170   : > { %906 = vst [vmem:[%s1547_s5 + $0x600] sm:$0xff] %v905_v37  ;;  %908 = vst [vmem:[%s1547_s5 + $0x608] sm:$0xff] %v907_v38 }
 0x171   : > { %910 = vst [vmem:[%s1547_s5 + $0x680] sm:$0xff] %v909_v39  ;;  %912 = vst [vmem:[%s1547_s5 + $0x688] sm:$0xff] %v911_v40 }
 0x172   : > { %v881_v25 = vld [vmem:[%s1484_s12 + $0x60] sm:$0xff] }
 0x173   : > { %v883_v26 = vld [vmem:[%s1484_s12 + $0x68] sm:$0xff]  ;;  %882 = vst [vmem:[%s1547_s5 + $0x300] sm:$0xff] %v881_v25 }
 0x174   : > { %v885_v27 = vld [vmem:[%s1484_s12 + $0x70] sm:$0xff]  ;;  %884 = vst [vmem:[%s1547_s5 + $0x308] sm:$0xff] %v883_v26 }
 0x175   : > { %886 = vst [vmem:[%s1547_s5 + $0x380] sm:$0xff] %v885_v27  ;;  %v887_v28 = vld [vmem:[%s1484_s12 + $0x78] sm:$0xff] }
 0x176   : > { %888 = vst [vmem:[%s1547_s5 + $0x388] sm:$0xff] %v887_v28 }
 0x177 PF: > { %s13_s16 = sadd.s32 1, %s1251_s16   ;;  %s1622_s12 = smov %s1239_s13 }
 0x178   : > { %p10_p12 = scmp.ge.s32.totalorder %s13_s16, 10   ;;  %s1623_s13 = smov %s1313_s22 }
 0x179   : > { %s1624_s14 = smov %s1247_s15  ;;  %s1625_s15 = smov %s1627_s17 }
 0x17a   :  { %12 = sbr.rel (!%p10_p12) target bundleno = 3 (0x3), region = 134 }

// kernel: generator_forward.9
= control target key start
LH: loop header
LB: loop body
LE: loop exit
PB: predicated region body
PF: predicated region fallthrough
CT: control target
= control target key end

     0   :  { %s970_s12 = smov 0   ;;  %s972_s13 = smov 0   ;;  %s1120_s0 = inlined_call_operand.vmem [shape: bf16[512,128], index: 0, kind: input, shape index: {}]   ;;  %s1121_s1 = inlined_call_operand.vmem [shape: bf16[128,128], index: 1, kind: input, shape index: {}]   ;;  %s1122_s2 = inlined_call_operand.vmem [shape: f32[1,128], index: 2, kind: input, shape index: {}]   ;;  %s1123_s3 = inlined_call_operand.vmem [shape: f32[512,128], index: 3, kind: output, shape index: {}]  }
   0x1   :  { %s974_s14 = smov 0  }
   0x2 LB: > { %s25_s15 = sadd.s32 1, %s944_s13  ;;  %p758_p0 = scmp.ge.s32.totalorder %s948_s14, 1  ;;  %s948_s14 = sphi %s974_s14, %s13_s14   ;;  %s944_s13 = sphi %s972_s13, %s1125_s13   ;;  %s940_s12 = sphi %s970_s12, %s1124_s12  }
   0x3   : > { %p27_p1 = scmp.ge.s32.totalorder %s25_s15, 2  ;;  %p169_p2 = scmp.lt.s32.totalorder %s948_s14, 3 }
   0x5   : > { %s1127_s15 = smov (%p27_p1, %s25_s15), 0  ;;  %p170_p3 = pnand %p758_p0, %p169_p2 }
   0x6   : > { %v902_v0 = vld [vmem:[%s1121_s1] sm:$0xff] (!%p170_p3)   ;;  %s759_s18 = sshll.u32 (!%p170_p3), %s940_s12, 5  ;;  %v903_v1 = vld [vmem:[%s1121_s1 + $0x8] sm:$0xff] (!%p170_p3)   ;;  %v904_v2 = vld [vmem:[%s1121_s1 + $0x10] sm:$0xff] (!%p170_p3)  }
   0x7   : > { %173 = sbr.rel (%p170_p3) target bundleno = 281 (0x119), region = 32  ;;  %p204_p4 = scmp.lt.s32.totalorder (!%p170_p3), %s759_s18, 63  ;;  %814 = vmatprep.subr.bf16.mxu0 (!%p170_p3), %v902_v0  ;;  %862 = vmatprep.subr.bf16.mxu1 (!%p170_p3), %v902_v0  ;;  %v905_v3 = vld [vmem:[%s1121_s1 + $0x18] sm:$0xff] (!%p170_p3)   ;;  %v906_v6 = vld [vmem:[%s1121_s1 + $0x20] sm:$0xff] (!%p170_p3)   ;;  %v907_v7 = vld [vmem:[%s1121_s1 + $0x28] sm:$0xff] (!%p170_p3)  }
   0x8   : > { %815 = vmatpush3.bf16.msra.mxu0 (!%p170_p3), %v902_v0  ;;  %870 = vmatpush3.bf16.msra.mxu1 (!%p170_p3), %v902_v0  ;;  %v908_v8 = vld [vmem:[%s1121_s1 + $0x30] sm:$0xff] (!%p170_p3)   ;;  %v909_v9 = vld [vmem:[%s1121_s1 + $0x38] sm:$0xff] (!%p170_p3)   ;;  %v1040_v24 = vld [vmem:[%s1122_s2] ss:$0 sm:$0xff] (!%p170_p3) }
   0x9   : > { %816 = vmatprep.subr.bf16.mxu0 (!%p170_p3), %v903_v1  ;;  %863 = vmatprep.subr.bf16.mxu1 (!%p170_p3), %v903_v1 }
   0xc   : > { %817 = vmatpush3.bf16.msra.mxu0 (!%p170_p3), %v903_v1  ;;  %871 = vmatpush3.bf16.msra.mxu1 (!%p170_p3), %v903_v1 }
   0xd   : > { %818 = vmatprep.subr.bf16.mxu0 (!%p170_p3), %v904_v2  ;;  %864 = vmatprep.subr.bf16.mxu1 (!%p170_p3), %v904_v2 }
   0xe   : > { %s1129_s18 = smov (!%p204_p4, %s759_s18), 63 }
   0xf   : > { %s760_s23 = sshll.u32 %s1129_s18, 2  ;;  %s762_s10 = sshll.u32 %s1129_s18, 3 }
  0x10   : > { %s1003_s26 = scalar_lea.vmem %s1120_s0, %s760_s23  ;;  %819 = vmatpush3.bf16.msra.mxu0 %v904_v2  ;;  %872 = vmatpush3.bf16.msra.mxu1 %v904_v2  ;;  %s1045_s19 = scalar_lea.vmem %s1123_s3, %s762_s10 }
  0x11   : > { %v910_v4 = vld [vmem:[%s1003_s26] sm:$0xff]   ;;  %820 = vmatprep.subr.bf16.mxu0 %v905_v3  ;;  %865 = vmatprep.subr.bf16.mxu1 %v905_v3  ;;  %v912_v10 = vld [vmem:[%s1003_s26 + $0x8] sm:$0xff]   ;;  %v914_v12 = vld [vmem:[%s1003_s26 + $0x10] sm:$0xff]  }
  0x12   : > { %v911_v5 = vld [vmem:[%s1003_s26 + $0x40] sm:$0xff]   ;;  %830 = vmatprep.mubr.bf16.mxu0 %v910_v4  ;;  %v913_v11 = vld [vmem:[%s1003_s26 + $0x48] sm:$0xff]   ;;  %v915_v13 = vld [vmem:[%s1003_s26 + $0x50] sm:$0xff]  }
  0x13   : > { %846 = vmatprep.mubr.bf16.mxu1 %v911_v5  ;;  %v916_v14 = vld [vmem:[%s1003_s26 + $0x18] sm:$0xff]   ;;  %v918_v16 = vld [vmem:[%s1003_s26 + $0x20] sm:$0xff]   ;;  %v920_v18 = vld [vmem:[%s1003_s26 + $0x28] sm:$0xff]  }
  0x14   : > { %821 = vmatpush3.bf16.msra.mxu0 %v905_v3  ;;  %873 = vmatpush3.bf16.msra.mxu1 %v905_v3  ;;  %v917_v15 = vld [vmem:[%s1003_s26 + $0x58] sm:$0xff]   ;;  %v919_v17 = vld [vmem:[%s1003_s26 + $0x60] sm:$0xff]   ;;  %v921_v19 = vld [vmem:[%s1003_s26 + $0x68] sm:$0xff]  }
  0x15   : > { %822 = vmatprep.subr.bf16.mxu0 %v906_v6  ;;  %866 = vmatprep.subr.bf16.mxu1 %v906_v6  ;;  %v922_v20 = vld [vmem:[%s1003_s26 + $0x30] sm:$0xff]   ;;  %v924_v22 = vld [vmem:[%s1003_s26 + $0x38] sm:$0xff]  }
  0x16   : > { %v923_v21 = vld [vmem:[%s1003_s26 + $0x70] sm:$0xff]   ;;  %v925_v23 = vld [vmem:[%s1003_s26 + $0x78] sm:$0xff]  }
  0x18   : > { %823 = vmatpush3.bf16.msra.mxu0 %v906_v6  ;;  %874 = vmatpush3.bf16.msra.mxu1 %v906_v6 }
  0x19   : > { %824 = vmatprep.subr.bf16.mxu0 %v907_v7  ;;  %867 = vmatprep.subr.bf16.mxu1 %v907_v7 }
  0x1c   : > { %825 = vmatpush3.bf16.msra.mxu0 %v907_v7  ;;  %875 = vmatpush3.bf16.msra.mxu1 %v907_v7 }
  0x1d   : > { %826 = vmatprep.subr.bf16.mxu0 %v908_v8  ;;  %868 = vmatprep.subr.bf16.mxu1 %v908_v8 }
  0x20   : > { %827 = vmatpush3.bf16.msra.mxu0 %v908_v8  ;;  %876 = vmatpush3.bf16.msra.mxu1 %v908_v8 }
  0x21   : > { %828 = vmatprep.subr.bf16.mxu0 %v909_v9  ;;  %869 = vmatprep.subr.bf16.mxu1 %v909_v9 }
  0x24   : > { %829 = vmatpush3.bf16.msra.mxu0 %v909_v9  ;;  %877 = vmatpush3.bf16.msra.mxu1 %v909_v9 }
  0x27   : > { %831 = vmatmul.mubr.bf16.vlgmr.msra.gmra.mrb[0].mxu0 %v912_v10  ;;  %847 = vmatmul.mubr.bf16.vlgmr.msra.gmra.mrb[0].mxu1 %v913_v11 }
  0x28   : > { %834 = vmatprep.mubr.bf16.mxu0 %v914_v12  ;;  %850 = vmatprep.mubr.bf16.mxu1 %v915_v13 }
  0x2f   : > { %835 = vmatmul.mubr.bf16.gmra.mrb[4].mxu0 %v916_v14  ;;  %851 = vmatmul.mubr.bf16.gmra.mrb[4].mxu1 %v917_v15 }
  0x30   : > { %838 = vmatprep.mubr.bf16.mxu0 %v918_v16  ;;  %854 = vmatprep.mubr.bf16.mxu1 %v919_v17 }
  0x37   : > { %839 = vmatmul.mubr.bf16.gmra.mrb[8].mxu0 %v920_v18  ;;  %855 = vmatmul.mubr.bf16.gmra.mrb[8].mxu1 %v921_v19 }
  0x38   : > { %842 = vmatprep.mubr.bf16.mxu0 %v922_v20  ;;  %858 = vmatprep.mubr.bf16.mxu1 %v923_v21 }
  0x3f   : > { %843 = vmatmul.mubr.bf16.gmra.mrb[12].mxu0 %v924_v22  ;;  %859 = vmatmul.mubr.bf16.gmra.mrb[12].mxu1 %v925_v23 }
  0xfa   : > { %v832_v25 = vpop.f32.mrb[0].mxu0  ;;  %v848_v26 = vpop.f32.mrb[0].mxu1 }
  0xfb   : > { %v588_v27 = vmul.f32 %v832_v25, %v1040_v24  ;;  %v604_v28 = vmul.f32 %v848_v26, %v1040_v24  ;;  %v452_v29 = vpop.f32.mrb[1].mxu0  ;;  %v516_v30 = vpop.f32.mrb[1].mxu1 }
  0xfc   : > { %v586_v31 = vmul.f32 %v1040_v24, %v452_v29  ;;  %v602_v32 = vmul.f32 %v1040_v24, %v516_v30  ;;  %v833_v33 = vpop.f32.mrb[2].mxu0  ;;  %v849_v34 = vpop.f32.mrb[2].mxu1 }
  0xfd   : > { %620 = vst [vmem:[%s1045_s19 + $0x10] sm:$0xff] %v588_v27  ;;  %636 = vst [vmem:[%s1045_s19 + $0x90] sm:$0xff] %v604_v28  ;;  %v589_v35 = vmul.f32 %v833_v33, %v1040_v24  ;;  %v605_v36 = vmul.f32 %v849_v34, %v1040_v24  ;;  %v455_v37 = vpop.f32.mrb[3].mxu0  ;;  %v519_v38 = vpop.f32.mrb[3].mxu1 }
  0xfe   : > { %618 = vst [vmem:[%s1045_s19] sm:$0xff] %v586_v31  ;;  %634 = vst [vmem:[%s1045_s19 + $0x80] sm:$0xff] %v602_v32  ;;  %v587_v39 = vmul.f32 %v1040_v24, %v455_v37  ;;  %v603_v40 = vmul.f32 %v1040_v24, %v519_v38 }
  0xff   : > { %621 = vst [vmem:[%s1045_s19 + $0x18] sm:$0xff] %v589_v35  ;;  %637 = vst [vmem:[%s1045_s19 + $0x98] sm:$0xff] %v605_v36 }
 0x100   : > { %619 = vst [vmem:[%s1045_s19 + $0x8] sm:$0xff] %v587_v39  ;;  %635 = vst [vmem:[%s1045_s19 + $0x88] sm:$0xff] %v603_v40 }
 0x102   : > { %v836_v41 = vpop.f32.mrb[4].mxu0  ;;  %v852_v42 = vpop.f32.mrb[4].mxu1 }
 0x103   : > { %v592_v43 = vmul.f32 %v836_v41, %v1040_v24  ;;  %v608_v44 = vmul.f32 %v852_v42, %v1040_v24  ;;  %v468_v45 = vpop.f32.mrb[5].mxu0  ;;  %v532_v46 = vpop.f32.mrb[5].mxu1 }
 0x104   : > { %v590_v47 = vmul.f32 %v1040_v24, %v468_v45  ;;  %v606_v48 = vmul.f32 %v1040_v24, %v532_v46  ;;  %v837_v49 = vpop.f32.mrb[6].mxu0  ;;  %v853_v50 = vpop.f32.mrb[6].mxu1 }
 0x105   : > { %624 = vst [vmem:[%s1045_s19 + $0x30] sm:$0xff] %v592_v43  ;;  %640 = vst [vmem:[%s1045_s19 + $0xb0] sm:$0xff] %v608_v44  ;;  %v593_v51 = vmul.f32 %v837_v49, %v1040_v24  ;;  %v609_v52 = vmul.f32 %v853_v50, %v1040_v24  ;;  %v471_v53 = vpop.f32.mrb[7].mxu0  ;;  %v535_v54 = vpop.f32.mrb[7].mxu1 }
 0x106   : > { %622 = vst [vmem:[%s1045_s19 + $0x20] sm:$0xff] %v590_v47  ;;  %638 = vst [vmem:[%s1045_s19 + $0xa0] sm:$0xff] %v606_v48  ;;  %v591_v55 = vmul.f32 %v1040_v24, %v471_v53  ;;  %v607_v56 = vmul.f32 %v1040_v24, %v535_v54 }
 0x107   : > { %625 = vst [vmem:[%s1045_s19 + $0x38] sm:$0xff] %v593_v51  ;;  %641 = vst [vmem:[%s1045_s19 + $0xb8] sm:$0xff] %v609_v52 }
 0x108   : > { %623 = vst [vmem:[%s1045_s19 + $0x28] sm:$0xff] %v591_v55  ;;  %639 = vst [vmem:[%s1045_s19 + $0xa8] sm:$0xff] %v607_v56 }
 0x10a   : > { %v840_v57 = vpop.f32.mrb[8].mxu0  ;;  %v856_v58 = vpop.f32.mrb[8].mxu1 }
 0x10b   : > { %v596_v59 = vmul.f32 %v840_v57, %v1040_v24  ;;  %v612_v60 = vmul.f32 %v856_v58, %v1040_v24  ;;  %v484_v61 = vpop.f32.mrb[9].mxu0  ;;  %v548_v62 = vpop.f32.mrb[9].mxu1 }
 0x10c   : > { %v594_v63 = vmul.f32 %v1040_v24, %v484_v61  ;;  %v610_v0 = vmul.f32 %v1040_v24, %v548_v62  ;;  %v841_v1 = vpop.f32.mrb[10].mxu0  ;;  %v857_v2 = vpop.f32.mrb[10].mxu1 }
 0x10d   : > { %628 = vst [vmem:[%s1045_s19 + $0x50] sm:$0xff] %v596_v59  ;;  %644 = vst [vmem:[%s1045_s19 + $0xd0] sm:$0xff] %v612_v60  ;;  %v597_v3 = vmul.f32 %v841_v1, %v1040_v24  ;;  %v613_v4 = vmul.f32 %v857_v2, %v1040_v24  ;;  %v487_v5 = vpop.f32.mrb[11].mxu0  ;;  %v551_v6 = vpop.f32.mrb[11].mxu1 }
 0x10e   : > { %626 = vst [vmem:[%s1045_s19 + $0x40] sm:$0xff] %v594_v63  ;;  %642 = vst [vmem:[%s1045_s19 + $0xc0] sm:$0xff] %v610_v0  ;;  %v595_v7 = vmul.f32 %v1040_v24, %v487_v5  ;;  %v611_v8 = vmul.f32 %v1040_v24, %v551_v6 }
 0x10f   : > { %629 = vst [vmem:[%s1045_s19 + $0x58] sm:$0xff] %v597_v3  ;;  %645 = vst [vmem:[%s1045_s19 + $0xd8] sm:$0xff] %v613_v4 }
 0x110   : > { %627 = vst [vmem:[%s1045_s19 + $0x48] sm:$0xff] %v595_v7  ;;  %643 = vst [vmem:[%s1045_s19 + $0xc8] sm:$0xff] %v611_v8 }
 0x112   : > { %v844_v9 = vpop.f32.mrb[12].mxu0  ;;  %v860_v10 = vpop.f32.mrb[12].mxu1 }
 0x113   : > { %v600_v11 = vmul.f32 %v844_v9, %v1040_v24  ;;  %v616_v12 = vmul.f32 %v860_v10, %v1040_v24  ;;  %v500_v13 = vpop.f32.mrb[13].mxu0  ;;  %v564_v14 = vpop.f32.mrb[13].mxu1 }
 0x114   : > { %v598_v15 = vmul.f32 %v1040_v24, %v500_v13  ;;  %v614_v16 = vmul.f32 %v1040_v24, %v564_v14  ;;  %v845_v17 = vpop.f32.mrb[14].mxu0  ;;  %v861_v18 = vpop.f32.mrb[14].mxu1 }
 0x115   : > { %632 = vst [vmem:[%s1045_s19 + $0x70] sm:$0xff] %v600_v11  ;;  %648 = vst [vmem:[%s1045_s19 + $0xf0] sm:$0xff] %v616_v12  ;;  %v601_v19 = vmul.f32 %v845_v17, %v1040_v24  ;;  %v617_v20 = vmul.f32 %v861_v18, %v1040_v24  ;;  %v503_v21 = vpop.f32.mrb[15].mxu0  ;;  %v567_v22 = vpop.f32.mrb[15].mxu1 }
 0x116   : > { %630 = vst [vmem:[%s1045_s19 + $0x60] sm:$0xff] %v598_v15  ;;  %646 = vst [vmem:[%s1045_s19 + $0xe0] sm:$0xff] %v614_v16  ;;  %v599_v23 = vmul.f32 %v1040_v24, %v503_v21  ;;  %v615_v25 = vmul.f32 %v1040_v24, %v567_v22 }
 0x117   : > { %633 = vst [vmem:[%s1045_s19 + $0x78] sm:$0xff] %v601_v19  ;;  %649 = vst [vmem:[%s1045_s19 + $0xf8] sm:$0xff] %v617_v20 }
 0x118   : > { %631 = vst [vmem:[%s1045_s19 + $0x68] sm:$0xff] %v599_v23  ;;  %647 = vst [vmem:[%s1045_s19 + $0xe8] sm:$0xff] %v615_v25 }
 0x119 PF: > { %s13_s14 = sadd.s32 1, %s948_s14   ;;  %s1124_s12 = smov %s944_s13 }
 0x11a   : > { %p10_p5 = scmp.ge.s32.totalorder %s13_s14, 4   ;;  %s1125_s13 = smov %s1127_s15 }
 0x11c   :  { %12 = sbr.rel (!%p10_p5) target bundleno = 2 (0x2), region = 68 }

// kernel: generator_forward.8
= control target key start
LH: loop header
LB: loop body
LE: loop exit
PB: predicated region body
PF: predicated region fallthrough
CT: control target
= control target key end

     0   :  { %s3629_s11 = smov 0   ;;  %s4919_s0 = inlined_call_operand.<no memory space> [shape: f32[1], index: 0, kind: input, shape index: {}]   ;;  %s4920_s1 = inlined_call_operand.vmem [shape: bf16[2,256,128], index: 1, kind: input, shape index: {}]   ;;  %s4921_s2 = inlined_call_operand.vmem [shape: bf16[128,16], index: 2, kind: input, shape index: {}]   ;;  %s4922_s3 = inlined_call_operand.vmem [shape: bf16[128,16], index: 3, kind: input, shape index: {}]   ;;  %s4923_s4 = inlined_call_operand.vmem [shape: bf16[128,128], index: 4, kind: input, shape index: {}]   ;;  %s4924_s5 = inlined_call_operand.vmem [shape: f32[1,16], index: 5, kind: input, shape index: {}]   ;;  %s4925_s6 = inlined_call_operand.vmem [shape: f32[1,16], index: 6, kind: input, shape index: {}]   ;;  %s4926_s7 = inlined_call_operand.vmem [shape: f32[1,128], index: 7, kind: input, shape index: {}]   ;;  %s4927_s8 = inlined_call_operand.vmem [shape: bf16[2,256,128], index: 8, kind: output, shape index: {0}]   ;;  %s4928_s9 = inlined_call_operand.vmem [shape: f32[2,256,256], index: 9, kind: output, shape index: {1}]  }
   0x1   :  { %15 = sst [smem:[#allocation2]] %s4919_s0 }
   0x2 LB: > { %s2662_s12 = sadd.s32 4294967295, %s3574_s11   ;;  %p2666_p0 = scmp.ge.s32.totalorder %s3574_s11, 1  ;;  %s3574_s11 = sphi %s3629_s11, %s21_s11  }
   0x3   : > { %p291_p1 = scmp.lt.s32.totalorder %s3574_s11, 3 }
   0x5   : > { %p292_p2 = pnand %p2666_p0, %p291_p1 }
   0x7   : > { %295 = sbr.rel (%p292_p2) target bundleno = 1344 (0x540), region = 52 }
   0xe   : > { %v3304_v0 = vld [vmem:[%s4921_s2] sm:$0xff]   ;;  %p332_p3 = scmp.lt.s32.totalorder %s2662_s12, 1  ;;  %v3305_v1 = vld [vmem:[%s4921_s2 + $0x8] sm:$0xff]   ;;  %v3306_v2 = vld [vmem:[%s4921_s2 + $0x10] sm:$0xff]   ;;  %vm1220_vm0 = vcmask 130048   ;;  %s2252_s19 = sld [smem:[#allocation2]] }
   0xf   : > { %3272 = vmatprep.subr.bf16.mxu1 %v3304_v0  ;;  %3128 = vmatprep.subr.bf16.mxu0 %v3304_v0  ;;  %v3307_v3 = vld [vmem:[%s4921_s2 + $0x18] sm:$0xff]   ;;  %v3308_v5 = vld [vmem:[%s4921_s2 + $0x20] sm:$0xff]   ;;  %v3309_v6 = vld [vmem:[%s4921_s2 + $0x28] sm:$0xff]  }
  0x10   : > { %s5063_s12 = smov (!%p332_p3, %s2662_s12), 1  ;;  %3280 = vmatpush3.bf16.msra.mxu1 %v3304_v0  ;;  %3129 = vmatpush3.bf16.msra.mxu0 %v3304_v0  ;;  %v3310_v8 = vld [vmem:[%s4921_s2 + $0x30] sm:$0xff]   ;;  %v3311_v9 = vld [vmem:[%s4921_s2 + $0x38] sm:$0xff]   ;;  %v3314_v11 = vld [vmem:[%s4922_s3] sm:$0xff]  }
  0x11   : > { %3273 = vmatprep.subr.bf16.mxu1 %v3305_v1  ;;  %s2766_s18 = sshll.u32 %s5063_s12, 7  ;;  %3130 = vmatprep.subr.bf16.mxu0 %v3305_v1  ;;  %v3315_v14 = vld [vmem:[%s4922_s3 + $0x8] sm:$0xff]   ;;  %v3318_v17 = vld [vmem:[%s4922_s3 + $0x10] sm:$0xff]   ;;  %v3319_v20 = vld [vmem:[%s4922_s3 + $0x18] sm:$0xff]   ;;  %s2768_s0 = sshll.u32 %s5063_s12, 9 }
  0x12   : > { %s3654_s21 = scalar_lea.vmem %s4920_s1, %s2766_s18  ;;  %v3322_v23 = vld [vmem:[%s4922_s3 + $0x20] sm:$0xff]   ;;  %v3323_v26 = vld [vmem:[%s4922_s3 + $0x28] sm:$0xff]   ;;  %v3326_v29 = vld [vmem:[%s4922_s3 + $0x30] sm:$0xff]   ;;  %s4653_s17 = scalar_lea.vmem %s4928_s9, %s2768_s0 }
  0x13   : > { %v3660_v4 = vld [vmem:[%s3654_s21 + $0x40] sm:$0xff]   ;;  %v3680_v10 = vld [vmem:[%s3654_s21 + $0x48] sm:$0xff]   ;;  %v3686_v12 = vld [vmem:[%s3654_s21 + $0x50] sm:$0xff]   ;;  %s4853_s23 = scalar_lea.vmem %s4927_s8, %s2766_s18 }
  0x14   : > { %3281 = vmatpush3.bf16.msra.mxu1 %v3305_v1  ;;  %3131 = vmatpush3.bf16.msra.mxu0 %v3305_v1  ;;  %v3670_v7 = vld [vmem:[%s3654_s21] sm:$0xff]   ;;  %v3689_v13 = vld [vmem:[%s3654_s21 + $0x8] sm:$0xff]   ;;  %v3695_v15 = vld [vmem:[%s3654_s21 + $0x10] sm:$0xff]  }
  0x15   : > { %3274 = vmatprep.subr.bf16.mxu1 %v3306_v2  ;;  %3132 = vmatprep.subr.bf16.mxu0 %v3306_v2  ;;  %v3700_v16 = vld [vmem:[%s3654_s21 + $0x58] sm:$0xff]   ;;  %v3706_v18 = vld [vmem:[%s3654_s21 + $0x60] sm:$0xff]   ;;  %v3722_v22 = vld [vmem:[%s3654_s21 + $0x68] sm:$0xff]  }
  0x16   : > { %3160 = vmatprep.mubr.bf16.mxu1 %v3660_v4  ;;  %3144 = vmatprep.mubr.bf16.mxu0 %v3670_v7  ;;  %v3711_v19 = vld [vmem:[%s3654_s21 + $0x18] sm:$0xff]   ;;  %v3717_v21 = vld [vmem:[%s3654_s21 + $0x20] sm:$0xff]   ;;  %v3728_v24 = vld [vmem:[%s3654_s21 + $0x70] sm:$0xff]  }
  0x17   : > { %v3733_v25 = vld [vmem:[%s3654_s21 + $0x28] sm:$0xff]   ;;  %v3739_v27 = vld [vmem:[%s3654_s21 + $0x30] sm:$0xff]   ;;  %v3744_v28 = vld [vmem:[%s3654_s21 + $0x78] sm:$0xff]  }
  0x18   : > { %3282 = vmatpush3.bf16.msra.mxu1 %v3306_v2  ;;  %3133 = vmatpush3.bf16.msra.mxu0 %v3306_v2  ;;  %v3752_v30 = vld [vmem:[%s3654_s21 + $0x38] sm:$0xff]   ;;  %v3779_v32 = vld [vmem:[%s4924_s5] ss:$0 sm:$0xff] }
  0x19   : > { %3275 = vmatprep.subr.bf16.mxu1 %v3307_v3  ;;  %3134 = vmatprep.subr.bf16.mxu0 %v3307_v3  ;;  %v3327_v31 = vld [vmem:[%s4922_s3 + $0x38] sm:$0xff]  }
  0x1c   : > { %3283 = vmatpush3.bf16.msra.mxu1 %v3307_v3  ;;  %3135 = vmatpush3.bf16.msra.mxu0 %v3307_v3 }
  0x1d   : > { %3276 = vmatprep.subr.bf16.mxu1 %v3308_v5  ;;  %3136 = vmatprep.subr.bf16.mxu0 %v3308_v5 }
  0x20   : > { %3284 = vmatpush3.bf16.msra.mxu1 %v3308_v5  ;;  %3137 = vmatpush3.bf16.msra.mxu0 %v3308_v5 }
  0x21   : > { %3277 = vmatprep.subr.bf16.mxu1 %v3309_v6  ;;  %3138 = vmatprep.subr.bf16.mxu0 %v3309_v6 }
  0x24   : > { %3285 = vmatpush3.bf16.msra.mxu1 %v3309_v6  ;;  %3139 = vmatpush3.bf16.msra.mxu0 %v3309_v6 }
  0x25   : > { %3278 = vmatprep.subr.bf16.mxu1 %v3310_v8  ;;  %3140 = vmatprep.subr.bf16.mxu0 %v3310_v8 }
  0x28   : > { %3286 = vmatpush3.bf16.msra.mxu1 %v3310_v8  ;;  %3141 = vmatpush3.bf16.msra.mxu0 %v3310_v8 }
  0x29   : > { %3279 = vmatprep.subr.bf16.mxu1 %v3311_v9  ;;  %3142 = vmatprep.subr.bf16.mxu0 %v3311_v9 }
  0x2c   : > { %3287 = vmatpush3.bf16.msra.mxu1 %v3311_v9  ;;  %3143 = vmatpush3.bf16.msra.mxu0 %v3311_v9 }
  0x2d   : > { %3176 = vmatprep.subr.bf16.mxu1 %v3314_v11 }
  0x2f   : > { %3161 = vmatmul.mubr.bf16.vlgmr.msra.gmra.mrb[0].mxu1 %v3680_v10  ;;  %3145 = vmatmul.mubr.bf16.vlgmr.msra.gmra.mrb[0].mxu0 %v3689_v13 }
  0x30   : > { %3177 = vmatpush3.bf16.msra.mxu1 %v3314_v11  ;;  %3164 = vmatprep.mubr.bf16.mxu1 %v3686_v12 }
  0x31   : > { %3178 = vmatprep.subr.bf16.mxu1 %v3315_v14  ;;  %3148 = vmatprep.mubr.bf16.mxu0 %v3695_v15 }
  0x34   : > { %3179 = vmatpush3.bf16.msra.mxu1 %v3315_v14 }
  0x35   : > { %3180 = vmatprep.subr.bf16.mxu1 %v3318_v17 }
  0x37   : > { %3165 = vmatmul.mubr.bf16.gmra.mrb[4].mxu1 %v3700_v16  ;;  %3149 = vmatmul.mubr.bf16.gmra.mrb[4].mxu0 %v3711_v19 }
  0x38   : > { %3181 = vmatpush3.bf16.msra.mxu1 %v3318_v17  ;;  %3168 = vmatprep.mubr.bf16.mxu1 %v3706_v18 }
  0x39   : > { %3182 = vmatprep.subr.bf16.mxu1 %v3319_v20  ;;  %3152 = vmatprep.mubr.bf16.mxu0 %v3717_v21 }
  0x3c   : > { %3183 = vmatpush3.bf16.msra.mxu1 %v3319_v20 }
  0x3d   : > { %3184 = vmatprep.subr.bf16.mxu1 %v3322_v23 }
  0x3f   : > { %3169 = vmatmul.mubr.bf16.gmra.mrb[8].mxu1 %v3722_v22  ;;  %3153 = vmatmul.mubr.bf16.gmra.mrb[8].mxu0 %v3733_v25 }
  0x40   : > { %3185 = vmatpush3.bf16.msra.mxu1 %v3322_v23  ;;  %3172 = vmatprep.mubr.bf16.mxu1 %v3728_v24 }
  0x41   : > { %3186 = vmatprep.subr.bf16.mxu1 %v3323_v26  ;;  %3156 = vmatprep.mubr.bf16.mxu0 %v3739_v27 }
  0x44   : > { %3187 = vmatpush3.bf16.msra.mxu1 %v3323_v26 }
  0x45   : > { %3188 = vmatprep.subr.bf16.mxu1 %v3326_v29 }
  0x47   : > { %3173 = vmatmul.mubr.bf16.gmra.mrb[12].mxu1 %v3744_v28  ;;  %3157 = vmatmul.mubr.bf16.gmra.mrb[12].mxu0 %v3752_v30 }
  0x48   : > { %3189 = vmatpush3.bf16.msra.mxu1 %v3326_v29  ;;  %3192 = vmatprep.mubr.bf16.mxu1 %v3670_v7 }
  0x49   : > { %3190 = vmatprep.subr.bf16.mxu1 %v3327_v31  ;;  %3240 = vmatprep.mubr.bf16.mxu0 %v3670_v7 }
  0x4c   : > { %3191 = vmatpush3.bf16.msra.mxu1 %v3327_v31 }
  0x4f   : > { %3193 = vmatmul.mubr.bf16.vlgmr.msra.gmra.mrb[16].mxu1 %v3689_v13 }
  0x50   : > { %3196 = vmatprep.mubr.bf16.mxu1 %v3695_v15 }
  0x57   : > { %3197 = vmatmul.mubr.bf16.gmra.mrb[20].mxu1 %v3711_v19 }
  0x58   : > { %3200 = vmatprep.mubr.bf16.mxu1 %v3717_v21 }
  0x5f   : > { %3201 = vmatmul.mubr.bf16.gmra.mrb[24].mxu1 %v3733_v25 }
  0x60   : > { %3204 = vmatprep.mubr.bf16.mxu1 %v3739_v27 }
  0x67   : > { %3205 = vmatmul.mubr.bf16.gmra.mrb[28].mxu1 %v3752_v30 }
  0x68   : > { %3208 = vmatprep.mubr.bf16.mxu1 %v3660_v4 }
  0x6f   : > { %3209 = vmatmul.mubr.bf16.gmra.mrb[32].mxu1 %v3680_v10 }
  0x70   : > { %3212 = vmatprep.mubr.bf16.mxu1 %v3686_v12 }
  0x77   : > { %3213 = vmatmul.mubr.bf16.gmra.mrb[36].mxu1 %v3700_v16 }
  0x78   : > { %3216 = vmatprep.mubr.bf16.mxu1 %v3706_v18 }
  0x7f   : > { %3217 = vmatmul.mubr.bf16.gmra.mrb[40].mxu1 %v3722_v22 }
  0x80   : > { %3220 = vmatprep.mubr.bf16.mxu1 %v3728_v24 }
  0x87   : > { %3221 = vmatmul.mubr.bf16.gmra.mrb[44].mxu1 %v3744_v28 }
 0x102   : > { %v3162_v33 = vpop.f32.mrb[0].mxu1  ;;  %v3146_v38 = vpop.f32.mrb[0].mxu0 }
 0x103   : > { %v654_v34 = vadd.f32 %v3162_v33, %v3779_v32  ;;  %v645_v35 = vpop.f32.mrb[1].mxu1  ;;  %v590_v41 = vadd.f32 %v3146_v38, %v3779_v32  ;;  %v581_v42 = vpop.f32.mrb[1].mxu0 }
 0x104   : > { %v646_v36 = vadd.f32 %v3779_v32, %v645_v35  ;;  %v3163_v37 = vpop.f32.mrb[2].mxu1  ;;  %v582_v44 = vadd.f32 %v3779_v32, %v581_v42  ;;  %v3147_v45 = vpop.f32.mrb[2].mxu0 }
 0x105   : > { %v657_v39 = vadd.f32 %v3163_v37, %v3779_v32  ;;  %v648_v40 = vpop.f32.mrb[3].mxu1  ;;  %v593_v47 = vadd.f32 %v3147_v45, %v3779_v32  ;;  %v584_v48 = vpop.f32.mrb[3].mxu0 }
 0x106   : > { %v649_v43 = vadd.f32 %v3779_v32, %v648_v40  ;;  %v585_v50 = vadd.f32 %v3779_v32, %v584_v48 }
 0x107   : > { %v3787_v46 = vpack.c.bf16 %v657_v39, %v654_v34  ;;  %v3793_v51 = vpack.c.bf16 %v593_v47, %v590_v41 }
 0x108   : > { %v3790_v49 = vpack.c.bf16 %v649_v43, %v646_v36  ;;  %v3795_v53 = vpack.c.bf16 %v585_v50, %v582_v44 }
 0x10a   : > { %v3166_v52 = vpop.f32.mrb[4].mxu1  ;;  %2984 = vmatprep.mubr.msk.bf16.mxu1 %vm1220_vm0, %v3795_v53  ;;  %v3150_v58 = vpop.f32.mrb[4].mxu0 }
 0x10b   : > { %v670_v54 = vadd.f32 %v3166_v52, %v3779_v32  ;;  %v661_v55 = vpop.f32.mrb[5].mxu1  ;;  %v606_v61 = vadd.f32 %v3150_v58, %v3779_v32  ;;  %v597_v62 = vpop.f32.mrb[5].mxu0 }
 0x10c   : > { %v662_v56 = vadd.f32 %v3779_v32, %v661_v55  ;;  %v3167_v57 = vpop.f32.mrb[6].mxu1  ;;  %v598_v0 = vadd.f32 %v3779_v32, %v597_v62  ;;  %v3151_v5 = vpop.f32.mrb[6].mxu0 }
 0x10d   : > { %v673_v59 = vadd.f32 %v3167_v57, %v3779_v32  ;;  %v664_v60 = vpop.f32.mrb[7].mxu1  ;;  %v609_v8 = vadd.f32 %v3151_v5, %v3779_v32  ;;  %v600_v9 = vpop.f32.mrb[7].mxu0 }
 0x10e   : > { %v665_v63 = vadd.f32 %v3779_v32, %v664_v60  ;;  %v601_v17 = vadd.f32 %v3779_v32, %v600_v9 }
 0x10f   : > { %v3805_v1 = vpack.c.bf16 %v673_v59, %v670_v54  ;;  %v3814_v26 = vpack.c.bf16 %v609_v8, %v606_v61  ;;  %v3836_v54 = vld [vmem:[%s4925_s6] ss:$0 sm:$0xff] }
 0x110   : > { %v3807_v2 = vpack.c.bf16 %v665_v63, %v662_v56  ;;  %v3817_v31 = vpack.c.bf16 %v601_v17, %v598_v0 }
 0x112   : > { %v3170_v3 = vpop.f32.mrb[8].mxu1  ;;  %v3154_v38 = vpop.f32.mrb[8].mxu0 }
 0x113   : > { %v686_v6 = vadd.f32 %v3170_v3, %v3779_v32  ;;  %v677_v7 = vpop.f32.mrb[9].mxu1  ;;  %v622_v41 = vadd.f32 %v3154_v38, %v3779_v32  ;;  %v613_v42 = vpop.f32.mrb[9].mxu0 }
 0x114   : > { %v678_v11 = vadd.f32 %v3779_v32, %v677_v7  ;;  %v3171_v14 = vpop.f32.mrb[10].mxu1  ;;  %v614_v45 = vadd.f32 %v3779_v32, %v613_v42  ;;  %v3155_v55 = vpop.f32.mrb[10].mxu0 }
 0x115   : > { %v689_v20 = vadd.f32 %v3171_v14, %v3779_v32  ;;  %v680_v23 = vpop.f32.mrb[11].mxu1  ;;  %v625_v57 = vadd.f32 %v3155_v55, %v3779_v32  ;;  %v616_v58 = vpop.f32.mrb[11].mxu0 }
 0x116   : > { %v681_v29 = vadd.f32 %v3779_v32, %v680_v23  ;;  %v617_v60 = vadd.f32 %v3779_v32, %v616_v58 }
 0x117   : > { %v3819_v33 = vpack.c.bf16 %v689_v20, %v686_v6  ;;  %v3846_v0 = vpack.c.bf16 %v625_v57, %v622_v41 }
 0x118   : > { %v3821_v34 = vpack.c.bf16 %v681_v29, %v678_v11  ;;  %v3850_v6 = vpack.c.bf16 %v617_v60, %v614_v45 }
 0x11a   : > { %v3174_v35 = vpop.f32.mrb[12].mxu1  ;;  %v3158_v11 = vpop.f32.mrb[12].mxu0 }
 0x11b   : > { %v702_v36 = vadd.f32 %v3174_v35, %v3779_v32  ;;  %v693_v37 = vpop.f32.mrb[13].mxu1  ;;  %v638_v17 = vadd.f32 %v3158_v11, %v3779_v32  ;;  %v629_v20 = vpop.f32.mrb[13].mxu0 }
 0x11c   : > { %v694_v39 = vadd.f32 %v3779_v32, %v693_v37  ;;  %v3175_v40 = vpop.f32.mrb[14].mxu1  ;;  %v630_v29 = vadd.f32 %v3779_v32, %v629_v20 }
 0x11d   : > { %v705_v43 = vadd.f32 %v3175_v40, %v3779_v32  ;;  %v696_v44 = vpop.f32.mrb[15].mxu1 }
 0x11e   : > { %v697_v47 = vadd.f32 %v3779_v32, %v696_v44 }
 0x11f   : > { %v3829_v48 = vpack.c.bf16 %v705_v43, %v702_v36  ;;  %v3159_v43 = vpop.f32.mrb[14].mxu0 }
 0x120   : > { %v3831_v50 = vpack.c.bf16 %v697_v47, %v694_v39  ;;  %v641_v45 = vadd.f32 %v3159_v43, %v3779_v32  ;;  %v632_v47 = vpop.f32.mrb[15].mxu0 }
 0x121   : > { %v633_v55 = vadd.f32 %v3779_v32, %v632_v47 }
 0x122   : > { %v3194_v52 = vpop.f32.mrb[16].mxu1 }
 0x123   : > { %v829_v56 = vpop.f32.mrb[17].mxu1  ;;  %v3841_v61 = vadd.f32 %v3194_v52, %v3836_v54 }
 0x124   : > { %v3195_v59 = vpop.f32.mrb[18].mxu1  ;;  %v830_v3 = vadd.f32 %v3836_v54, %v829_v56 }
 0x125   : > { %v3844_v62 = vadd.f32 %v3195_v59, %v3836_v54  ;;  %v832_v63 = vpop.f32.mrb[19].mxu1  ;;  %v3880_v59 = vpack.c.bf16 %v641_v45, %v638_v17 }
 0x126   : > { %v833_v5 = vadd.f32 %v3836_v54, %v832_v63 }
 0x127   : > { %v957_v7 = vpack.c.bf16 %v3844_v62, %v3841_v61 }
 0x128   : > { %v956_v8 = vpack.c.bf16 %v833_v5, %v830_v3  ;;  %v3888_v3 = vpack.c.bf16 %v633_v55, %v630_v29 }
 0x12a   : > { %v3198_v9 = vpop.f32.mrb[20].mxu1 }
 0x12b   : > { %v845_v14 = vpop.f32.mrb[21].mxu1  ;;  %v3857_v35 = vadd.f32 %v3198_v9, %v3836_v54 }
 0x12c   : > { %v3199_v23 = vpop.f32.mrb[22].mxu1  ;;  %v3863_v38 = vadd.f32 %v3836_v54, %v845_v14 }
 0x12d   : > { %v3860_v36 = vadd.f32 %v3199_v23, %v3836_v54  ;;  %v848_v37 = vpop.f32.mrb[23].mxu1 }
 0x12e   : > { %v3866_v39 = vadd.f32 %v3836_v54, %v848_v37 }
 0x12f   : > { %v959_v40 = vpack.c.bf16 %v3860_v36, %v3857_v35 }
 0x130   : > { %v958_v41 = vpack.c.bf16 %v3866_v39, %v3863_v38 }
 0x131   : > { %v1279_v38 = vsel %vm1220_vm0, %v959_v40, 0 }
 0x132   : > { %v3202_v42 = vpop.f32.mrb[24].mxu1  ;;  %v1276_v61 = vsel %vm1220_vm0, %v958_v41, 0 }
 0x133   : > { %v861_v44 = vpop.f32.mrb[25].mxu1  ;;  %v3875_v56 = vadd.f32 %v3202_v42, %v3836_v54  ;;  %v1270_v42 = vsel %vm1220_vm0, %v956_v8, 0  ;;  %v1273_v8 = vsel %vm1220_vm0, %v957_v7, 0 }
 0x134   : > { %v3203_v52 = vpop.f32.mrb[26].mxu1  ;;  %v3883_v60 = vadd.f32 %v3836_v54, %v861_v44 }
 0x135   : > { %v3878_v57 = vadd.f32 %v3203_v52, %v3836_v54  ;;  %v864_v58 = vpop.f32.mrb[27].mxu1 }
 0x136   : > { %v3886_v63 = vadd.f32 %v3836_v54, %v864_v58 }
 0x138   : > { %v4969_v39 = vpack.c.bf16 %v3886_v63, %v3883_v60 }
 0x13a   : > { %v3206_v9 = vpop.f32.mrb[28].mxu1  ;;  %v1282_v41 = vsel %vm1220_vm0, %v4969_v39, 0 }
 0x13b   : > { %v877_v11 = vpop.f32.mrb[29].mxu1  ;;  %v3895_v17 = vadd.f32 %v3206_v9, %v3836_v54 }
 0x13c   : > { %v3207_v14 = vpop.f32.mrb[30].mxu1  ;;  %v3901_v37 = vadd.f32 %v3836_v54, %v877_v11 }
 0x13d   : > { %v3898_v20 = vadd.f32 %v3207_v14, %v3836_v54  ;;  %v880_v23 = vpop.f32.mrb[31].mxu1 }
 0x13e   : > { %v3904_v29 = vadd.f32 %v3836_v54, %v880_v23 }
 0x13f   : > { %v4971_v36 = vpack.c.bf16 %v3898_v20, %v3895_v17 }
 0x140   : > { %v962_v43 = vpack.c.bf16 %v3904_v29, %v3901_v37 }
 0x141   : > { %v1291_v40 = vsel %vm1220_vm0, %v4971_v36, 0 }
 0x142   : > { %v3210_v44 = vpop.f32.mrb[32].mxu1  ;;  %v1288_v35 = vsel %vm1220_vm0, %v962_v43, 0 }
 0x143   : > { %v893_v45 = vpop.f32.mrb[33].mxu1  ;;  %v902_v52 = vadd.f32 %v3210_v44, %v3836_v54 }
 0x144   : > { %v3211_v47 = vpop.f32.mrb[34].mxu1  ;;  %v894_v9 = vadd.f32 %v3836_v54, %v893_v45 }
 0x145   : > { %v905_v55 = vadd.f32 %v3211_v47, %v3836_v54  ;;  %v896_v58 = vpop.f32.mrb[35].mxu1 }
 0x146   : > { %v897_v11 = vadd.f32 %v3836_v54, %v896_v58 }
 0x147   : > { %v965_v14 = vpack.c.bf16 %v905_v55, %v902_v52 }
 0x148   : > { %v964_v23 = vpack.c.bf16 %v897_v11, %v894_v9 }
 0x14a   : > { %3288 = vmatprep.subr.msk.bf16.mxu1 %vm1220_vm0, %v964_v23  ;;  %v3214_v32 = vpop.f32.mrb[36].mxu1 }
 0x14b   : > { %2969 = vmatpush3.bf16.xpose.msra.mxu1 %v1270_v42  ;;  %v918_v37 = vadd.f32 %v3214_v32, %v3836_v54  ;;  %v909_v29 = vpop.f32.mrb[37].mxu1 }
 0x14c   : > { %3289 = vmatprep.subr.msk.bf16.mxu1 %vm1220_vm0, %v965_v14  ;;  %v910_v44 = vadd.f32 %v3836_v54, %v909_v29  ;;  %v3215_v47 = vpop.f32.mrb[38].mxu1 }
 0x14d   : > { %v921_v45 = vadd.f32 %v3215_v47, %v3836_v54  ;;  %v912_v5 = vpop.f32.mrb[39].mxu1 }
 0x14e   : > { %v913_v52 = vadd.f32 %v3836_v54, %v912_v5 }
 0x14f   : > { %v967_v55 = vpack.c.bf16 %v921_v45, %v918_v37 }
 0x150   : > { %v966_v58 = vpack.c.bf16 %v913_v52, %v910_v44 }
 0x152   : > { %v3218_v42 = vpop.f32.mrb[40].mxu1 }
 0x153   : > { %2971 = vmatpush3.bf16.xpose.msra.mxu1 %v1273_v8  ;;  %v934_v32 = vadd.f32 %v3218_v42, %v3836_v54  ;;  %v925_v9 = vpop.f32.mrb[41].mxu1 }
 0x154   : > { %3290 = vmatprep.subr.msk.bf16.mxu1 %vm1220_vm0, %v966_v58  ;;  %v926_v11 = vadd.f32 %v3836_v54, %v925_v9  ;;  %v3219_v14 = vpop.f32.mrb[42].mxu1 }
 0x155   : > { %v937_v23 = vadd.f32 %v3219_v14, %v3836_v54  ;;  %v928_v5 = vpop.f32.mrb[43].mxu1 }
 0x156   : > { %v929_v37 = vadd.f32 %v3836_v54, %v928_v5 }
 0x157   : > { %v969_v29 = vpack.c.bf16 %v937_v23, %v934_v32 }
 0x158   : > { %v968_v44 = vpack.c.bf16 %v929_v37, %v926_v11 }
 0x15a   : > { %v3222_v62 = vpop.f32.mrb[44].mxu1 }
 0x15b   : > { %2973 = vmatpush3.bf16.xpose.msra.mxu1 %v1276_v61  ;;  %v950_v7 = vadd.f32 %v3222_v62, %v3836_v54  ;;  %v941_v47 = vpop.f32.mrb[45].mxu1 }
 0x15c   : > { %3291 = vmatprep.subr.msk.bf16.mxu1 %vm1220_vm0, %v967_v55  ;;  %v942_v45 = vadd.f32 %v3836_v54, %v941_v47  ;;  %v3223_v52 = vpop.f32.mrb[46].mxu1 }
 0x15d   : > { %v953_v58 = vadd.f32 %v3223_v52, %v3836_v54  ;;  %v944_v8 = vpop.f32.mrb[47].mxu1 }
 0x15e   : > { %v945_v42 = vadd.f32 %v3836_v54, %v944_v8  ;;  %v4970_v54 = vpack.c.bf16 %v3878_v57, %v3875_v56 }
 0x15f   : > { %v971_v32 = vpack.c.bf16 %v953_v58, %v950_v7 }
 0x160   : > { %v970_v9 = vpack.c.bf16 %v945_v42, %v942_v45  ;;  %v1285_v55 = vsel %vm1220_vm0, %v4970_v54, 0 }
 0x163   : > { %2975 = vmatpush3.bf16.xpose.msra.mxu1 %v1279_v38 }
 0x164   : > { %3292 = vmatprep.subr.msk.bf16.mxu1 %vm1220_vm0, %v968_v44 }
 0x16b   : > { %2977 = vmatpush3.bf16.xpose.msra.mxu1 %v1282_v41 }
 0x16c   : > { %3293 = vmatprep.subr.msk.bf16.mxu1 %vm1220_vm0, %v969_v29 }
 0x173   : > { %2979 = vmatpush3.bf16.xpose.msra.mxu1 %v1285_v55 }
 0x174   : > { %3294 = vmatprep.subr.msk.bf16.mxu1 %vm1220_vm0, %v970_v9 }
 0x17b   : > { %2981 = vmatpush3.bf16.xpose.msra.mxu1 %v1288_v35 }
 0x17c   : > { %3295 = vmatprep.subr.msk.bf16.mxu1 %vm1220_vm0, %v971_v32 }
 0x183   : > { %2983 = vmatpush3.bf16.xpose.msra.mxu1 %v1291_v40 }
 0x18a   : > { %2985 = vmatmul.mubr.msk.bf16.vlgmr.msra.gmra.mrb[48].mxu1 %vm1220_vm0, %v3795_v53  ;;  %v3339_v53 = vld [vmem:[%s4923_s4 + $0x18] sm:$0xff]  }
 0x18b   : > { %2986 = vmatprep.mubr.msk.bf16.mxu1 %vm1220_vm0, %v3793_v51 }
 0x192   : > { %2987 = vmatmul.mubr.msk.bf16.gmra.mrb[52].mxu1 %vm1220_vm0, %v3793_v51  ;;  %v3338_v51 = vld [vmem:[%s4923_s4 + $0x10] sm:$0xff]  }
 0x193   : > { %2988 = vmatprep.mubr.msk.bf16.mxu1 %vm1220_vm0, %v3817_v31 }
 0x19a   : > { %2989 = vmatmul.mubr.msk.bf16.gmra.mrb[56].mxu1 %vm1220_vm0, %v3817_v31  ;;  %v3343_v31 = vld [vmem:[%s4923_s4 + $0x38] sm:$0xff]  }
 0x19b   : > { %2990 = vmatprep.mubr.msk.bf16.mxu1 %vm1220_vm0, %v3814_v26 }
 0x1a2   : > { %2991 = vmatmul.mubr.msk.bf16.gmra.mrb[60].mxu1 %vm1220_vm0, %v3814_v26  ;;  %v3342_v26 = vld [vmem:[%s4923_s4 + $0x30] sm:$0xff]  }
 0x1a3   : > { %2992 = vmatprep.mubr.msk.bf16.mxu1 %vm1220_vm0, %v3850_v6 }
 0x1aa   : > { %2993 = vmatmul.mubr.msk.bf16.gmra.mrb[64].mxu1 %vm1220_vm0, %v3850_v6 }
 0x1ab   : > { %2994 = vmatprep.mubr.msk.bf16.mxu1 %vm1220_vm0, %v3846_v0 }
 0x1b2   : > { %2995 = vmatmul.mubr.msk.bf16.gmra.mrb[68].mxu1 %vm1220_vm0, %v3846_v0 }
 0x1b3   : > { %2996 = vmatprep.mubr.msk.bf16.mxu1 %vm1220_vm0, %v3888_v3 }
 0x1ba   : > { %2997 = vmatmul.mubr.msk.bf16.gmra.mrb[72].mxu1 %vm1220_vm0, %v3888_v3 }
 0x1bb   : > { %2998 = vmatprep.mubr.msk.bf16.mxu1 %vm1220_vm0, %v3880_v59 }
 0x1c2   : > { %2999 = vmatmul.mubr.msk.bf16.gmra.mrb[76].mxu1 %vm1220_vm0, %v3880_v59 }
 0x1c3   : > { %3000 = vmatprep.mubr.msk.bf16.mxu1 %vm1220_vm0, %v3790_v49 }
 0x1ca   : > { %3001 = vmatmul.mubr.msk.bf16.gmra.mrb[80].mxu1 %vm1220_vm0, %v3790_v49  ;;  %v3336_v49 = vld [vmem:[%s4923_s4] sm:$0xff]  }
 0x1cb   : > { %3002 = vmatprep.mubr.msk.bf16.mxu1 %vm1220_vm0, %v3787_v46  ;;  %3224 = vmatprep.subr.bf16.mxu0 %v3336_v49 }
 0x1cc   : > { %3225 = vmatpush3.bf16.msra.mxu0 %v3336_v49 }
 0x1d2   : > { %3003 = vmatmul.mubr.msk.bf16.gmra.mrb[84].mxu1 %vm1220_vm0, %v3787_v46  ;;  %v3337_v46 = vld [vmem:[%s4923_s4 + $0x8] sm:$0xff]  }
 0x1d3   : > { %3004 = vmatprep.mubr.msk.bf16.mxu1 %vm1220_vm0, %v3807_v2  ;;  %3226 = vmatprep.subr.bf16.mxu0 %v3337_v46 }
 0x1d4   : > { %3227 = vmatpush3.bf16.msra.mxu0 %v3337_v46 }
 0x1d5   : > { %3228 = vmatprep.subr.bf16.mxu0 %v3338_v51 }
 0x1d8   : > { %3229 = vmatpush3.bf16.msra.mxu0 %v3338_v51 }
 0x1d9   : > { %3230 = vmatprep.subr.bf16.mxu0 %v3339_v53 }
 0x1da   : > { %3005 = vmatmul.mubr.msk.bf16.gmra.mrb[88].mxu1 %vm1220_vm0, %v3807_v2  ;;  %v3341_v2 = vld [vmem:[%s4923_s4 + $0x28] sm:$0xff]  }
 0x1db   : > { %3006 = vmatprep.mubr.msk.bf16.mxu1 %vm1220_vm0, %v3805_v1 }
 0x1dc   : > { %3231 = vmatpush3.bf16.msra.mxu0 %v3339_v53 }
 0x1e2   : > { %3007 = vmatmul.mubr.msk.bf16.gmra.mrb[92].mxu1 %vm1220_vm0, %v3805_v1  ;;  %v3340_v1 = vld [vmem:[%s4923_s4 + $0x20] sm:$0xff]  }
 0x1e3   : > { %3008 = vmatprep.mubr.msk.bf16.mxu1 %vm1220_vm0, %v3821_v34  ;;  %3232 = vmatprep.subr.bf16.mxu0 %v3340_v1 }
 0x1e4   : > { %3233 = vmatpush3.bf16.msra.mxu0 %v3340_v1 }
 0x1e5   : > { %3234 = vmatprep.subr.bf16.mxu0 %v3341_v2 }
 0x1e8   : > { %3235 = vmatpush3.bf16.msra.mxu0 %v3341_v2 }
 0x1e9   : > { %3236 = vmatprep.subr.bf16.mxu0 %v3342_v26 }
 0x1ea   : > { %3009 = vmatmul.mubr.msk.bf16.gmra.mrb[96].mxu1 %vm1220_vm0, %v3821_v34 }
 0x1eb   : > { %3010 = vmatprep.mubr.msk.bf16.mxu1 %vm1220_vm0, %v3819_v33 }
 0x1ec   : > { %3237 = vmatpush3.bf16.msra.mxu0 %v3342_v26 }
 0x1ed   : > { %3238 = vmatprep.subr.bf16.mxu0 %v3343_v31 }
 0x1f0   : > { %3239 = vmatpush3.bf16.msra.mxu0 %v3343_v31 }
 0x1f2   : > { %3011 = vmatmul.mubr.msk.bf16.gmra.mrb[100].mxu1 %vm1220_vm0, %v3819_v33 }
 0x1f3   : > { %3012 = vmatprep.mubr.msk.bf16.mxu1 %vm1220_vm0, %v3831_v50  ;;  %3241 = vmatmul.mubr.bf16.vlgmr.msra.gmra.mrb[16].mxu0 %v3689_v13  ;;  %v1510_v13 = vlaneseq }
 0x1f4   : > { %3244 = vmatprep.mubr.bf16.mxu0 %v3695_v15 }
 0x1f5   : > { %v1511_v15 = vand.u32 127, %v1510_v13 }
 0x1fa   : > { %3013 = vmatmul.mubr.msk.bf16.gmra.mrb[104].mxu1 %vm1220_vm0, %v3831_v50 }
 0x1fb   : > { %3014 = vmatprep.mubr.msk.bf16.mxu1 %vm1220_vm0, %v3829_v48  ;;  %3245 = vmatmul.mubr.bf16.gmra.mrb[20].mxu0 %v3711_v19  ;;  %v4061_v19 = vadd.s32 128, %v1511_v15 }
 0x1fc   : > { %3248 = vmatprep.mubr.bf16.mxu0 %v3717_v21 }
 0x1fd   : > { %vm1514_vm1 = vcmp.lt.s32.totalorder %v4061_v19, 196 }
 0x202   : > { %3015 = vmatmul.mubr.msk.bf16.gmra.mrb[108].mxu1 %vm1220_vm0, %v3829_v48 }
 0x203   : > { %3249 = vmatmul.mubr.bf16.gmra.mrb[24].mxu0 %v3733_v25 }
 0x204   : > { %3252 = vmatprep.mubr.bf16.mxu0 %v3739_v27 }
 0x20b   : > { %3253 = vmatmul.mubr.bf16.gmra.mrb[28].mxu0 %v3752_v30 }
 0x20c   : > { %3256 = vmatprep.mubr.bf16.mxu0 %v3660_v4 }
 0x213   : > { %3257 = vmatmul.mubr.bf16.gmra.mrb[32].mxu0 %v3680_v10 }
 0x214   : > { %3260 = vmatprep.mubr.bf16.mxu0 %v3686_v12 }
 0x21b   : > { %3261 = vmatmul.mubr.bf16.gmra.mrb[36].mxu0 %v3700_v16 }
 0x21c   : > { %3264 = vmatprep.mubr.bf16.mxu0 %v3706_v18 }
 0x223   : > { %3265 = vmatmul.mubr.bf16.gmra.mrb[40].mxu0 %v3722_v22 }
 0x224   : > { %3268 = vmatprep.mubr.bf16.mxu0 %v3728_v24 }
 0x22b   : > { %3269 = vmatmul.mubr.bf16.gmra.mrb[44].mxu0 %v3744_v28 }
 0x25d   : > { %v4064_v4 = vpop.f32.mrb[48].mxu1 }
 0x25e   : > { %v1353_v10 = vpop.f32.mrb[49].mxu1 }
 0x25f   : > { %v4068_v12 = vsel %vm1514_vm1, %v1353_v10, -1e+30  ;;  %v4070_v16 = vpop.f32.mrb[50].mxu1 }
 0x260   : > { %v1357_v18 = vpop.f32.mrb[51].mxu1  ;;  %v1579_v21 = vmax.f32 %v4064_v4, %v4068_v12 }
 0x261   : > { %v4076_v22 = vsel %vm1514_vm1, %v1357_v18, -1e+30 }
 0x262   : > { %1580 = vmax.xlane.f32.xlu0 %v1579_v21  ;;  %v1582_v24 = vmax.f32 %v4070_v16, %v4076_v22 }
 0x265   : > { %v4080_v25 = vpop.f32.mrb[52].mxu1 }
 0x266   : > { %1583 = vmax.xlane.f32.xlu0 %v1582_v24  ;;  %v1363_v27 = vpop.f32.mrb[53].mxu1 }
 0x267   : > { %v4084_v28 = vsel %vm1514_vm1, %v1363_v27, -1e+30  ;;  %v4086_v30 = vpop.f32.mrb[54].mxu1 }
 0x268   : > { %v1367_v33 = vpop.f32.mrb[55].mxu1  ;;  %v1585_v34 = vmax.f32 %v4080_v25, %v4084_v28 }
 0x269   : > { %v4092_v48 = vsel %vm1514_vm1, %v1367_v33, -1e+30 }
 0x26a   : > { %1586 = vmax.xlane.f32.xlu1 %v1585_v34  ;;  %v1588_v50 = vmax.f32 %v4086_v30, %v4092_v48 }
 0x26d   : > { %v4096_v0 = vpop.f32.mrb[56].mxu1 }
 0x26e   : > { %1589 = vmax.xlane.f32.xlu1 %v1588_v50  ;;  %v1373_v6 = vpop.f32.mrb[57].mxu1 }
 0x26f   : > { %v4100_v56 = vsel %vm1514_vm1, %v1373_v6, -1e+30  ;;  %v4102_v57 = vpop.f32.mrb[58].mxu1 }
 0x270   : > { %v1377_v59 = vpop.f32.mrb[59].mxu1  ;;  %v1591_v60 = vmax.f32 %v4096_v0, %v4100_v56 }
 0x271   : > { %v4108_v63 = vsel %vm1514_vm1, %v1377_v59, -1e+30 }
 0x272   : > { %1592 = vmax.xlane.f32.xlu0 %v1591_v60  ;;  %v1594_v3 = vmax.f32 %v4102_v57, %v4108_v63 }
 0x274   : > { %1595 = vmax.xlane.f32.xlu1 %v1594_v3 }
 0x275   : > { %v4112_v17 = vpop.f32.mrb[60].mxu1 }
 0x276   : > { %v1383_v20 = vpop.f32.mrb[61].mxu1 }
 0x277   : > { %v4116_v43 = vsel %vm1514_vm1, %v1383_v20, -1e+30  ;;  %v4118_v11 = vpop.f32.mrb[62].mxu1 }
 0x278   : > { %v1387_v14 = vpop.f32.mrb[63].mxu1  ;;  %v1597_v23 = vmax.f32 %v4112_v17, %v4116_v43 }
 0x279   : > { %v4124_v5 = vsel %vm1514_vm1, %v1387_v14, -1e+30 }
 0x27a   : > { %1598 = vmax.xlane.f32.xlu0 %v1597_v23  ;;  %v1600_v37 = vmax.f32 %v4118_v11, %v4124_v5 }
 0x27c   : > { %1601 = vmax.xlane.f32.xlu1 %v1600_v37 }
 0x27d   : > { %v4128_v29 = vpop.f32.mrb[64].mxu1 }
 0x27e   : > { %v1393_v44 = vpop.f32.mrb[65].mxu1 }
 0x27f   : > { %v4132_v61 = vsel %vm1514_vm1, %v1393_v44, -1e+30  ;;  %v4134_v62 = vpop.f32.mrb[66].mxu1 }
 0x280   : > { %v1397_v7 = vpop.f32.mrb[67].mxu1  ;;  %v1603_v47 = vmax.f32 %v4128_v29, %v4132_v61 }
 0x281   : > { %v4140_v45 = vsel %vm1514_vm1, %v1397_v7, -1e+30 }
 0x282   : > { %1604 = vmax.xlane.f32.xlu0 %v1603_v47  ;;  %v1606_v52 = vmax.f32 %v4134_v62, %v4140_v45 }
 0x284   : > { %1607 = vmax.xlane.f32.xlu1 %v1606_v52 }
 0x285   : > { %v4144_v58 = vpop.f32.mrb[68].mxu1 }
 0x286   : > { %v1403_v8 = vpop.f32.mrb[69].mxu1 }
 0x287   : > { %v4148_v42 = vsel %vm1514_vm1, %v1403_v8, -1e+30  ;;  %v4150_v32 = vpop.f32.mrb[70].mxu1 }
 0x288   : > { %v1407_v9 = vpop.f32.mrb[71].mxu1  ;;  %v1609_v38 = vmax.f32 %v4144_v58, %v4148_v42 }
 0x289   : > { %v4156_v39 = vsel %vm1514_vm1, %v1407_v9, -1e+30 }
 0x28a   : > { %4972 = vst [vmem:[#allocation3_spill] sm:$0xff] %v4156_v39  ;;  %1610 = vmax.xlane.f32.xlu0 %v1609_v38  ;;  %v1612_v41 = vmax.f32 %v4150_v32, %v4156_v39 }
 0x28c   : > { %1613 = vmax.xlane.f32.xlu1 %v1612_v41 }
 0x28d   : > { %v4160_v54 = vpop.f32.mrb[72].mxu1 }
 0x28e   : > { %4973 = vst [vmem:[#allocation4_spill] sm:$0xff] %v4160_v54  ;;  %v1413_v55 = vpop.f32.mrb[73].mxu1 }
 0x28f   : > { %v4164_v35 = vsel %vm1514_vm1, %v1413_v55, -1e+30  ;;  %v4166_v36 = vpop.f32.mrb[74].mxu1 }
 0x290   : > { %4974 = vst [vmem:[#allocation5_spill] sm:$0xff] %v4164_v35  ;;  %4975 = vst [vmem:[#allocation6_spill] sm:$0xff] %v4166_v36  ;;  %v1417_v40 = vpop.f32.mrb[75].mxu1  ;;  %v1615_v49 = vmax.f32 %v4160_v54, %v4164_v35 }
 0x291   : > { %v4172_v46 = vsel %vm1514_vm1, %v1417_v40, -1e+30 }
 0x292   : > { %4976 = vst [vmem:[#allocation7_spill] sm:$0xff] %v4172_v46  ;;  %1616 = vmax.xlane.f32.xlu0 %v1615_v49  ;;  %v1618_v51 = vmax.f32 %v4166_v36, %v4172_v46 }
 0x294   : > { %1619 = vmax.xlane.f32.xlu1 %v1618_v51 }
 0x295   : > { %v4176_v53 = vpop.f32.mrb[76].mxu1 }
 0x296   : > { %4977 = vst [vmem:[#allocation8_spill] sm:$0xff] %v4176_v53  ;;  %v1423_v1 = vpop.f32.mrb[77].mxu1 }
 0x297   : > { %v4180_v2 = vsel %vm1514_vm1, %v1423_v1, -1e+30  ;;  %v4182_v26 = vpop.f32.mrb[78].mxu1 }
 0x298   : > { %4978 = vst [vmem:[#allocation9_spill] sm:$0xff] %v4180_v2  ;;  %4979 = vst [vmem:[#allocation10_spill] sm:$0xff] %v4182_v26  ;;  %v1427_v31 = vpop.f32.mrb[79].mxu1  ;;  %v1621_v13 = vmax.f32 %v4176_v53, %v4180_v2 }
 0x299   : > { %v4188_v15 = vsel %vm1514_vm1, %v1427_v31, -1e+30 }
 0x29a   : > { %4980 = vst [vmem:[#allocation11_spill] sm:$0xff] %v4188_v15  ;;  %1622 = vmax.xlane.f32.xlu0 %v1621_v13  ;;  %v1624_v10 = vmax.f32 %v4182_v26, %v4188_v15 }
 0x29c   : > { %1625 = vmax.xlane.f32.xlu1 %v1624_v10 }
 0x29d   : > { %v4192_v18 = vpop.f32.mrb[80].mxu1 }
 0x29e   : > { %4981 = vst [vmem:[#allocation12_spill] sm:$0xff] %v4192_v18  ;;  %v1433_v21 = vpop.f32.mrb[81].mxu1 }
 0x29f   : > { %v4196_v24 = vsel %vm1514_vm1, %v1433_v21, -1e+30  ;;  %v4198_v27 = vpop.f32.mrb[82].mxu1 }
 0x2a0   : > { %4982 = vst [vmem:[#allocation13_spill] sm:$0xff] %v4196_v24  ;;  %4983 = vst [vmem:[#allocation14_spill] sm:$0xff] %v4198_v27  ;;  %v1437_v33 = vpop.f32.mrb[83].mxu1  ;;  %v1627_v34 = vmax.f32 %v4192_v18, %v4196_v24 }
 0x2a1   : > { %v4204_v50 = vsel %vm1514_vm1, %v1437_v33, -1e+30 }
 0x2a2   : > { %4984 = vst [vmem:[#allocation15_spill] sm:$0xff] %v4204_v50  ;;  %1628 = vmax.xlane.f32.xlu0 %v1627_v34  ;;  %v1630_v6 = vmax.f32 %v4198_v27, %v4204_v50 }
 0x2a4   : > { %1631 = vmax.xlane.f32.xlu1 %v1630_v6 }
 0x2a5   : > { %v4208_v59 = vpop.f32.mrb[84].mxu1 }
 0x2a6   : > { %4985 = vst [vmem:[#allocation16_spill] sm:$0xff] %v4208_v59  ;;  %v1443_v60 = vpop.f32.mrb[85].mxu1 }
 0x2a7   : > { %v4212_v3 = vsel %vm1514_vm1, %v1443_v60, -1e+30  ;;  %v4214_v20 = vpop.f32.mrb[86].mxu1 }
 0x2a8   : > { %4986 = vst [vmem:[#allocation17_spill] sm:$0xff] %v4212_v3  ;;  %4987 = vst [vmem:[#allocation18_spill] sm:$0xff] %v4214_v20  ;;  %v1447_v14 = vpop.f32.mrb[87].mxu1  ;;  %v1633_v23 = vmax.f32 %v4208_v59, %v4212_v3 }
 0x2a9   : > { %v4220_v37 = vsel %vm1514_vm1, %v1447_v14, -1e+30 }
 0x2aa   : > { %4988 = vst [vmem:[#allocation19_spill] sm:$0xff] %v4220_v37  ;;  %1634 = vmax.xlane.f32.xlu0 %v1633_v23  ;;  %v1636_v44 = vmax.f32 %v4214_v20, %v4220_v37 }
 0x2ac   : > { %1637 = vmax.xlane.f32.xlu1 %v1636_v44 }
 0x2ad   : > { %v4224_v7 = vpop.f32.mrb[88].mxu1 }
 0x2ae   : > { %4989 = vst [vmem:[#allocation20_spill] sm:$0xff] %v4224_v7  ;;  %v1453_v47 = vpop.f32.mrb[89].mxu1 }
 0x2af   : > { %v4228_v52 = vsel %vm1514_vm1, %v1453_v47, -1e+30  ;;  %v4230_v8 = vpop.f32.mrb[90].mxu1 }
 0x2b0   : > { %4990 = vst [vmem:[#allocation21_spill] sm:$0xff] %v4228_v52  ;;  %4991 = vst [vmem:[#allocation22_spill] sm:$0xff] %v4230_v8  ;;  %v1457_v9 = vpop.f32.mrb[91].mxu1  ;;  %v1639_v38 = vmax.f32 %v4224_v7, %v4228_v52 }
 0x2b1   : > { %v4236_v41 = vsel %vm1514_vm1, %v1457_v9, -1e+30 }
 0x2b2   : > { %4992 = vst [vmem:[#allocation23_spill] sm:$0xff] %v4236_v41  ;;  %1640 = vmax.xlane.f32.xlu0 %v1639_v38  ;;  %v1642_v55 = vmax.f32 %v4230_v8, %v4236_v41 }
 0x2b4   : > { %1643 = vmax.xlane.f32.xlu1 %v1642_v55 }
 0x2b5   : > { %v4240_v40 = vpop.f32.mrb[92].mxu1 }
 0x2b6   : > { %4993 = vst [vmem:[#allocation24_spill] sm:$0xff] %v4240_v40  ;;  %v1463_v49 = vpop.f32.mrb[93].mxu1 }
 0x2b7   : > { %v4244_v51 = vsel %vm1514_vm1, %v1463_v49, -1e+30  ;;  %v4246_v1 = vpop.f32.mrb[94].mxu1 }
 0x2b8   : > { %4994 = vst [vmem:[#allocation25_spill] sm:$0xff] %v4244_v51  ;;  %4995 = vst [vmem:[#allocation26_spill] sm:$0xff] %v4246_v1  ;;  %v1467_v31 = vpop.f32.mrb[95].mxu1  ;;  %v1645_v13 = vmax.f32 %v4240_v40, %v4244_v51  ;;  %v4291_v51 = vld [vmem:[%s4926_s7] ss:$0 sm:$0xff] }
 0x2b9   : > { %v4252_v10 = vsel %vm1514_vm1, %v1467_v31, -1e+30 }
 0x2ba   : > { %4996 = vst [vmem:[#allocation27_spill] sm:$0xff] %v4252_v10  ;;  %1646 = vmax.xlane.f32.xlu0 %v1645_v13  ;;  %v1648_v21 = vmax.f32 %v4246_v1, %v4252_v10 }
 0x2bc   : > { %1649 = vmax.xlane.f32.xlu1 %v1648_v21 }
 0x2bd   : > { %v4256_v33 = vpop.f32.mrb[96].mxu1 }
 0x2be   : > { %v4258_v34 = vpop.f32.mrb[97].mxu1 }
 0x2bf   : > { %v4260_v6 = vpop.f32.mrb[98].mxu1 }
 0x2c0   : > { %v4262_v60 = vpop.f32.mrb[99].mxu1 }
 0x2c5   : > { %v4264_v14 = vpop.f32.mrb[100].mxu1 }
 0x2c6   : > { %v4266_v23 = vpop.f32.mrb[101].mxu1  ;;  %v3242_v1 = vpop.f32.mrb[16].mxu0 }
 0x2c7   : > { %v4268_v44 = vpop.f32.mrb[102].mxu1  ;;  %v4294_v40 = vadd.f32 %v3242_v1, %v4291_v51  ;;  %v1077_v41 = vpop.f32.mrb[17].mxu0 }
 0x2c8   : > { %v4270_v47 = vpop.f32.mrb[103].mxu1  ;;  %v4297_v8 = vadd.f32 %v4291_v51, %v1077_v41  ;;  %v3243_v52 = vpop.f32.mrb[18].mxu0 }
 0x2c9   : > { %v4300_v7 = vadd.f32 %v3243_v52, %v4291_v51  ;;  %v1080_v37 = vpop.f32.mrb[19].mxu0 }
 0x2ca   : > { %v4303_v20 = vadd.f32 %v4291_v51, %v1080_v37 }
 0x2cd   : > { %v4272_v9 = vpop.f32.mrb[104].mxu1 }
 0x2ce   : > { %v4274_v38 = vpop.f32.mrb[105].mxu1  ;;  %v3246_v3 = vpop.f32.mrb[20].mxu0 }
 0x2cf   : > { %v4276_v55 = vpop.f32.mrb[106].mxu1  ;;  %v4308_v50 = vadd.f32 %v3246_v3, %v4291_v51  ;;  %v1093_v1 = vpop.f32.mrb[21].mxu0 }
 0x2d0   : > { %v4278_v49 = vpop.f32.mrb[107].mxu1  ;;  %v4313_v27 = vadd.f32 %v4291_v51, %v1093_v1  ;;  %v3247_v52 = vpop.f32.mrb[22].mxu0 }
 0x2d1   : > { %v4316_v24 = vadd.f32 %v3247_v52, %v4291_v51  ;;  %v1096_v37 = vpop.f32.mrb[23].mxu0 }
 0x2d2   : > { %v4319_v18 = vadd.f32 %v4291_v51, %v1096_v37 }
 0x2d5   : > { %v4280_v31 = vpop.f32.mrb[108].mxu1 }
 0x2d6   : > { %4997 = vst [vmem:[#allocation28_spill] sm:$0xff] %v4280_v31  ;;  %v4282_v13 = vpop.f32.mrb[109].mxu1  ;;  %v3250_v15 = vpop.f32.mrb[24].mxu0 }
 0x2d7   : > { %v4284_v21 = vpop.f32.mrb[110].mxu1  ;;  %v4326_v41 = vadd.f32 %v3250_v15, %v4291_v51  ;;  %v1109_v1 = vpop.f32.mrb[25].mxu0 }
 0x2d8   : > { %4998 = vst [vmem:[#allocation29_spill] sm:$0xff] %v4284_v21  ;;  %v4286_v10 = vpop.f32.mrb[111].mxu1  ;;  %v4329_v26 = vadd.f32 %v4291_v51, %v1109_v1  ;;  %v3251_v52 = vpop.f32.mrb[26].mxu0 }
 0x2d9   : > { %4999 = vst [vmem:[#allocation30_spill] sm:$0xff] %v4286_v10  ;;  %v4332_v2 = vadd.f32 %v3251_v52, %v4291_v51  ;;  %v1112_v37 = vpop.f32.mrb[27].mxu0 }
 0x2da   : > { %v4335_v53 = vadd.f32 %v4291_v51, %v1112_v37 }
 0x2de   : > { %v3254_v36 = vpop.f32.mrb[28].mxu0 }
 0x2df   : > { %v4344_v21 = vadd.f32 %v3254_v36, %v4291_v51  ;;  %v1125_v52 = vpop.f32.mrb[29].mxu0 }
 0x2e0   : > { %v4347_v37 = vadd.f32 %v4291_v51, %v1125_v52  ;;  %v3255_v10 = vpop.f32.mrb[30].mxu0 }
 0x2e1   : > { %5000 = vst [vmem:[#allocation31_spill] sm:$0xff] %v4344_v21  ;;  %v4350_v31 = vadd.f32 %v3255_v10, %v4291_v51  ;;  %v1128_v3 = vpop.f32.mrb[31].mxu0 }
 0x2e2   : > { %v4355_v36 = vadd.f32 %v4291_v51, %v1128_v3 }
 0x2e6   : > { %v3258_v39 = vpop.f32.mrb[32].mxu0 }
 0x2ef   : > { %v1581_v15 = vpop.xlane.xlu0 %1580 }
 0x2f0   : > { %v1675_v46 = vsub.f32 %v4064_v4, %v1581_v15  ;;  %v1676_v1 = vsub.f32 %v4068_v12, %v1581_v15 }
 0x2f2   : > { %v1739_v35 = vmul.f32 1.442695, %v1675_v46  ;;  %v1741_v54 = vmul.f32 1.442695, %v1676_v1 }
 0x2f3   : > { %v1584_v59 = vpop.xlane.xlu0 %1583 }
 0x2f4   : > { %3360 = vpow2.f32 %v1739_v35  ;;  %v1677_v4 = vsub.f32 %v4070_v16, %v1584_v59  ;;  %v1678_v12 = vsub.f32 %v4076_v22, %v1584_v59  ;;  %v1150_v22 = vadd.f32 %v3258_v39, %v4291_v51  ;;  %v1141_v59 = vpop.f32.mrb[33].mxu0 }
 0x2f5   : > { %3362 = vpow2.f32 %v1741_v54  ;;  %v1142_v46 = vadd.f32 %v4291_v51, %v1141_v59 }
 0x2f6   : > { %v1743_v15 = vmul.f32 1.442695, %v1677_v4  ;;  %v1745_v1 = vmul.f32 1.442695, %v1678_v12  ;;  %v3259_v4 = vpop.f32.mrb[34].mxu0 }
 0x2f7   : > { %v1587_v10 = vpop.xlane.xlu1 %1586  ;;  %v1153_v21 = vadd.f32 %v3259_v4, %v4291_v51  ;;  %v1144_v52 = vpop.f32.mrb[35].mxu0  ;;  %v4376_v4 = vsel %vm1514_vm1, %v4258_v34, -1e+30  ;;  %v5001_v34 = vpack.c.bf16 %v4303_v20, %v4297_v8 }
 0x2f8   : > { %3364 = vpow2.f32 %v1743_v15  ;;  %v1679_v35 = vsub.f32 %v4080_v25, %v1587_v10  ;;  %v1680_v16 = vsub.f32 %v4084_v28, %v1587_v10  ;;  %v1145_v28 = vadd.f32 %v4291_v51, %v1144_v52  ;;  %v3262_v52 = vpop.f32.mrb[36].mxu0 }
 0x2f9   : > { %3366 = vpow2.f32 %v1745_v1  ;;  %v1213_v1 = vpack.c.bf16 %v1153_v21, %v1150_v22  ;;  %v1166_v22 = vadd.f32 %v3262_v52, %v4291_v51  ;;  %v1651_v20 = vmax.f32 %v4256_v33, %v4376_v4 }
 0x2fa   : > { %v1747_v54 = vmul.f32 1.442695, %v1679_v35  ;;  %v1749_v3 = vmul.f32 1.442695, %v1680_v16  ;;  %v1212_v16 = vpack.c.bf16 %v1145_v28, %v1142_v46 }
 0x2fb   : > { %v1590_v12 = vpop.xlane.xlu1 %1589 }
 0x2fc   : > { %3368 = vpow2.f32 %v1747_v54  ;;  %v1681_v15 = vsub.f32 %v4086_v30, %v1590_v12  ;;  %v1682_v25 = vsub.f32 %v4092_v48, %v1590_v12  ;;  %3016 = vmatprep.subr.bf16.mxu0 %v1212_v16 }
 0x2fd   : > { %3370 = vpow2.f32 %v1749_v3  ;;  %v1157_v3 = vpop.f32.mrb[37].mxu0  ;;  %3017 = vmatpush3.bf16.msra.mxu0 %v5001_v34 }
 0x2fe   : > { %v4369_v39 = vpop.eup %3360  ;;  %v1751_v10 = vmul.f32 1.442695, %v1681_v15  ;;  %v1753_v35 = vmul.f32 1.442695, %v1682_v25  ;;  %v3263_v28 = vpop.f32.mrb[38].mxu0  ;;  %3018 = vmatprep.subr.bf16.mxu0 %v1213_v1  ;;  %v1158_v8 = vadd.f32 %v4291_v51, %v1157_v3 }
 0x2ff   : > { %v4371_v59 = vpop.eup %3362  ;;  %v1593_v54 = vpop.xlane.xlu0 %1592  ;;  %v1169_v16 = vadd.f32 %v3263_v28, %v4291_v51 }
 0x300   : > { %3372 = vpow2.f32 %v1751_v10  ;;  %v1683_v30 = vsub.f32 %v4096_v0, %v1593_v54  ;;  %v1684_v48 = vsub.f32 %v4100_v56, %v1593_v54  ;;  %v1867_v21 = vadd.f32 %v4371_v59, %v4369_v39 }
 0x301   : > { %3374 = vpow2.f32 %v1753_v35  ;;  %v1596_v46 = vpop.xlane.xlu1 %1595  ;;  %v4395_v35 = vsel %vm1514_vm1, %v4262_v60, -1e+30  ;;  %v5002_v60 = vpack.c.bf16 %v4300_v7, %v4294_v40 }
 0x302   : > { %v4386_v12 = vpop.eup %3364  ;;  %v1755_v15 = vmul.f32 1.442695, %v1683_v30  ;;  %v1757_v0 = vmul.f32 1.442695, %v1684_v48  ;;  %v1685_v56 = vsub.f32 %v4102_v57, %v1596_v46  ;;  %v1686_v25 = vsub.f32 %v4108_v63, %v1596_v46  ;;  %1868 = vadd.xlane.f32.xlu0 %v1867_v21  ;;  %v1160_v57 = vpop.f32.mrb[39].mxu0 }
 0x303   : > { %v4390_v10 = vpop.eup %3366  ;;  %v1215_v30 = vpack.c.bf16 %v1169_v16, %v1166_v22  ;;  %v1161_v48 = vadd.f32 %v4291_v51, %v1160_v57  ;;  %3019 = vmatpush3.bf16.msra.mxu0 %v5002_v60  ;;  %v1654_v3 = vmax.f32 %v4260_v6, %v4395_v35  ;;  %v4416_v22 = vsel %vm1514_vm1, %v4266_v23, -1e+30 }
 0x304   : > { %3376 = vpow2.f32 %v1755_v15  ;;  %v1759_v63 = vmul.f32 1.442695, %v1685_v56  ;;  %v1761_v54 = vmul.f32 1.442695, %v1686_v25  ;;  %v1870_v1 = vadd.f32 %v4390_v10, %v4386_v12 }
 0x305   : > { %3378 = vpow2.f32 %v1757_v0  ;;  %v1214_v34 = vpack.c.bf16 %v1161_v48, %v1158_v8  ;;  %v3266_v0 = vpop.f32.mrb[40].mxu0 }
 0x306   : > { %v4407_v21 = vpop.eup %3368  ;;  %3380 = vpow2.f32 %v1759_v63  ;;  %1871 = vadd.xlane.f32.xlu1 %v1870_v1  ;;  %1652 = vmax.xlane.f32.xlu0 %v1651_v20  ;;  %v1182_v25 = vadd.f32 %v3266_v0, %v4291_v51  ;;  %v1173_v28 = vpop.f32.mrb[41].mxu0  ;;  %v4432_v63 = vsel %vm1514_vm1, %v4270_v47, -1e+30 }
 0x307   : > { %v4409_v52 = vpop.eup %3370  ;;  %3382 = vpow2.f32 %v1761_v54  ;;  %v1599_v46 = vpop.xlane.xlu0 %1598  ;;  %3020 = vmatprep.subr.bf16.mxu0 %v1214_v34  ;;  %v1657_v54 = vmax.f32 %v4264_v14, %v4416_v22  ;;  %v1174_v1 = vadd.f32 %v4291_v51, %v1173_v28 }
 0x308   : > { %v1687_v7 = vsub.f32 %v4112_v17, %v1599_v46  ;;  %v1688_v40 = vsub.f32 %v4116_v43, %v1599_v46  ;;  %v1873_v15 = vadd.f32 %v4409_v52, %v4407_v21  ;;  %v3267_v17 = vpop.f32.mrb[42].mxu0 }
 0x309   : > { %v1602_v56 = vpop.xlane.xlu1 %1601  ;;  %v1176_v48 = vpop.f32.mrb[43].mxu0 }
 0x30a   : > { %v4423_v20 = vpop.eup %3372  ;;  %v1763_v8 = vmul.f32 1.442695, %v1687_v7  ;;  %v1765_v16 = vmul.f32 1.442695, %v1688_v40  ;;  %v1689_v23 = vsub.f32 %v4118_v11, %v1602_v56  ;;  %v1690_v57 = vsub.f32 %v4124_v5, %v1602_v56  ;;  %1874 = vadd.xlane.f32.xlu0 %v1873_v15  ;;  %1655 = vmax.xlane.f32.xlu1 %v1654_v3 }
 0x30b   : > { %v4427_v43 = vpop.eup %3374  ;;  %v5003_v11 = vpack.c.bf16 %v4319_v18, %v4313_v27  ;;  %v1185_v5 = vadd.f32 %v3267_v17, %v4291_v51  ;;  %v1177_v34 = vadd.f32 %v4291_v51, %v1176_v48  ;;  %v1660_v40 = vmax.f32 %v4268_v44, %v4432_v63 }
 0x30c   : > { %3384 = vpow2.f32 %v1763_v8  ;;  %v1767_v60 = vmul.f32 1.442695, %v1689_v23  ;;  %v1769_v46 = vmul.f32 1.442695, %v1690_v57  ;;  %v1876_v3 = vadd.f32 %v4427_v43, %v4423_v20 }
 0x30d   : > { %3021 = vmatpush3.bf16.msra.mxu0 %v5003_v11  ;;  %3386 = vpow2.f32 %v1765_v16  ;;  %v1217_v47 = vpack.c.bf16 %v1185_v5, %v1182_v25  ;;  %v1216_v15 = vpack.c.bf16 %v1177_v34, %v1174_v1  ;;  %v4458_v56 = vsel %vm1514_vm1, %v4274_v38, -1e+30  ;;  %v3270_v16 = vpop.f32.mrb[44].mxu0 }
 0x30e   : > { %3022 = vmatprep.subr.bf16.mxu0 %v1215_v30  ;;  %v4444_v7 = vpop.eup %3376  ;;  %3388 = vpow2.f32 %v1767_v60  ;;  %1877 = vadd.xlane.f32.xlu1 %v1876_v3  ;;  %v5004_v30 = vpack.c.bf16 %v4316_v24, %v4308_v50  ;;  %v5005_v38 = vpack.c.bf16 %v4335_v53, %v4329_v26  ;;  %v5006_v60 = vpack.c.bf16 %v4332_v2, %v4326_v41 }
 0x30f   : > { %1658 = vmax.xlane.f32.xlu0 %v1657_v54  ;;  %v4446_v18 = vpop.eup %3378  ;;  %3390 = vpow2.f32 %v1769_v46  ;;  %v1605_v27 = vpop.xlane.xlu0 %1604  ;;  %v4494_v3 = vsel %vm1514_vm1, %v4282_v13, -1e+30 }
 0x310   : > { %v4453_v0 = vpop.eup %3380  ;;  %v1691_v25 = vsub.f32 %v4128_v29, %v1605_v27  ;;  %v1692_v28 = vsub.f32 %v4132_v61, %v1605_v27  ;;  %v1879_v8 = vadd.f32 %v4446_v18, %v4444_v7  ;;  %v4471_v29 = vsel %vm1514_vm1, %v4278_v49, -1e+30  ;;  %v1189_v49 = vpop.f32.mrb[45].mxu0 }
 0x311   : > { %3023 = vmatpush3.bf16.msra.mxu0 %v5004_v30  ;;  %v4464_v23 = vpop.eup %3382  ;;  %v1608_v57 = vpop.xlane.xlu1 %1607  ;;  %v1663_v61 = vmax.f32 %v4272_v9, %v4458_v56  ;;  %v1666_v53 = vmax.f32 %v4276_v55, %v4471_v29  ;;  %v1190_v2 = vadd.f32 %v4291_v51, %v1189_v49 }
 0x312   : > { %3024 = vmatprep.subr.bf16.mxu0 %v1216_v15  ;;  %v1771_v24 = vmul.f32 1.442695, %v1691_v25  ;;  %v1773_v50 = vmul.f32 1.442695, %v1692_v28  ;;  %v1693_v17 = vsub.f32 %v4134_v62, %v1608_v57  ;;  %v1694_v54 = vsub.f32 %v4140_v45, %v1608_v57  ;;  %1661 = vmax.xlane.f32.xlu1 %v1660_v40  ;;  %v3271_v26 = vpop.f32.mrb[46].mxu0 }
 0x313   : > { %1880 = vadd.xlane.f32.xlu0 %v1879_v8  ;;  %v1882_v62 = vadd.f32 %v4464_v23, %v4453_v0  ;;  %v1192_v40 = vpop.f32.mrb[47].mxu0  ;;  %v5007_v8 = vld [vmem:[#allocation3_spill] sm:$0xff] }
 0x314   : > { %3392 = vpow2.f32 %v1771_v24  ;;  %v1775_v1 = vmul.f32 1.442695, %v1693_v17  ;;  %v1777_v11 = vmul.f32 1.442695, %v1694_v54  ;;  %v1193_v41 = vadd.f32 %v4291_v51, %v1192_v40 }
 0x315   : > { %3025 = vmatpush3.bf16.msra.mxu0 %v5005_v38  ;;  %3394 = vpow2.f32 %v1773_v50  ;;  %v1198_v24 = vadd.f32 %v3270_v16, %v4291_v51  ;;  %v5009_v38 = vld [vmem:[#allocation30_spill] sm:$0xff] }
 0x316   : > { %3026 = vmatprep.subr.bf16.mxu0 %v1217_v47  ;;  %v4480_v45 = vpop.eup %3384  ;;  %3396 = vpow2.f32 %v1775_v1  ;;  %1883 = vadd.xlane.f32.xlu1 %v1882_v62  ;;  %v1218_v50 = vpack.c.bf16 %v1193_v41, %v1190_v2  ;;  %v1201_v1 = vadd.f32 %v3271_v26, %v4291_v51  ;;  %v5012_v51 = vld [vmem:[#allocation5_spill] sm:$0xff] }
 0x317   : > { %1664 = vmax.xlane.f32.xlu0 %v1663_v61  ;;  %v4482_v5 = vpop.eup %3386  ;;  %3398 = vpow2.f32 %v1777_v11  ;;  %v1611_v48 = vpop.xlane.xlu0 %1610 }
 0x318   : > { %v4489_v46 = vpop.eup %3388  ;;  %v1695_v47 = vsub.f32 %v4144_v58, %v1611_v48  ;;  %v1696_v34 = vsub.f32 %v4148_v42, %v1611_v48  ;;  %v1885_v27 = vadd.f32 %v4482_v5, %v4480_v45  ;;  %v5008_v58 = vld [vmem:[#allocation28_spill] sm:$0xff]  ;;  %v1219_v49 = vpack.c.bf16 %v1201_v1, %v1198_v24  ;;  %v5019_v1 = vld [vmem:[#allocation9_spill] sm:$0xff] }
 0x319   : > { %3027 = vmatpush3.bf16.msra.mxu0 %v5006_v60  ;;  %v4500_v15 = vpop.eup %3390  ;;  %v1614_v30 = vpop.xlane.xlu1 %1613  ;;  %v1669_v42 = vmax.f32 %v5008_v58, %v4494_v3  ;;  %v5010_v48 = vpack.c.bf16 %v4355_v36, %v4347_v37  ;;  %v5014_v37 = vld [vmem:[#allocation6_spill] sm:$0xff] }
 0x31a   : > { %v1779_v25 = vmul.f32 1.442695, %v1695_v47  ;;  %v1781_v28 = vmul.f32 1.442695, %v1696_v34  ;;  %v1697_v13 = vsub.f32 %v4150_v32, %v1614_v30  ;;  %v1698_v57 = vsub.f32 %v5007_v8, %v1614_v30  ;;  %1667 = vmax.xlane.f32.xlu1 %v1666_v53  ;;  %3028 = vmatprep.subr.bf16.mxu0 %v1218_v50  ;;  %v5011_v53 = vld [vmem:[#allocation4_spill] sm:$0xff]  ;;  %v5013_v34 = vld [vmem:[#allocation29_spill] sm:$0xff] }
 0x31b   : > { %1886 = vadd.xlane.f32.xlu0 %v1885_v27  ;;  %v1888_v61 = vadd.f32 %v4500_v15, %v4489_v46  ;;  %v4514_v32 = vsel %vm1514_vm1, %v5009_v38, -1e+30  ;;  %v5018_v38 = vld [vmem:[#allocation8_spill] sm:$0xff] }
 0x31c   : > { %3400 = vpow2.f32 %v1779_v25  ;;  %v1783_v17 = vmul.f32 1.442695, %v1697_v13  ;;  %v1785_v54 = vmul.f32 1.442695, %v1698_v57  ;;  %v1672_v27 = vmax.f32 %v5013_v34, %v4514_v32  ;;  %v5015_v25 = vld [vmem:[#allocation7_spill] sm:$0xff] }
 0x31d   : > { %3402 = vpow2.f32 %v1781_v28  ;;  %3029 = vmatpush3.bf16.msra.mxu0 %v5010_v48  ;;  %v5016_v13 = vld [vmem:[#allocation31_spill] sm:$0xff] }
 0x31e   : > { %v4517_v11 = vpop.eup %3392  ;;  %3404 = vpow2.f32 %v1783_v17  ;;  %1889 = vadd.xlane.f32.xlu1 %v1888_v61  ;;  %3030 = vmatprep.subr.bf16.mxu0 %v1219_v49  ;;  %v5017_v8 = vpack.c.bf16 %v4350_v31, %v5016_v13 }
 0x31f   : > { %1670 = vmax.xlane.f32.xlu0 %v1669_v42  ;;  %v4519_v16 = vpop.eup %3394  ;;  %3406 = vpow2.f32 %v1785_v54  ;;  %v1617_v62 = vpop.xlane.xlu0 %1616 }
 0x320   : > { %v4524_v19 = vpop.eup %3396  ;;  %v1699_v60 = vsub.f32 %v5011_v53, %v1617_v62  ;;  %v1700_v26 = vsub.f32 %v5012_v51, %v1617_v62  ;;  %v1891_v47 = vadd.f32 %v4519_v16, %v4517_v11 }
 0x321   : > { %v4532_v40 = vpop.eup %3398  ;;  %v1620_v30 = vpop.xlane.xlu1 %1619  ;;  %3031 = vmatpush3.bf16.msra.mxu0 %v5017_v8  ;;  %v5022_v8 = vld [vmem:[#allocation12_spill] sm:$0xff] }
 0x322   : > { %v1787_v2 = vmul.f32 1.442695, %v1699_v60  ;;  %v1789_v41 = vmul.f32 1.442695, %v1700_v26  ;;  %v1701_v36 = vsub.f32 %v5014_v37, %v1620_v30  ;;  %v1702_v28 = vsub.f32 %v5015_v25, %v1620_v30  ;;  %1673 = vmax.xlane.f32.xlu1 %v1672_v27  ;;  %v5020_v26 = vld [vmem:[#allocation10_spill] sm:$0xff]  ;;  %v5021_v27 = vld [vmem:[#allocation11_spill] sm:$0xff] }
 0x323   : > { %1892 = vadd.xlane.f32.xlu0 %v1891_v47  ;;  %v1894_v24 = vadd.f32 %v4532_v40, %v4524_v19 }
 0x324   : > { %3408 = vpow2.f32 %v1787_v2  ;;  %v1791_v57 = vmul.f32 1.442695, %v1701_v36  ;;  %v1793_v42 = vmul.f32 1.442695, %v1702_v28 }
 0x325   : > { %3410 = vpow2.f32 %v1789_v41 }
 0x326   : > { %v4541_v50 = vpop.eup %3400  ;;  %3412 = vpow2.f32 %v1791_v57  ;;  %1895 = vadd.xlane.f32.xlu1 %v1894_v24 }
 0x327   : > { %v4543_v17 = vpop.eup %3402  ;;  %3414 = vpow2.f32 %v1793_v42  ;;  %v1623_v54 = vpop.xlane.xlu0 %1622  ;;  %v5023_v42 = vld [vmem:[#allocation13_spill] sm:$0xff] }
 0x328   : > { %v4545_v61 = vpop.eup %3404  ;;  %v1703_v31 = vsub.f32 %v5018_v38, %v1623_v54  ;;  %v1704_v62 = vsub.f32 %v5019_v1, %v1623_v54  ;;  %v1897_v49 = vadd.f32 %v4543_v17, %v4541_v50 }
 0x329   : > { %v4551_v48 = vpop.eup %3406  ;;  %v1626_v53 = vpop.xlane.xlu1 %1625 }
 0x32a   : > { %v1795_v60 = vmul.f32 1.442695, %v1703_v31  ;;  %v1797_v51 = vmul.f32 1.442695, %v1704_v62  ;;  %v1705_v47 = vsub.f32 %v5020_v26, %v1626_v53  ;;  %v1706_v30 = vsub.f32 %v5021_v27, %v1626_v53  ;;  %1898 = vadd.xlane.f32.xlu0 %v1897_v49  ;;  %v5024_v49 = vld [vmem:[#allocation14_spill] sm:$0xff] }
 0x32b   : > { %v1900_v2 = vadd.f32 %v4551_v48, %v4545_v61 }
 0x32c   : > { %3416 = vpow2.f32 %v1795_v60  ;;  %v1799_v41 = vmul.f32 1.442695, %v1705_v47  ;;  %v1801_v37 = vmul.f32 1.442695, %v1706_v30  ;;  %v5025_v60 = vld [vmem:[#allocation15_spill] sm:$0xff] }
 0x32d   : > { %3418 = vpow2.f32 %v1797_v51  ;;  %1901 = vadd.xlane.f32.xlu1 %v1900_v2 }
 0x32e   : > { %v4557_v36 = vpop.eup %3408  ;;  %3420 = vpow2.f32 %v1799_v41 }
 0x32f   : > { %v4559_v25 = vpop.eup %3410  ;;  %3422 = vpow2.f32 %v1801_v37  ;;  %v1629_v28 = vpop.xlane.xlu0 %1628 }
 0x330   : > { %v4561_v13 = vpop.eup %3412  ;;  %v1707_v57 = vsub.f32 %v5022_v8, %v1629_v28  ;;  %v1708_v24 = vsub.f32 %v5023_v42, %v1629_v28  ;;  %v1903_v54 = vadd.f32 %v4559_v25, %v4557_v36  ;;  %v5028_v28 = vld [vmem:[#allocation16_spill] sm:$0xff] }
 0x331   : > { %v4567_v38 = vpop.eup %3414  ;;  %v1632_v31 = vpop.xlane.xlu1 %1631 }
 0x332   : > { %v1803_v1 = vmul.f32 1.442695, %v1707_v57  ;;  %v1805_v62 = vmul.f32 1.442695, %v1708_v24  ;;  %v1709_v53 = vsub.f32 %v5024_v49, %v1632_v31  ;;  %v1710_v51 = vsub.f32 %v5025_v60, %v1632_v31  ;;  %1904 = vadd.xlane.f32.xlu0 %v1903_v54  ;;  %v5029_v57 = vld [vmem:[#allocation17_spill] sm:$0xff]  ;;  %v5031_v49 = vld [vmem:[#allocation18_spill] sm:$0xff] }
 0x333   : > { %v1906_v26 = vadd.f32 %v4567_v38, %v4561_v13  ;;  %v5032_v60 = vld [vmem:[#allocation19_spill] sm:$0xff] }
 0x334   : > { %3424 = vpow2.f32 %v1803_v1  ;;  %v1807_v47 = vmul.f32 1.442695, %v1709_v53  ;;  %v1809_v27 = vmul.f32 1.442695, %v1710_v51 }
 0x335   : > { %3426 = vpow2.f32 %v1805_v62  ;;  %1907 = vadd.xlane.f32.xlu1 %v1906_v26 }
 0x336   : > { %v4573_v30 = vpop.eup %3416  ;;  %3428 = vpow2.f32 %v1807_v47 }
 0x337   : > { %5026 = vst [vmem:[#allocation3_spill] sm:$0xff] %v4573_v30  ;;  %v4575_v2 = vpop.eup %3418  ;;  %3430 = vpow2.f32 %v1809_v27  ;;  %v1635_v41 = vpop.xlane.xlu0 %1634 }
 0x338   : > { %v4577_v37 = vpop.eup %3420  ;;  %v1711_v8 = vsub.f32 %v5028_v28, %v1635_v41  ;;  %v1712_v42 = vsub.f32 %v5029_v57, %v1635_v41  ;;  %v1909_v24 = vadd.f32 %v4575_v2, %v4573_v30 }
 0x339   : > { %5027 = vst [vmem:[#allocation28_spill] sm:$0xff] %v4577_v37  ;;  %v4583_v54 = vpop.eup %3422  ;;  %v1638_v31 = vpop.xlane.xlu1 %1637 }
 0x33a   : > { %5030 = vst [vmem:[#allocation30_spill] sm:$0xff] %v4583_v54  ;;  %v1811_v1 = vmul.f32 1.442695, %v1711_v8  ;;  %v1813_v62 = vmul.f32 1.442695, %v1712_v42  ;;  %v1713_v53 = vsub.f32 %v5031_v49, %v1638_v31  ;;  %v1714_v51 = vsub.f32 %v5032_v60, %v1638_v31  ;;  %1910 = vadd.xlane.f32.xlu0 %v1909_v24  ;;  %v5036_v42 = vld [vmem:[#allocation20_spill] sm:$0xff] }
 0x33b   : > { %v1912_v26 = vadd.f32 %v4583_v54, %v4577_v37  ;;  %v5037_v24 = vld [vmem:[#allocation21_spill] sm:$0xff]  ;;  %v5040_v37 = vld [vmem:[#allocation23_spill] sm:$0xff] }
 0x33c   : > { %3432 = vpow2.f32 %v1811_v1  ;;  %v1815_v47 = vmul.f32 1.442695, %v1713_v53  ;;  %v1817_v27 = vmul.f32 1.442695, %v1714_v51 }
 0x33d   : > { %3434 = vpow2.f32 %v1813_v62  ;;  %1913 = vadd.xlane.f32.xlu1 %v1912_v26  ;;  %v5039_v26 = vld [vmem:[#allocation22_spill] sm:$0xff] }
 0x33e   : > { %v4589_v41 = vpop.eup %3424  ;;  %3436 = vpow2.f32 %v1815_v47 }
 0x33f   : > { %5033 = vst [vmem:[#allocation4_spill] sm:$0xff] %v4589_v41  ;;  %v4591_v28 = vpop.eup %3426  ;;  %3438 = vpow2.f32 %v1817_v27  ;;  %v1641_v8 = vpop.xlane.xlu0 %1640 }
 0x340   : > { %5034 = vst [vmem:[#allocation5_spill] sm:$0xff] %v4591_v28  ;;  %v4593_v57 = vpop.eup %3428  ;;  %v1715_v31 = vsub.f32 %v5036_v42, %v1641_v8  ;;  %v1716_v49 = vsub.f32 %v5037_v24, %v1641_v8  ;;  %v1915_v1 = vadd.f32 %v4591_v28, %v4589_v41 }
 0x341   : > { %5035 = vst [vmem:[#allocation29_spill] sm:$0xff] %v4593_v57  ;;  %v4599_v53 = vpop.eup %3430  ;;  %v1644_v62 = vpop.xlane.xlu1 %1643 }
 0x342   : > { %5038 = vst [vmem:[#allocation6_spill] sm:$0xff] %v4599_v53  ;;  %v1819_v60 = vmul.f32 1.442695, %v1715_v31  ;;  %v1821_v51 = vmul.f32 1.442695, %v1716_v49  ;;  %v1717_v47 = vsub.f32 %v5039_v26, %v1644_v62  ;;  %v1718_v54 = vsub.f32 %v5040_v37, %v1644_v62  ;;  %1916 = vadd.xlane.f32.xlu0 %v1915_v1  ;;  %v5041_v26 = vld [vmem:[#allocation24_spill] sm:$0xff] }
 0x343   : > { %v1918_v27 = vadd.f32 %v4599_v53, %v4593_v57  ;;  %v5042_v1 = vld [vmem:[#allocation25_spill] sm:$0xff]  ;;  %v5043_v57 = vld [vmem:[#allocation26_spill] sm:$0xff]  ;;  %v5044_v53 = vld [vmem:[#allocation27_spill] sm:$0xff] }
 0x344   : > { %3440 = vpow2.f32 %v1819_v60  ;;  %v1823_v42 = vmul.f32 1.442695, %v1717_v47  ;;  %v1825_v30 = vmul.f32 1.442695, %v1718_v54 }
 0x345   : > { %3442 = vpow2.f32 %v1821_v51  ;;  %1919 = vadd.xlane.f32.xlu1 %v1918_v27 }
 0x346   : > { %v4605_v8 = vpop.eup %3432  ;;  %3444 = vpow2.f32 %v1823_v42 }
 0x347   : > { %v4607_v24 = vpop.eup %3434  ;;  %3446 = vpow2.f32 %v1825_v30  ;;  %v1647_v31 = vpop.xlane.xlu0 %1646 }
 0x348   : > { %v4609_v49 = vpop.eup %3436  ;;  %v1719_v37 = vsub.f32 %v5041_v26, %v1647_v31  ;;  %v1720_v62 = vsub.f32 %v5042_v1, %v1647_v31  ;;  %v1921_v60 = vadd.f32 %v4607_v24, %v4605_v8 }
 0x349   : > { %v4615_v47 = vpop.eup %3438  ;;  %v1650_v54 = vpop.xlane.xlu1 %1649 }
 0x34a   : > { %v1827_v51 = vmul.f32 1.442695, %v1719_v37  ;;  %v1829_v27 = vmul.f32 1.442695, %v1720_v62  ;;  %v1721_v42 = vsub.f32 %v5043_v57, %v1650_v54  ;;  %v1722_v41 = vsub.f32 %v5044_v53, %v1650_v54  ;;  %1922 = vadd.xlane.f32.xlu0 %v1921_v60 }
 0x34b   : > { %v1924_v30 = vadd.f32 %v4615_v47, %v4609_v49 }
 0x34c   : > { %3448 = vpow2.f32 %v1827_v51  ;;  %v1831_v26 = vmul.f32 1.442695, %v1721_v42  ;;  %v1833_v28 = vmul.f32 1.442695, %v1722_v41 }
 0x34d   : > { %3450 = vpow2.f32 %v1829_v27  ;;  %1925 = vadd.xlane.f32.xlu1 %v1924_v30 }
 0x34e   : > { %v4621_v31 = vpop.eup %3440  ;;  %3452 = vpow2.f32 %v1831_v26 }
 0x34f   : > { %v4623_v1 = vpop.eup %3442  ;;  %3454 = vpow2.f32 %v1833_v28 }
 0x350   : > { %v4625_v37 = vpop.eup %3444  ;;  %v1927_v57 = vadd.f32 %v4623_v1, %v4621_v31 }
 0x351   : > { %5045 = vst [vmem:[#allocation7_spill] sm:$0xff] %v4625_v37  ;;  %v4629_v53 = vpop.eup %3446 }
 0x352   : > { %5046 = vst [vmem:[#allocation31_spill] sm:$0xff] %v4629_v53  ;;  %1928 = vadd.xlane.f32.xlu0 %v1927_v57  ;;  %v1930_v62 = vadd.f32 %v4629_v53, %v4625_v37 }
 0x354   : > { %1931 = vadd.xlane.f32.xlu1 %v1930_v62 }
 0x356   : > { %v4633_v41 = vpop.eup %3448 }
 0x357   : > { %5047 = vst [vmem:[#allocation8_spill] sm:$0xff] %v4633_v41  ;;  %v4635_v60 = vpop.eup %3450 }
 0x358   : > { %5048 = vst [vmem:[#allocation9_spill] sm:$0xff] %v4635_v60  ;;  %v4637_v54 = vpop.eup %3452  ;;  %v1933_v28 = vadd.f32 %v4635_v60, %v4633_v41 }
 0x359   : > { %5049 = vst [vmem:[#allocation10_spill] sm:$0xff] %v4637_v54  ;;  %v4641_v51 = vpop.eup %3454 }
 0x35a   : > { %1934 = vadd.xlane.f32.xlu0 %v1933_v28  ;;  %v1936_v27 = vadd.f32 %v4641_v51, %v4637_v54 }
 0x35c   : > { %1937 = vadd.xlane.f32.xlu1 %v1936_v27 }
 0x38f   : > { %v1869_v42 = vpop.xlane.xlu0 %1868 }
 0x390   : > { %3456 = vrcp.f32 %v1869_v42 }
 0x393   : > { %v1872_v30 = vpop.xlane.xlu1 %1871  ;;  %v1653_v26 = vpop.xlane.xlu0 %1652 }
 0x394   : > { %3458 = vrcp.f32 %v1872_v30  ;;  %v1723_v57 = vsub.f32 %v4256_v33, %v1653_v26  ;;  %v1724_v62 = vsub.f32 %v4376_v4, %v1653_v26 }
 0x396   : > { %v1835_v37 = vmul.f32 1.442695, %v1723_v57  ;;  %v1837_v53 = vmul.f32 1.442695, %v1724_v62 }
 0x397   : > { %v1875_v41 = vpop.xlane.xlu0 %1874  ;;  %v1656_v60 = vpop.xlane.xlu1 %1655 }
 0x398   : > { %3460 = vpow2.f32 %v1835_v37  ;;  %v1725_v28 = vsub.f32 %v4260_v6, %v1656_v60  ;;  %v1726_v54 = vsub.f32 %v4395_v35, %v1656_v60 }
 0x399   : > { %3462 = vpow2.f32 %v1837_v53 }
 0x39a   : > { %v3457_v27 = vpop.eup %3456  ;;  %3464 = vrcp.f32 %v1875_v41  ;;  %v1839_v33 = vmul.f32 1.442695, %v1725_v28  ;;  %v1841_v4 = vmul.f32 1.442695, %v1726_v54 }
 0x39b   : > { %v1964_v42 = vmul.f32 %v3457_v27, %v4369_v39  ;;  %v1878_v30 = vpop.xlane.xlu1 %1877  ;;  %v1965_v6 = vmul.f32 %v3457_v27, %v4371_v59 }
 0x39c   : > { %v1659_v37 = vpop.xlane.xlu0 %1658  ;;  %3466 = vpow2.f32 %v1839_v33 }
 0x39d   : > { %v1727_v35 = vsub.f32 %v4264_v14, %v1659_v37  ;;  %v1728_v53 = vsub.f32 %v4416_v22, %v1659_v37  ;;  %2510 = vst [vmem:[%s4653_s17] sm:$0xff] %v1964_v42  ;;  %3468 = vpow2.f32 %v1841_v4  ;;  %2511 = vst [vmem:[%s4653_s17 + $0x8] sm:$0xff] %v1965_v6 }
 0x39e   : > { %v3459_v60 = vpop.eup %3458  ;;  %3470 = vrcp.f32 %v1878_v30 }
 0x39f   : > { %v1843_v41 = vmul.f32 1.442695, %v1727_v35  ;;  %v1845_v54 = vmul.f32 1.442695, %v1728_v53  ;;  %v1967_v39 = vmul.f32 %v3459_v60, %v4386_v12  ;;  %v1662_v57 = vpop.xlane.xlu1 %1661  ;;  %v1968_v59 = vmul.f32 %v3459_v60, %v4390_v10 }
 0x3a0   : > { %v1881_v26 = vpop.xlane.xlu0 %1880  ;;  %v1729_v14 = vsub.f32 %v4268_v44, %v1662_v57  ;;  %v1730_v62 = vsub.f32 %v4432_v63, %v1662_v57 }
 0x3a1   : > { %3472 = vpow2.f32 %v1843_v41  ;;  %2512 = vst [vmem:[%s4653_s17 + $0x10] sm:$0xff] %v1967_v39  ;;  %v2060_v22 = vpack.c.bf16 %v1968_v59, %v1965_v6  ;;  %2513 = vst [vmem:[%s4653_s17 + $0x18] sm:$0xff] %v1968_v59  ;;  %v2059_v28 = vpack.c.bf16 %v1967_v39, %v1964_v42 }
 0x3a2   : > { %3474 = vpow2.f32 %v1845_v54  ;;  %v4667_v27 = vpop.eup %3460  ;;  %v1847_v33 = vmul.f32 1.442695, %v1729_v14  ;;  %v1849_v4 = vmul.f32 1.442695, %v1730_v62 }
 0x3a3   : > { %3476 = vrcp.f32 %v1881_v26  ;;  %v4669_v12 = vpop.eup %3462  ;;  %2123 = vmatprep.mubr.bf16.mxu0 %v2060_v22  ;;  %v1884_v30 = vpop.xlane.xlu1 %1883 }
 0x3a4   : > { %v1665_v10 = vpop.xlane.xlu0 %1664  ;;  %v3465_v37 = vpop.eup %3464  ;;  %3478 = vpow2.f32 %v1847_v33  ;;  %2124 = vmatmul.mubr.bf16.vlgmr.msra.gmra.mrb[48].mxu0 %v2059_v28  ;;  %v1939_v42 = vadd.f32 %v4669_v12, %v4667_v27 }
 0x3a5   : > { %v1731_v44 = vsub.f32 %v4272_v9, %v1665_v10  ;;  %v1732_v63 = vsub.f32 %v4458_v56, %v1665_v10  ;;  %3480 = vpow2.f32 %v1849_v4  ;;  %v1971_v6 = vmul.f32 %v3465_v37, %v4409_v52 }
 0x3a6   : > { %v1970_v35 = vmul.f32 %v3465_v37, %v4407_v21  ;;  %v4677_v53 = vpop.eup %3466  ;;  %3482 = vrcp.f32 %v1884_v30  ;;  %1940 = vadd.xlane.f32.xlu0 %v1939_v42 }
 0x3a7   : > { %v1851_v60 = vmul.f32 1.442695, %v1731_v44  ;;  %v1853_v41 = vmul.f32 1.442695, %v1732_v63  ;;  %v4679_v54 = vpop.eup %3468  ;;  %v1668_v39 = vpop.xlane.xlu1 %1667  ;;  %2515 = vst [vmem:[%s4653_s17 + $0x28] sm:$0xff] %v1971_v6 }
 0x3a8   : > { %v1887_v9 = vpop.xlane.xlu0 %1886  ;;  %2514 = vst [vmem:[%s4653_s17 + $0x20] sm:$0xff] %v1970_v35  ;;  %v3471_v56 = vpop.eup %3470  ;;  %v1733_v26 = vsub.f32 %v4276_v55, %v1668_v39  ;;  %v1734_v52 = vsub.f32 %v4471_v29, %v1668_v39  ;;  %v1942_v21 = vadd.f32 %v4679_v54, %v4677_v53 }
 0x3a9   : > { %3484 = vpow2.f32 %v1851_v60  ;;  %v1974_v57 = vmul.f32 %v3471_v56, %v4427_v43  ;;  %v1973_v59 = vmul.f32 %v3471_v56, %v4423_v20 }
 0x3aa   : > { %3486 = vpow2.f32 %v1853_v41  ;;  %v1855_v62 = vmul.f32 1.442695, %v1733_v26  ;;  %v1857_v22 = vmul.f32 1.442695, %v1734_v52  ;;  %1943 = vadd.xlane.f32.xlu1 %v1942_v21 }
 0x3ab   : > { %v4689_v14 = vpop.eup %3472  ;;  %3488 = vrcp.f32 %v1887_v9  ;;  %v2062_v55 = vpack.c.bf16 %v1974_v57, %v1971_v6  ;;  %2517 = vst [vmem:[%s4653_s17 + $0x38] sm:$0xff] %v1974_v57  ;;  %v1890_v29 = vpop.xlane.xlu1 %1889  ;;  %v2061_v4 = vpack.c.bf16 %v1973_v59, %v1970_v35  ;;  %2516 = vst [vmem:[%s4653_s17 + $0x30] sm:$0xff] %v1973_v59 }
 0x3ac   : > { %v4691_v28 = vpop.eup %3474  ;;  %v1671_v33 = vpop.xlane.xlu0 %1670  ;;  %3490 = vpow2.f32 %v1855_v62 }
 0x3ad   : > { %v3477_v30 = vpop.eup %3476  ;;  %v1735_v43 = vsub.f32 %v5008_v58, %v1671_v33  ;;  %v1736_v20 = vsub.f32 %v4494_v3, %v1671_v33  ;;  %v1945_v10 = vadd.f32 %v4691_v28, %v4689_v14  ;;  %3492 = vpow2.f32 %v1857_v22  ;;  %2131 = vmatprep.mubr.bf16.mxu0 %v2062_v55 }
 0x3ae   : > { %v1977_v37 = vmul.f32 %v3477_v30, %v4446_v18  ;;  %v1976_v44 = vmul.f32 %v3477_v30, %v4444_v7  ;;  %v4701_v63 = vpop.eup %3478  ;;  %3494 = vrcp.f32 %v1890_v29  ;;  %2132 = vmatmul.mubr.bf16.gmra.mrb[52].mxu0 %v2061_v4 }
 0x3af   : > { %v1859_v42 = vmul.f32 1.442695, %v1735_v43  ;;  %v1861_v6 = vmul.f32 1.442695, %v1736_v20  ;;  %1946 = vadd.xlane.f32.xlu0 %v1945_v10  ;;  %v4703_v58 = vpop.eup %3480  ;;  %v1674_v35 = vpop.xlane.xlu1 %1673 }
 0x3b0   : > { %v1893_v3 = vpop.xlane.xlu0 %1892  ;;  %2519 = vst [vmem:[%s4653_s17 + $0x48] sm:$0xff] %v1977_v37  ;;  %2518 = vst [vmem:[%s4653_s17 + $0x40] sm:$0xff] %v1976_v44  ;;  %v3483_v60 = vpop.eup %3482  ;;  %v1737_v18 = vsub.f32 %v5013_v34, %v1674_v35  ;;  %v1738_v7 = vsub.f32 %v4514_v32, %v1674_v35  ;;  %v1948_v41 = vadd.f32 %v4703_v58, %v4701_v63 }
 0x3b1   : > { %3496 = vpow2.f32 %v1859_v42  ;;  %v1980_v9 = vmul.f32 %v3483_v60, %v4464_v23  ;;  %v1979_v39 = vmul.f32 %v3483_v60, %v4453_v0 }
 0x3b2   : > { %3498 = vpow2.f32 %v1861_v6  ;;  %v1863_v26 = vmul.f32 1.442695, %v1737_v18  ;;  %v1865_v52 = vmul.f32 1.442695, %v1738_v7  ;;  %1949 = vadd.xlane.f32.xlu1 %v1948_v41 }
 0x3b3   : > { %v4713_v56 = vpop.eup %3484  ;;  %3500 = vrcp.f32 %v1893_v3  ;;  %v2064_v34 = vpack.c.bf16 %v1980_v9, %v1977_v37  ;;  %2521 = vst [vmem:[%s4653_s17 + $0x58] sm:$0xff] %v1980_v9  ;;  %v1896_v57 = vpop.xlane.xlu1 %1895  ;;  %v2063_v32 = vpack.c.bf16 %v1979_v39, %v1976_v44  ;;  %2520 = vst [vmem:[%s4653_s17 + $0x50] sm:$0xff] %v1979_v39 }
 0x3b4   : > { %v4715_v21 = vpop.eup %3486  ;;  %3502 = vpow2.f32 %v1863_v26 }
 0x3b5   : > { %v3489_v59 = vpop.eup %3488  ;;  %v1951_v0 = vadd.f32 %v4715_v21, %v4713_v56  ;;  %3504 = vpow2.f32 %v1865_v52  ;;  %2139 = vmatprep.mubr.bf16.mxu0 %v2064_v34 }
 0x3b6   : > { %v1983_v23 = vmul.f32 %v3489_v59, %v4482_v5  ;;  %v1982_v62 = vmul.f32 %v3489_v59, %v4480_v45  ;;  %v4723_v22 = vpop.eup %3490  ;;  %3506 = vrcp.f32 %v1896_v57  ;;  %2140 = vmatmul.mubr.bf16.gmra.mrb[56].mxu0 %v2063_v32 }
 0x3b7   : > { %1952 = vadd.xlane.f32.xlu0 %v1951_v0  ;;  %v4725_v55 = vpop.eup %3492  ;;  %v1899_v29 = vpop.xlane.xlu0 %1898 }
 0x3b8   : > { %2523 = vst [vmem:[%s4653_s17 + $0x68] sm:$0xff] %v1983_v23  ;;  %2522 = vst [vmem:[%s4653_s17 + $0x60] sm:$0xff] %v1982_v62  ;;  %v3495_v33 = vpop.eup %3494  ;;  %3508 = vrcp.f32 %v1899_v29  ;;  %v1954_v4 = vadd.f32 %v4725_v55, %v4723_v22 }
 0x3b9   : > { %v1986_v5 = vmul.f32 %v3495_v33, %v4500_v15  ;;  %v1985_v45 = vmul.f32 %v3495_v33, %v4489_v46 }
 0x3ba   : > { %1955 = vadd.xlane.f32.xlu1 %v1954_v4  ;;  %v1902_v43 = vpop.xlane.xlu1 %1901 }
 0x3bb   : > { %v4733_v30 = vpop.eup %3496  ;;  %3510 = vrcp.f32 %v1902_v43  ;;  %v2066_v10 = vpack.c.bf16 %v1986_v5, %v1983_v23  ;;  %2525 = vst [vmem:[%s4653_s17 + $0x78] sm:$0xff] %v1986_v5  ;;  %v2065_v37 = vpack.c.bf16 %v1985_v45, %v1982_v62  ;;  %2524 = vst [vmem:[%s4653_s17 + $0x70] sm:$0xff] %v1985_v45  ;;  %v5050_v5 = vld [vmem:[#allocation3_spill] sm:$0xff] }
 0x3bc   : > { %v4735_v20 = vpop.eup %3498 }
 0x3bd   : > { %v3501_v44 = vpop.eup %3500  ;;  %v1957_v42 = vadd.f32 %v4735_v20, %v4733_v30  ;;  %2147 = vmatprep.mubr.bf16.mxu0 %v2066_v10 }
 0x3be   : > { %v1989_v46 = vmul.f32 %v3501_v44, %v4519_v16  ;;  %v1988_v15 = vmul.f32 %v3501_v44, %v4517_v11  ;;  %v4743_v6 = vpop.eup %3502  ;;  %2148 = vmatmul.mubr.bf16.gmra.mrb[60].mxu0 %v2065_v37  ;;  %v5052_v37 = vld [vmem:[#allocation28_spill] sm:$0xff] }
 0x3bf   : > { %1958 = vadd.xlane.f32.xlu0 %v1957_v42  ;;  %v4745_v3 = vpop.eup %3504  ;;  %v1905_v35 = vpop.xlane.xlu0 %1904 }
 0x3c0   : > { %2527 = vst [vmem:[%s4653_s17 + $0x88] sm:$0xff] %v1989_v46  ;;  %2526 = vst [vmem:[%s4653_s17 + $0x80] sm:$0xff] %v1988_v15  ;;  %v3507_v60 = vpop.eup %3506  ;;  %3512 = vrcp.f32 %v1905_v35  ;;  %v1960_v18 = vadd.f32 %v4745_v3, %v4743_v6  ;;  %v5053_v35 = vld [vmem:[#allocation5_spill] sm:$0xff] }
 0x3c1   : > { %v1992_v16 = vmul.f32 %v3507_v60, %v4532_v40  ;;  %v1991_v11 = vmul.f32 %v3507_v60, %v4524_v19 }
 0x3c2   : > { %v3509_v7 = vpop.eup %3508  ;;  %1961 = vadd.xlane.f32.xlu1 %v1960_v18  ;;  %v1908_v41 = vpop.xlane.xlu1 %1907  ;;  %v5054_v18 = vld [vmem:[#allocation4_spill] sm:$0xff] }
 0x3c3   : > { %3514 = vrcp.f32 %v1908_v41  ;;  %v2068_v9 = vpack.c.bf16 %v1992_v16, %v1989_v46  ;;  %2529 = vst [vmem:[%s4653_s17 + $0x98] sm:$0xff] %v1992_v16  ;;  %v2067_v39 = vpack.c.bf16 %v1991_v11, %v1988_v15  ;;  %2528 = vst [vmem:[%s4653_s17 + $0x90] sm:$0xff] %v1991_v11  ;;  %v1995_v26 = vmul.f32 %v3509_v7, %v4543_v17  ;;  %v5055_v41 = vld [vmem:[#allocation6_spill] sm:$0xff] }
 0x3c4   : > { %v1994_v52 = vmul.f32 %v3509_v7, %v4541_v50 }
 0x3c5   : > { %v3511_v34 = vpop.eup %3510  ;;  %2155 = vmatprep.mubr.bf16.mxu0 %v2068_v9  ;;  %2531 = vst [vmem:[%s4653_s17 + $0xa8] sm:$0xff] %v1995_v26 }
 0x3c6   : > { %2156 = vmatmul.mubr.bf16.gmra.mrb[64].mxu0 %v2067_v39  ;;  %v1998_v19 = vmul.f32 %v3511_v34, %v4551_v48  ;;  %v1997_v40 = vmul.f32 %v3511_v34, %v4545_v61  ;;  %2530 = vst [vmem:[%s4653_s17 + $0xa0] sm:$0xff] %v1994_v52  ;;  %v5056_v39 = vld [vmem:[#allocation29_spill] sm:$0xff] }
 0x3c7   : > { %v1911_v57 = vpop.xlane.xlu0 %1910 }
 0x3c8   : > { %3516 = vrcp.f32 %v1911_v57  ;;  %v2070_v32 = vpack.c.bf16 %v1998_v19, %v1995_v26  ;;  %2533 = vst [vmem:[%s4653_s17 + $0xb8] sm:$0xff] %v1998_v19  ;;  %2532 = vst [vmem:[%s4653_s17 + $0xb0] sm:$0xff] %v1997_v40  ;;  %v2069_v0 = vpack.c.bf16 %v1997_v40, %v1994_v52 }
 0x3ca   : > { %v3513_v59 = vpop.eup %3512  ;;  %2163 = vmatprep.mubr.bf16.mxu0 %v2070_v32  ;;  %v1914_v50 = vpop.xlane.xlu1 %1913 }
 0x3cb   : > { %3518 = vrcp.f32 %v1914_v50  ;;  %v2001_v17 = vmul.f32 %v3513_v59, %v4559_v25  ;;  %v2000_v48 = vmul.f32 %v3513_v59, %v4557_v36 }
 0x3cd   : > { %v3515_v23 = vpop.eup %3514  ;;  %2535 = vst [vmem:[%s4653_s17 + $0xc8] sm:$0xff] %v2001_v17  ;;  %2534 = vst [vmem:[%s4653_s17 + $0xc0] sm:$0xff] %v2000_v48 }
 0x3ce   : > { %2164 = vmatmul.mubr.bf16.gmra.mrb[68].mxu0 %v2069_v0  ;;  %v2004_v61 = vmul.f32 %v3515_v23, %v4567_v38  ;;  %v2003_v62 = vmul.f32 %v3515_v23, %v4561_v13  ;;  %v5051_v13 = vld [vmem:[#allocation30_spill] sm:$0xff] }
 0x3cf   : > { %v1917_v29 = vpop.xlane.xlu0 %1916 }
 0x3d0   : > { %3520 = vrcp.f32 %v1917_v29  ;;  %v2072_v33 = vpack.c.bf16 %v2004_v61, %v2001_v17  ;;  %2537 = vst [vmem:[%s4653_s17 + $0xd8] sm:$0xff] %v2004_v61  ;;  %2536 = vst [vmem:[%s4653_s17 + $0xd0] sm:$0xff] %v2003_v62  ;;  %v2071_v43 = vpack.c.bf16 %v2003_v62, %v2000_v48 }
 0x3d2   : > { %v3517_v4 = vpop.eup %3516  ;;  %2171 = vmatprep.mubr.bf16.mxu0 %v2072_v33  ;;  %v1920_v36 = vpop.xlane.xlu1 %1919  ;;  %v5057_v33 = vld [vmem:[#allocation31_spill] sm:$0xff] }
 0x3d3   : > { %3522 = vrcp.f32 %v1920_v36  ;;  %v2007_v25 = vmul.f32 %v3517_v4, %v4575_v2  ;;  %v2006_v45 = vmul.f32 %v3517_v4, %v5050_v5  ;;  %v5058_v4 = vld [vmem:[#allocation7_spill] sm:$0xff]  ;;  %v5059_v5 = vld [vmem:[#allocation9_spill] sm:$0xff] }
 0x3d5   : > { %v3519_v38 = vpop.eup %3518  ;;  %2539 = vst [vmem:[%s4653_s17 + $0xe8] sm:$0xff] %v2007_v25  ;;  %2538 = vst [vmem:[%s4653_s17 + $0xe0] sm:$0xff] %v2006_v45 }
 0x3d6   : > { %2172 = vmatmul.mubr.bf16.gmra.mrb[72].mxu0 %v2071_v43  ;;  %v2010_v10 = vmul.f32 %v3519_v38, %v5051_v13  ;;  %v2009_v44 = vmul.f32 %v3519_v38, %v5052_v37  ;;  %v5061_v37 = vld [vmem:[#allocation10_spill] sm:$0xff] }
 0x3d7   : > { %v1923_v42 = vpop.xlane.xlu0 %1922 }
 0x3d8   : > { %3524 = vrcp.f32 %v1923_v42  ;;  %v2074_v46 = vpack.c.bf16 %v2010_v10, %v2007_v25  ;;  %2541 = vst [vmem:[%s4653_s17 + $0xf8] sm:$0xff] %v2010_v10  ;;  %2540 = vst [vmem:[%s4653_s17 + $0xf0] sm:$0xff] %v2009_v44  ;;  %v2073_v11 = vpack.c.bf16 %v2009_v44, %v2006_v45  ;;  %v5060_v45 = vld [vmem:[#allocation8_spill] sm:$0xff] }
 0x3da   : > { %v3521_v15 = vpop.eup %3520  ;;  %2179 = vmatprep.mubr.bf16.mxu0 %v2074_v46  ;;  %v1926_v2 = vpop.xlane.xlu1 %1925 }
 0x3db   : > { %3526 = vrcp.f32 %v1926_v2  ;;  %v2013_v60 = vmul.f32 %v3521_v15, %v5053_v35  ;;  %v2012_v16 = vmul.f32 %v3521_v15, %v5054_v18 }
 0x3dd   : > { %v3523_v7 = vpop.eup %3522  ;;  %2543 = vst [vmem:[%s4653_s17 + $0x108] sm:$0xff] %v2013_v60  ;;  %2542 = vst [vmem:[%s4653_s17 + $0x100] sm:$0xff] %v2012_v16 }
 0x3de   : > { %2180 = vmatmul.mubr.bf16.gmra.mrb[76].mxu0 %v2073_v11  ;;  %v2016_v9 = vmul.f32 %v3523_v7, %v5055_v41  ;;  %v2015_v26 = vmul.f32 %v3523_v7, %v5056_v39 }
 0x3df   : > { %v1929_v52 = vpop.xlane.xlu0 %1928 }
 0x3e0   : > { %3528 = vrcp.f32 %v1929_v52  ;;  %v2076_v34 = vpack.c.bf16 %v2016_v9, %v2013_v60  ;;  %2545 = vst [vmem:[%s4653_s17 + $0x118] sm:$0xff] %v2016_v9  ;;  %2544 = vst [vmem:[%s4653_s17 + $0x110] sm:$0xff] %v2015_v26  ;;  %v2075_v59 = vpack.c.bf16 %v2015_v26, %v2012_v16 }
 0x3e1   : > { %v1932_v19 = vpop.xlane.xlu1 %1931 }
 0x3e2   : > { %v3525_v40 = vpop.eup %3524  ;;  %2187 = vmatprep.mubr.bf16.mxu0 %v2076_v34  ;;  %3530 = vrcp.f32 %v1932_v19 }
 0x3e3   : > { %v2019_v57 = vmul.f32 %v3525_v40, %v4607_v24  ;;  %v2018_v32 = vmul.f32 %v3525_v40, %v4605_v8 }
 0x3e5   : > { %v3527_v50 = vpop.eup %3526  ;;  %2547 = vst [vmem:[%s4653_s17 + $0x128] sm:$0xff] %v2019_v57  ;;  %2546 = vst [vmem:[%s4653_s17 + $0x120] sm:$0xff] %v2018_v32 }
 0x3e6   : > { %2188 = vmatmul.mubr.bf16.gmra.mrb[80].mxu0 %v2075_v59  ;;  %v2022_v17 = vmul.f32 %v3527_v50, %v4615_v47  ;;  %v2021_v48 = vmul.f32 %v3527_v50, %v4609_v49 }
 0x3e7   : > { %v1935_v0 = vpop.xlane.xlu0 %1934 }
 0x3e8   : > { %3532 = vrcp.f32 %v1935_v0  ;;  %v2078_v23 = vpack.c.bf16 %v2022_v17, %v2019_v57  ;;  %2549 = vst [vmem:[%s4653_s17 + $0x138] sm:$0xff] %v2022_v17  ;;  %2548 = vst [vmem:[%s4653_s17 + $0x130] sm:$0xff] %v2021_v48  ;;  %v2077_v29 = vpack.c.bf16 %v2021_v48, %v2018_v32 }
 0x3e9   : > { %v1938_v24 = vpop.xlane.xlu1 %1937 }
 0x3ea   : > { %v3529_v8 = vpop.eup %3528  ;;  %2195 = vmatprep.mubr.bf16.mxu0 %v2078_v23  ;;  %3534 = vrcp.f32 %v1938_v24 }
 0x3eb   : > { %v2025_v61 = vmul.f32 %v3529_v8, %v4623_v1  ;;  %v2024_v62 = vmul.f32 %v3529_v8, %v4621_v31 }
 0x3ec   : > { %v3531_v47 = vpop.eup %3530 }
 0x3ed   : > { %v2028_v49 = vmul.f32 %v3531_v47, %v5057_v33  ;;  %2551 = vst [vmem:[%s4653_s17 + $0x148] sm:$0xff] %v2025_v61  ;;  %v2027_v36 = vmul.f32 %v3531_v47, %v5058_v4  ;;  %2550 = vst [vmem:[%s4653_s17 + $0x140] sm:$0xff] %v2024_v62  ;;  %v3552_v47 = vld [vmem:[%s3654_s21] sm:$0xff]  }
 0x3ee   : > { %2196 = vmatmul.mubr.bf16.gmra.mrb[84].mxu0 %v2077_v29  ;;  %v2286_v29 = vunpack.c.l.bf16 %v3552_v47 }
 0x3ef   : > { %v2080_v25 = vpack.c.bf16 %v2028_v49, %v2025_v61  ;;  %2553 = vst [vmem:[%s4653_s17 + $0x158] sm:$0xff] %v2028_v49  ;;  %2552 = vst [vmem:[%s4653_s17 + $0x150] sm:$0xff] %v2027_v36  ;;  %v2079_v13 = vpack.c.bf16 %v2027_v36, %v2024_v62 }
 0x3f1   : > { %2203 = vmatprep.mubr.bf16.mxu0 %v2080_v25 }
 0x3f2   : > { %v3533_v1 = vpop.eup %3532 }
 0x3f3   : > { %v2031_v31 = vmul.f32 %v3533_v1, %v5059_v5  ;;  %v2030_v43 = vmul.f32 %v3533_v1, %v5060_v45 }
 0x3f4   : > { %v3535_v38 = vpop.eup %3534 }
 0x3f5   : > { %v2034_v10 = vmul.f32 %v3535_v38, %v4641_v51  ;;  %2555 = vst [vmem:[%s4653_s17 + $0x168] sm:$0xff] %v2031_v31  ;;  %v2033_v44 = vmul.f32 %v3535_v38, %v5061_v37  ;;  %2554 = vst [vmem:[%s4653_s17 + $0x160] sm:$0xff] %v2030_v43 }
 0x3f6   : > { %2204 = vmatmul.mubr.bf16.gmra.mrb[88].mxu0 %v2079_v13 }
 0x3f7   : > { %v2082_v42 = vpack.c.bf16 %v2034_v10, %v2031_v31  ;;  %2557 = vst [vmem:[%s4653_s17 + $0x178] sm:$0xff] %v2034_v10  ;;  %2556 = vst [vmem:[%s4653_s17 + $0x170] sm:$0xff] %v2033_v44  ;;  %v2081_v46 = vpack.c.bf16 %v2033_v44, %v2030_v43  ;;  %v3553_v44 = vld [vmem:[%s3654_s21 + $0x8] sm:$0xff]  }
 0x3f9   : > { %2211 = vmatprep.mubr.bf16.mxu0 %v2082_v42  ;;  %v2288_v42 = vunpack.c.l.bf16 %v3553_v44 }
 0x3fe   : > { %2212 = vmatmul.mubr.bf16.gmra.mrb[92].mxu0 %v2081_v46 }
 0x433   : > { %v1941_v15 = vpop.xlane.xlu0 %1940 }
 0x434   : > { %3536 = vrcp.f32 %v1941_v15  ;;  %v2289_v15 = vunpack.c.h.bf16 %v3553_v44 }
 0x437   : > { %v1944_v2 = vpop.xlane.xlu1 %1943 }
 0x438   : > { %3538 = vrcp.f32 %v1944_v2 }
 0x43c   : > { %v1947_v35 = vpop.xlane.xlu0 %1946 }
 0x43d   : > { %3540 = vrcp.f32 %v1947_v35 }
 0x43e   : > { %v3537_v51 = vpop.eup %3536 }
 0x43f   : > { %v1950_v60 = vpop.xlane.xlu1 %1949  ;;  %v2037_v18 = vmul.f32 %v3537_v51, %v4669_v12  ;;  %v2036_v16 = vmul.f32 %v3537_v51, %v4667_v27 }
 0x440   : > { %3542 = vrcp.f32 %v1950_v60 }
 0x441   : > { %2559 = vst [vmem:[%s4653_s17 + $0x188] sm:$0xff] %v2037_v18  ;;  %2558 = vst [vmem:[%s4653_s17 + $0x180] sm:$0xff] %v2036_v16 }
 0x442   : > { %v3539_v11 = vpop.eup %3538 }
 0x443   : > { %v2040_v41 = vmul.f32 %v3539_v11, %v4679_v54  ;;  %v2039_v9 = vmul.f32 %v3539_v11, %v4677_v53 }
 0x444   : > { %v1953_v7 = vpop.xlane.xlu0 %1952 }
 0x445   : > { %3544 = vrcp.f32 %v1953_v7  ;;  %v2084_v39 = vpack.c.bf16 %v2040_v41, %v2037_v18  ;;  %2561 = vst [vmem:[%s4653_s17 + $0x198] sm:$0xff] %v2040_v41  ;;  %v2083_v26 = vpack.c.bf16 %v2039_v9, %v2036_v16  ;;  %2560 = vst [vmem:[%s4653_s17 + $0x190] sm:$0xff] %v2039_v9  ;;  %v3554_v16 = vld [vmem:[%s3654_s21 + $0x10] sm:$0xff]  }
 0x446   : > { %v2290_v11 = vunpack.c.l.bf16 %v3554_v16 }
 0x447   : > { %v3541_v12 = vpop.eup %3540  ;;  %2219 = vmatprep.mubr.bf16.mxu0 %v2084_v39  ;;  %v1956_v27 = vpop.xlane.xlu1 %1955 }
 0x448   : > { %v2043_v52 = vmul.f32 %v3541_v12, %v4691_v28  ;;  %v2042_v34 = vmul.f32 %v3541_v12, %v4689_v14  ;;  %3546 = vrcp.f32 %v1956_v27  ;;  %2220 = vmatmul.mubr.bf16.gmra.mrb[96].mxu0 %v2083_v26  ;;  %v2291_v26 = vunpack.c.h.bf16 %v3554_v16 }
 0x44a   : > { %2563 = vst [vmem:[%s4653_s17 + $0x1a8] sm:$0xff] %v2043_v52  ;;  %2562 = vst [vmem:[%s4653_s17 + $0x1a0] sm:$0xff] %v2042_v34  ;;  %v3543_v54 = vpop.eup %3542 }
 0x44b   : > { %v2046_v19 = vmul.f32 %v3543_v54, %v4703_v58  ;;  %v2045_v40 = vmul.f32 %v3543_v54, %v4701_v63 }
 0x44c   : > { %v1959_v53 = vpop.xlane.xlu0 %1958 }
 0x44d   : > { %3548 = vrcp.f32 %v1959_v53  ;;  %v2086_v57 = vpack.c.bf16 %v2046_v19, %v2043_v52  ;;  %2565 = vst [vmem:[%s4653_s17 + $0x1b8] sm:$0xff] %v2046_v19  ;;  %v2085_v32 = vpack.c.bf16 %v2045_v40, %v2042_v34  ;;  %2564 = vst [vmem:[%s4653_s17 + $0x1b0] sm:$0xff] %v2045_v40  ;;  %v3555_v40 = vld [vmem:[%s3654_s21 + $0x18] sm:$0xff]  }
 0x44f   : > { %v3545_v14 = vpop.eup %3544  ;;  %2227 = vmatprep.mubr.bf16.mxu0 %v2086_v57  ;;  %v1962_v28 = vpop.xlane.xlu1 %1961  ;;  %v2292_v57 = vunpack.c.l.bf16 %v3555_v40 }
 0x450   : > { %v2049_v59 = vmul.f32 %v3545_v14, %v4715_v21  ;;  %v2048_v50 = vmul.f32 %v3545_v14, %v4713_v56  ;;  %3550 = vrcp.f32 %v1962_v28  ;;  %2228 = vmatmul.mubr.bf16.gmra.mrb[100].mxu0 %v2085_v32 }
 0x452   : > { %2567 = vst [vmem:[%s4653_s17 + $0x1c8] sm:$0xff] %v2049_v59  ;;  %2566 = vst [vmem:[%s4653_s17 + $0x1c0] sm:$0xff] %v2048_v50  ;;  %v3547_v63 = vpop.eup %3546 }
 0x453   : > { %v2052_v58 = vmul.f32 %v3547_v63, %v4725_v55  ;;  %v2051_v17 = vmul.f32 %v3547_v63, %v4723_v22 }
 0x455   : > { %v2088_v48 = vpack.c.bf16 %v2052_v58, %v2049_v59  ;;  %2569 = vst [vmem:[%s4653_s17 + $0x1d8] sm:$0xff] %v2052_v58  ;;  %v2087_v0 = vpack.c.bf16 %v2051_v17, %v2048_v50  ;;  %2568 = vst [vmem:[%s4653_s17 + $0x1d0] sm:$0xff] %v2051_v17  ;;  %v2293_v50 = vunpack.c.h.bf16 %v3555_v40 }
 0x457   : > { %v3549_v21 = vpop.eup %3548  ;;  %2235 = vmatprep.mubr.bf16.mxu0 %v2088_v48 }
 0x458   : > { %v2055_v56 = vmul.f32 %v3549_v21, %v4735_v20  ;;  %v2054_v23 = vmul.f32 %v3549_v21, %v4733_v30  ;;  %2236 = vmatmul.mubr.bf16.gmra.mrb[104].mxu0 %v2087_v0  ;;  %v4843_v30 = vstv %s2252_s19 }
 0x45a   : > { %2571 = vst [vmem:[%s4653_s17 + $0x1e8] sm:$0xff] %v2055_v56  ;;  %2570 = vst [vmem:[%s4653_s17 + $0x1e0] sm:$0xff] %v2054_v23  ;;  %v3551_v24 = vpop.eup %3550 }
 0x45b   : > { %v2058_v55 = vmul.f32 %v3551_v24, %v4745_v3  ;;  %v2057_v22 = vmul.f32 %v3551_v24, %v4743_v6  ;;  %v2287_v3 = vunpack.c.h.bf16 %v3552_v47 }
 0x45d   : > { %v2090_v8 = vpack.c.bf16 %v2058_v55, %v2055_v56  ;;  %2573 = vst [vmem:[%s4653_s17 + $0x1f8] sm:$0xff] %v2058_v55  ;;  %v2089_v61 = vpack.c.bf16 %v2057_v22, %v2054_v23  ;;  %2572 = vst [vmem:[%s4653_s17 + $0x1f0] sm:$0xff] %v2057_v22  ;;  %v3556_v23 = vld [vmem:[%s3654_s21 + $0x20] sm:$0xff]  }
 0x45e   : > { %v2294_v24 = vunpack.c.l.bf16 %v3556_v23 }
 0x45f   : > { %2243 = vmatprep.mubr.bf16.mxu0 %v2090_v8 }
 0x460   : > { %2244 = vmatmul.mubr.bf16.gmra.mrb[108].mxu0 %v2089_v61 }
 0x477   : > { %v3032_v20 = vpop.f32.mrb[48].mxu0 }
 0x478   : > { %v3033_v62 = vpop.f32.mrb[49].mxu0 }
 0x479   : > { %v3034_v33 = vadd.f32 %v3033_v62, %v3032_v20  ;;  %v3035_v49 = vpop.f32.mrb[50].mxu0  ;;  %v2295_v20 = vunpack.c.h.bf16 %v3556_v23 }
 0x47a   : > { %v3036_v4 = vpop.f32.mrb[51].mxu0 }
 0x47b   : > { %v2254_v6 = vmul.f32 %v3034_v33, %v4843_v30  ;;  %v3037_v36 = vadd.f32 %v3036_v4, %v3035_v49 }
 0x47d   : > { %v2318_v25 = vadd.f32 %v2286_v29, %v2254_v6  ;;  %v2255_v1 = vmul.f32 %v3037_v36, %v4843_v30  ;;  %v3557_v6 = vld [vmem:[%s3654_s21 + $0x28] sm:$0xff]  }
 0x47e   : > { %v2296_v36 = vunpack.c.l.bf16 %v3557_v6 }
 0x47f   : > { %v2319_v5 = vadd.f32 %v2287_v3, %v2255_v1 }
 0x481   : > { %v2804_v31 = vpack.c.bf16 %v2319_v5, %v2318_v25  ;;  %v3038_v45 = vpop.f32.mrb[52].mxu0 }
 0x482   : > { %v3039_v43 = vpop.f32.mrb[53].mxu0 }
 0x483   : > { %2805 = vst [vmem:[%s4853_s23] sm:$0xff] %v2804_v31   ;;  %v3040_v38 = vadd.f32 %v3039_v43, %v3038_v45  ;;  %v3041_v13 = vpop.f32.mrb[54].mxu0  ;;  %v2297_v45 = vunpack.c.h.bf16 %v3557_v6 }
 0x484   : > { %v3042_v10 = vpop.f32.mrb[55].mxu0 }
 0x485   : > { %v2256_v37 = vmul.f32 %v3040_v38, %v4843_v30  ;;  %v3043_v46 = vadd.f32 %v3042_v10, %v3041_v13 }
 0x487   : > { %v2257_v2 = vmul.f32 %v3043_v46, %v4843_v30  ;;  %v2320_v35 = vadd.f32 %v2288_v42, %v2256_v37  ;;  %v3558_v46 = vld [vmem:[%s3654_s21 + $0x30] sm:$0xff]  }
 0x489   : > { %v2321_v51 = vadd.f32 %v2289_v15, %v2257_v2  ;;  %v3044_v60 = vpop.f32.mrb[56].mxu0  ;;  %v2298_v15 = vunpack.c.l.bf16 %v3558_v46 }
 0x48a   : > { %v3045_v18 = vpop.f32.mrb[57].mxu0 }
 0x48b   : > { %v2809_v7 = vpack.c.bf16 %v2321_v51, %v2320_v35  ;;  %v3046_v41 = vadd.f32 %v3045_v18, %v3044_v60  ;;  %v3047_v9 = vpop.f32.mrb[58].mxu0  ;;  %v2299_v18 = vunpack.c.h.bf16 %v3558_v46 }
 0x48c   : > { %v3048_v39 = vpop.f32.mrb[59].mxu0 }
 0x48d   : > { %2881 = vst [vmem:[%s4853_s23 + $0x8] sm:$0xff] %v2809_v7   ;;  %v2258_v12 = vmul.f32 %v3046_v41, %v4843_v30  ;;  %v3049_v27 = vadd.f32 %v3048_v39, %v3047_v9 }
 0x48f   : > { %v2322_v52 = vadd.f32 %v2290_v11, %v2258_v12  ;;  %v2259_v34 = vmul.f32 %v3049_v27, %v4843_v30  ;;  %v3559_v12 = vld [vmem:[%s3654_s21 + $0x38] sm:$0xff]  }
 0x490   : > { %v2300_v27 = vunpack.c.l.bf16 %v3559_v12 }
 0x491   : > { %v2323_v54 = vadd.f32 %v2291_v26, %v2259_v34  ;;  %v3050_v53 = vpop.f32.mrb[60].mxu0 }
 0x492   : > { %v3051_v19 = vpop.f32.mrb[61].mxu0 }
 0x493   : > { %v2814_v32 = vpack.c.bf16 %v2323_v54, %v2322_v52  ;;  %v3052_v14 = vadd.f32 %v3051_v19, %v3050_v53  ;;  %v3053_v28 = vpop.f32.mrb[62].mxu0  ;;  %v2301_v19 = vunpack.c.h.bf16 %v3559_v12 }
 0x494   : > { %v3054_v59 = vpop.f32.mrb[63].mxu0 }
 0x495   : > { %2882 = vst [vmem:[%s4853_s23 + $0x10] sm:$0xff] %v2814_v32   ;;  %v2260_v63 = vmul.f32 %v3052_v14, %v4843_v30  ;;  %v3055_v58 = vadd.f32 %v3054_v59, %v3053_v28 }
 0x497   : > { %v2324_v17 = vadd.f32 %v2292_v57, %v2260_v63  ;;  %v2261_v48 = vmul.f32 %v3055_v58, %v4843_v30  ;;  %v3560_v63 = vld [vmem:[%s3654_s21 + $0x40] sm:$0xff]  }
 0x498   : > { %v2302_v58 = vunpack.c.l.bf16 %v3560_v63 }
 0x499   : > { %v2325_v0 = vadd.f32 %v2293_v50, %v2261_v48  ;;  %v3056_v21 = vpop.f32.mrb[64].mxu0 }
 0x49a   : > { %v3057_v56 = vpop.f32.mrb[65].mxu0 }
 0x49b   : > { %v2819_v55 = vpack.c.bf16 %v2325_v0, %v2324_v17  ;;  %v3058_v22 = vadd.f32 %v3057_v56, %v3056_v21  ;;  %v3059_v8 = vpop.f32.mrb[66].mxu0  ;;  %v2303_v56 = vunpack.c.h.bf16 %v3560_v63 }
 0x49c   : > { %v3060_v61 = vpop.f32.mrb[67].mxu0 }
 0x49d   : > { %2883 = vst [vmem:[%s4853_s23 + $0x18] sm:$0xff] %v2819_v55   ;;  %v2262_v62 = vmul.f32 %v3058_v22, %v4843_v30  ;;  %v3061_v47 = vadd.f32 %v3060_v61, %v3059_v8 }
 0x49f   : > { %v2326_v29 = vadd.f32 %v2294_v24, %v2262_v62  ;;  %v2263_v33 = vmul.f32 %v3061_v47, %v4843_v30  ;;  %v3561_v62 = vld [vmem:[%s3654_s21 + $0x48] sm:$0xff]  }
 0x4a0   : > { %v2304_v47 = vunpack.c.l.bf16 %v3561_v62 }
 0x4a1   : > { %v2327_v49 = vadd.f32 %v2295_v20, %v2263_v33  ;;  %v3062_v4 = vpop.f32.mrb[68].mxu0 }
 0x4a2   : > { %v3063_v3 = vpop.f32.mrb[69].mxu0 }
 0x4a3   : > { %v2824_v25 = vpack.c.bf16 %v2327_v49, %v2326_v29  ;;  %v3064_v1 = vadd.f32 %v3063_v3, %v3062_v4  ;;  %v3065_v5 = vpop.f32.mrb[70].mxu0  ;;  %v2305_v3 = vunpack.c.h.bf16 %v3561_v62 }
 0x4a4   : > { %v3066_v31 = vpop.f32.mrb[71].mxu0 }
 0x4a5   : > { %2884 = vst [vmem:[%s4853_s23 + $0x20] sm:$0xff] %v2824_v25   ;;  %v2264_v43 = vmul.f32 %v3064_v1, %v4843_v30  ;;  %v3067_v38 = vadd.f32 %v3066_v31, %v3065_v5 }
 0x4a7   : > { %v2328_v13 = vadd.f32 %v2296_v36, %v2264_v43  ;;  %v2265_v10 = vmul.f32 %v3067_v38, %v4843_v30  ;;  %v3562_v43 = vld [vmem:[%s3654_s21 + $0x50] sm:$0xff]  }
 0x4a8   : > { %v2306_v38 = vunpack.c.l.bf16 %v3562_v43 }
 0x4a9   : > { %v2329_v37 = vadd.f32 %v2297_v45, %v2265_v10  ;;  %v3068_v44 = vpop.f32.mrb[72].mxu0 }
 0x4aa   : > { %v3069_v42 = vpop.f32.mrb[73].mxu0 }
 0x4ab   : > { %v2829_v2 = vpack.c.bf16 %v2329_v37, %v2328_v13  ;;  %v3070_v35 = vadd.f32 %v3069_v42, %v3068_v44  ;;  %v3071_v51 = vpop.f32.mrb[74].mxu0  ;;  %v2307_v42 = vunpack.c.h.bf16 %v3562_v43 }
 0x4ac   : > { %v3072_v60 = vpop.f32.mrb[75].mxu0 }
 0x4ad   : > { %2885 = vst [vmem:[%s4853_s23 + $0x28] sm:$0xff] %v2829_v2   ;;  %v2266_v16 = vmul.f32 %v3070_v35, %v4843_v30  ;;  %v3073_v11 = vadd.f32 %v3072_v60, %v3071_v51 }
 0x4af   : > { %v2330_v7 = vadd.f32 %v2298_v15, %v2266_v16  ;;  %v2267_v41 = vmul.f32 %v3073_v11, %v4843_v30  ;;  %v3563_v16 = vld [vmem:[%s3654_s21 + $0x58] sm:$0xff]  }
 0x4b0   : > { %v2308_v11 = vunpack.c.l.bf16 %v3563_v16 }
 0x4b1   : > { %v2331_v9 = vadd.f32 %v2299_v18, %v2267_v41  ;;  %v3074_v39 = vpop.f32.mrb[76].mxu0 }
 0x4b2   : > { %v3075_v26 = vpop.f32.mrb[77].mxu0 }
 0x4b3   : > { %v2834_v52 = vpack.c.bf16 %v2331_v9, %v2330_v7  ;;  %v3076_v34 = vadd.f32 %v3075_v26, %v3074_v39  ;;  %v3077_v54 = vpop.f32.mrb[78].mxu0  ;;  %v2309_v26 = vunpack.c.h.bf16 %v3563_v16 }
 0x4b4   : > { %v3078_v53 = vpop.f32.mrb[79].mxu0 }
 0x4b5   : > { %2886 = vst [vmem:[%s4853_s23 + $0x30] sm:$0xff] %v2834_v52   ;;  %v2268_v40 = vmul.f32 %v3076_v34, %v4843_v30  ;;  %v3079_v57 = vadd.f32 %v3078_v53, %v3077_v54 }
 0x4b7   : > { %v2332_v32 = vadd.f32 %v2300_v27, %v2268_v40  ;;  %v2269_v14 = vmul.f32 %v3079_v57, %v4843_v30  ;;  %v3564_v57 = vld [vmem:[%s3654_s21 + $0x60] sm:$0xff]  }
 0x4b9   : > { %v2333_v28 = vadd.f32 %v2301_v19, %v2269_v14  ;;  %v3080_v59 = vpop.f32.mrb[80].mxu0 }
 0x4ba   : > { %v3081_v50 = vpop.f32.mrb[81].mxu0 }
 0x4bb   : > { %v2839_v17 = vpack.c.bf16 %v2333_v28, %v2332_v32  ;;  %v3082_v48 = vadd.f32 %v3081_v50, %v3080_v59  ;;  %v3083_v0 = vpop.f32.mrb[82].mxu0  ;;  %v2310_v32 = vunpack.c.l.bf16 %v3564_v57  ;;  %v2311_v50 = vunpack.c.h.bf16 %v3564_v57 }
 0x4bc   : > { %v3084_v21 = vpop.f32.mrb[83].mxu0 }
 0x4bd   : > { %2887 = vst [vmem:[%s4853_s23 + $0x38] sm:$0xff] %v2839_v17   ;;  %v2270_v23 = vmul.f32 %v3082_v48, %v4843_v30  ;;  %v3085_v24 = vadd.f32 %v3084_v21, %v3083_v0 }
 0x4bf   : > { %v2334_v55 = vadd.f32 %v2302_v58, %v2270_v23  ;;  %v2271_v22 = vmul.f32 %v3085_v24, %v4843_v30  ;;  %v3565_v23 = vld [vmem:[%s3654_s21 + $0x68] sm:$0xff]  }
 0x4c0   : > { %v2312_v24 = vunpack.c.l.bf16 %v3565_v23 }
 0x4c1   : > { %v2335_v8 = vadd.f32 %v2303_v56, %v2271_v22  ;;  %v3086_v61 = vpop.f32.mrb[84].mxu0 }
 0x4c2   : > { %v3087_v20 = vpop.f32.mrb[85].mxu0 }
 0x4c3   : > { %v2844_v29 = vpack.c.bf16 %v2335_v8, %v2334_v55  ;;  %v3088_v33 = vadd.f32 %v3087_v20, %v3086_v61  ;;  %v3089_v49 = vpop.f32.mrb[86].mxu0  ;;  %v2313_v20 = vunpack.c.h.bf16 %v3565_v23 }
 0x4c4   : > { %v3090_v4 = vpop.f32.mrb[87].mxu0 }
 0x4c5   : > { %2888 = vst [vmem:[%s4853_s23 + $0x40] sm:$0xff] %v2844_v29   ;;  %v2272_v6 = vmul.f32 %v3088_v33, %v4843_v30  ;;  %v3091_v36 = vadd.f32 %v3090_v4, %v3089_v49 }
 0x4c7   : > { %v2336_v25 = vadd.f32 %v2304_v47, %v2272_v6  ;;  %v2273_v1 = vmul.f32 %v3091_v36, %v4843_v30  ;;  %v3566_v6 = vld [vmem:[%s3654_s21 + $0x70] sm:$0xff]  }
 0x4c8   : > { %v2314_v36 = vunpack.c.l.bf16 %v3566_v6 }
 0x4c9   : > { %v2337_v5 = vadd.f32 %v2305_v3, %v2273_v1  ;;  %v3092_v31 = vpop.f32.mrb[88].mxu0 }
 0x4ca   : > { %v3093_v45 = vpop.f32.mrb[89].mxu0 }
 0x4cb   : > { %v2849_v13 = vpack.c.bf16 %v2337_v5, %v2336_v25  ;;  %v3094_v10 = vadd.f32 %v3093_v45, %v3092_v31  ;;  %v3095_v37 = vpop.f32.mrb[90].mxu0  ;;  %v2315_v45 = vunpack.c.h.bf16 %v3566_v6 }
 0x4cc   : > { %v3096_v44 = vpop.f32.mrb[91].mxu0 }
 0x4cd   : > { %2889 = vst [vmem:[%s4853_s23 + $0x48] sm:$0xff] %v2849_v13   ;;  %v2274_v46 = vmul.f32 %v3094_v10, %v4843_v30  ;;  %v3097_v15 = vadd.f32 %v3096_v44, %v3095_v37 }
 0x4cf   : > { %v2338_v2 = vadd.f32 %v2306_v38, %v2274_v46  ;;  %v2275_v35 = vmul.f32 %v3097_v15, %v4843_v30  ;;  %v3567_v46 = vld [vmem:[%s3654_s21 + $0x78] sm:$0xff]  }
 0x4d0   : > { %v2316_v15 = vunpack.c.l.bf16 %v3567_v46 }
 0x4d1   : > { %v2339_v51 = vadd.f32 %v2307_v42, %v2275_v35  ;;  %v3098_v60 = vpop.f32.mrb[92].mxu0 }
 0x4d2   : > { %v3099_v18 = vpop.f32.mrb[93].mxu0 }
 0x4d3   : > { %v2854_v7 = vpack.c.bf16 %v2339_v51, %v2338_v2  ;;  %v3100_v41 = vadd.f32 %v3099_v18, %v3098_v60  ;;  %v3101_v9 = vpop.f32.mrb[94].mxu0  ;;  %v2317_v18 = vunpack.c.h.bf16 %v3567_v46 }
 0x4d4   : > { %v3102_v39 = vpop.f32.mrb[95].mxu0 }
 0x4d5   : > { %2890 = vst [vmem:[%s4853_s23 + $0x50] sm:$0xff] %v2854_v7   ;;  %v2276_v12 = vmul.f32 %v3100_v41, %v4843_v30  ;;  %v3103_v27 = vadd.f32 %v3102_v39, %v3101_v9 }
 0x4d7   : > { %v2340_v52 = vadd.f32 %v2308_v11, %v2276_v12  ;;  %v2277_v34 = vmul.f32 %v3103_v27, %v4843_v30 }
 0x4d9   : > { %v2341_v54 = vadd.f32 %v2309_v26, %v2277_v34 }
 0x4db   : > { %v2859_v53 = vpack.c.bf16 %v2341_v54, %v2340_v52 }
 0x4dd   : > { %2891 = vst [vmem:[%s4853_s23 + $0x58] sm:$0xff] %v2859_v53  }
 0x51b   : > { %v3104_v19 = vpop.f32.mrb[96].mxu0 }
 0x51c   : > { %v3105_v40 = vpop.f32.mrb[97].mxu0 }
 0x51d   : > { %v3106_v14 = vadd.f32 %v3105_v40, %v3104_v19  ;;  %v3107_v28 = vpop.f32.mrb[98].mxu0 }
 0x51e   : > { %v3108_v59 = vpop.f32.mrb[99].mxu0 }
 0x51f   : > { %v2278_v63 = vmul.f32 %v3106_v14, %v4843_v30  ;;  %v3109_v58 = vadd.f32 %v3108_v59, %v3107_v28 }
 0x521   : > { %v2342_v17 = vadd.f32 %v2310_v32, %v2278_v63  ;;  %v2279_v48 = vmul.f32 %v3109_v58, %v4843_v30 }
 0x523   : > { %v2343_v0 = vadd.f32 %v2311_v50, %v2279_v48  ;;  %v3110_v21 = vpop.f32.mrb[100].mxu0 }
 0x524   : > { %v3111_v56 = vpop.f32.mrb[101].mxu0 }
 0x525   : > { %v2864_v55 = vpack.c.bf16 %v2343_v0, %v2342_v17  ;;  %v3112_v22 = vadd.f32 %v3111_v56, %v3110_v21  ;;  %v3113_v8 = vpop.f32.mrb[102].mxu0 }
 0x526   : > { %v3114_v61 = vpop.f32.mrb[103].mxu0 }
 0x527   : > { %2892 = vst [vmem:[%s4853_s23 + $0x60] sm:$0xff] %v2864_v55   ;;  %v2280_v62 = vmul.f32 %v3112_v22, %v4843_v30  ;;  %v3115_v47 = vadd.f32 %v3114_v61, %v3113_v8 }
 0x529   : > { %v2344_v29 = vadd.f32 %v2312_v24, %v2280_v62  ;;  %v2281_v33 = vmul.f32 %v3115_v47, %v4843_v30 }
 0x52b   : > { %v2345_v49 = vadd.f32 %v2313_v20, %v2281_v33  ;;  %v3116_v4 = vpop.f32.mrb[104].mxu0 }
 0x52c   : > { %v3117_v3 = vpop.f32.mrb[105].mxu0 }
 0x52d   : > { %v2869_v25 = vpack.c.bf16 %v2345_v49, %v2344_v29  ;;  %v3118_v1 = vadd.f32 %v3117_v3, %v3116_v4  ;;  %v3119_v5 = vpop.f32.mrb[106].mxu0 }
 0x52e   : > { %v3120_v31 = vpop.f32.mrb[107].mxu0 }
 0x52f   : > { %2893 = vst [vmem:[%s4853_s23 + $0x68] sm:$0xff] %v2869_v25   ;;  %v2282_v43 = vmul.f32 %v3118_v1, %v4843_v30  ;;  %v3121_v38 = vadd.f32 %v3120_v31, %v3119_v5 }
 0x531   : > { %v2346_v13 = vadd.f32 %v2314_v36, %v2282_v43  ;;  %v2283_v10 = vmul.f32 %v3121_v38, %v4843_v30 }
 0x533   : > { %v2347_v37 = vadd.f32 %v2315_v45, %v2283_v10  ;;  %v3122_v44 = vpop.f32.mrb[108].mxu0 }
 0x534   : > { %v3123_v42 = vpop.f32.mrb[109].mxu0 }
 0x535   : > { %v2874_v2 = vpack.c.bf16 %v2347_v37, %v2346_v13  ;;  %v3124_v35 = vadd.f32 %v3123_v42, %v3122_v44  ;;  %v3125_v51 = vpop.f32.mrb[110].mxu0 }
 0x536   : > { %v3126_v60 = vpop.f32.mrb[111].mxu0 }
 0x537   : > { %2894 = vst [vmem:[%s4853_s23 + $0x70] sm:$0xff] %v2874_v2   ;;  %v2284_v16 = vmul.f32 %v3124_v35, %v4843_v30  ;;  %v3127_v11 = vadd.f32 %v3126_v60, %v3125_v51 }
 0x539   : > { %v2348_v7 = vadd.f32 %v2316_v15, %v2284_v16  ;;  %v2285_v41 = vmul.f32 %v3127_v11, %v4843_v30 }
 0x53b   : > { %v2349_v9 = vadd.f32 %v2317_v18, %v2285_v41 }
 0x53d   : > { %v2879_v39 = vpack.c.bf16 %v2349_v9, %v2348_v7 }
 0x53f   : > { %2895 = vst [vmem:[%s4853_s23 + $0x78] sm:$0xff] %v2879_v39  }
 0x540 PF: > { %s21_s11 = sadd.s32 1, %s3574_s11  }
 0x541   : > { %p18_p4 = scmp.ge.s32.totalorder %s21_s11, 4  }
 0x543   :  { %20 = sbr.rel (!%p18_p4) target bundleno = 2 (0x2), region = 94 }

</bundles_post_ra>
